<compile_context>
chip_gen: v6e
topology: v6e:2x2x1
jax: 0.10.0
libtpu: 0.0.40
codegen_flags: <defaults>
</compile_context>

<pallas_src>
import functools
import math

import jax
import jax.numpy as jnp
import numpy as np
from jax.experimental import pallas as pl
from jax.experimental.pallas import tpu as pltpu


def _layer_norm(x, w, b, d_real, eps=1e-5):
    # Padded feature columns of x are zero and w/b are zero there, so dividing the
    # raw sums by the REAL feature count and using E[x^2]-mu^2 reproduces the
    # unpadded LayerNorm exactly and keeps padded output columns at zero.
    inv_d = 1.0 / d_real
    mu = jnp.sum(x, axis=-1, keepdims=True) * inv_d
    var = jnp.sum(x * x, axis=-1, keepdims=True) * inv_d - mu * mu
    return (x - mu) * jax.lax.rsqrt(var + eps) * w + b


def _encoder_layer_kernel(src_ref, in_w_ref, in_b_ref, op_w_ref, op_b_ref,
                          l1_w_ref, l1_b_ref, l2_w_ref, l2_b_ref,
                          ln1_w_ref, ln1_b_ref, ln2_w_ref, ln2_b_ref,
                          g_ref, o_ref, hs_ref, *, n_head, d_real, ff_chunk):
    BT, S, Dm = src_ref.shape
    T = BT * S
    Dh = in_w_ref.shape[1] // 3          # padded concatenated head dim
    hd_p = Dh // n_head                  # padded per-head dim
    FFp = l1_w_ref.shape[1]

    # NOTE: when B % block_b != 0 the last grid step computes on out-of-range rows;
    # every op here is per-token / per-sequence, so padded rows never contaminate
    # real outputs and their writes are dropped by the pipeline.
    x2 = src_ref[...].astype(jnp.float32).reshape(T, Dm)
    x_b = x2.astype(jnp.bfloat16)

    # ---- qkv projection (1/sqrt(hd) pre-folded into the q weights/bias) ----
    qkv = jnp.dot(x_b, in_w_ref[...], preferred_element_type=jnp.float32) + in_b_ref[...]
    # keep only bf16 copies live past this point (the f32 (T,3Dh) tensor dies here)
    q = qkv[:, 0 * Dh:1 * Dh].astype(jnp.bfloat16)
    k = qkv[:, 1 * Dh:2 * Dh].astype(jnp.bfloat16)
    v = qkv[:, 2 * Dh:3 * Dh].astype(jnp.bfloat16)

    # ---- multi-head self-attention (no masks, eval mode) ----
    # Each head's output lands in the head-major VMEM slab hs_ref so the output
    # projection below is a single full-depth (K = Dh) MXU matmul.
    # TODO(synk): grouping 2+ heads per MXU operand (>=128-lane batched dot_general)
    # would further improve MXU width utilisation when hd_p < 128.
    for h in range(n_head):                               # static -> unrolled
        sl = slice(h * hd_p, (h + 1) * hd_p)
        qh = q[:, sl].reshape(BT, S, hd_p)
        kh = k[:, sl].reshape(BT, S, hd_p)
        vh = v[:, sl].reshape(BT, S, hd_p)
        s = jnp.einsum('bqd,bkd->bqk', qh, kh, preferred_element_type=jnp.float32)
        s = s - jnp.max(s, axis=-1, keepdims=True)
        p = jnp.exp(s)
        inv = pl.reciprocal(jnp.sum(p, axis=-1, keepdims=True), approx=True)
        head = jnp.einsum('bqk,bkd->bqd', p.astype(jnp.bfloat16), vh,
                          preferred_element_type=jnp.float32) * inv
        hs_ref[:, sl] = head.reshape(T, hd_p).astype(jnp.bfloat16)

    # ---- single output projection + bias ----
    attn = jnp.dot(hs_ref[...], op_w_ref[...],
                   preferred_element_type=jnp.float32) + op_b_ref[...]

    # ---- residual + LayerNorm1 (f32 statistics) ----
    x = _layer_norm(x2 + attn, ln1_w_ref[...], ln1_b_ref[...], d_real)
    xb = x.astype(jnp.bfloat16)

    # ---- feed-forward (relu), tiled over the FF axis to bound VMEM residency ----
    ff = None
    for c0 in range(0, FFp, ff_chunk):                    # static -> unrolled
        c1 = min(c0 + ff_chunk, FFp)
        hid = jnp.maximum(
            jnp.dot(xb, l1_w_ref[:, c0:c1], preferred_element_type=jnp.float32)
            + l1_b_ref[:, c0:c1], 0.0)
        part = jnp.dot(hid.astype(jnp.bfloat16), l2_w_ref[c0:c1, :],
                       preferred_element_type=jnp.float32)
        ff = part if ff is None else ff + part
    ff = ff + l2_b_ref[...]

    # ---- residual + LayerNorm2 (f32) ----
    out1 = _layer_norm(x + ff, ln2_w_ref[...], ln2_b_ref[...], d_real).reshape(BT, S, Dm)

    # ---- identity-initialized gate: g*out1 + (1-g)*src, g = sigmoid(weight) from SMEM ----
    g = g_ref[0]
    o_ref[...] = (g * out1 + (1.0 - g) * src_ref[...].astype(jnp.float32)).astype(o_ref.dtype)


def _round_up(x, m):
    return (x + m - 1) // m * m


def prepare_params(params, n_head):
    """One-time parameter prep (call once, reuse across calls):
    pads to lane-friendly sizes, folds the attention scale into the q projection,
    reorganises op_w head-major, and casts the matmul weights to bf16."""
    (in_w, in_b, op_w, op_b, l1_w, l1_b, l2_w, l2_b,
     ln1_w, ln1_b, ln2_w, ln2_b, gate) = params
    D = in_w.shape[0]
    FF = l1_w.shape[1]
    H = n_head
    assert D % H == 0
    hd = D // H

    Dm = _round_up(D, 128)                       # padded model dim (end-padded)
    step = 128 // math.gcd(H, 128)
    hd_p = _round_up(hd, step)                   # padded per-head dim
    Dh = H * hd_p                                # padded concatenated head dim (%128==0)
    FFp = _round_up(FF, 128)
    scale = 1.0 / math.sqrt(hd)

    def pad_model_cols(x):                       # (..., D) -> (..., Dm)
        return jnp.pad(x, [(0, 0)] * (x.ndim - 1) + [(0, Dm - D)])

    def pad_head_cols(x):                        # (..., H*hd) -> (..., H*hd_p), interleaved
        lead = x.shape[:-1]
        x = x.reshape(lead + (H, hd))
        x = jnp.pad(x, [(0, 0)] * (x.ndim - 1) + [(0, hd_p - hd)])
        return x.reshape(lead + (Dh,))

    wq, wk, wv = in_w[:, :D], in_w[:, D:2 * D], in_w[:, 2 * D:]
    bq, bk, bv = in_b[..., :D], in_b[..., D:2 * D], in_b[..., 2 * D:]
    wq = wq * scale                              # fold 1/sqrt(hd) into q projection
    bq = bq * scale

    def prep_qkv_w(w):                           # (D, D) -> (Dm, Dh)
        w = pad_head_cols(w)
        return jnp.pad(w, ((0, Dm - D), (0, 0)))

    in_w_p = jnp.concatenate([prep_qkv_w(wq), prep_qkv_w(wk), prep_qkv_w(wv)],
                             axis=1).astype(jnp.bfloat16)                   # (Dm, 3Dh)
    in_b_p = jnp.concatenate([pad_head_cols(bq), pad_head_cols(bk),
                              pad_head_cols(bv)], axis=-1).astype(jnp.float32)

    op_w_p = op_w.reshape(H, hd, D)
    op_w_p = jnp.pad(op_w_p, ((0, 0), (0, hd_p - hd), (0, Dm - D)))
    op_w_p = op_w_p.reshape(Dh, Dm).astype(jnp.bfloat16)                    # (Dh, Dm)
    op_b_p = pad_model_cols(op_b).astype(jnp.float32)

    l1_w_p = jnp.pad(l1_w, ((0, Dm - D), (0, FFp - FF))).astype(jnp.bfloat16)
    l1_b_p = jnp.pad(l1_b, ((0, 0), (0, FFp - FF))).astype(jnp.float32)
    l2_w_p = jnp.pad(l2_w, ((0, FFp - FF), (0, Dm - D))).astype(jnp.bfloat16)
    l2_b_p = pad_model_cols(l2_b).astype(jnp.float32)

    ln1_w_p = pad_model_cols(ln1_w).astype(jnp.float32)   # zero on padded cols -> pad stays 0
    ln1_b_p = pad_model_cols(ln1_b).astype(jnp.float32)
    ln2_w_p = pad_model_cols(ln2_w).astype(jnp.float32)
    ln2_b_p = pad_model_cols(ln2_b).astype(jnp.float32)

    g = jax.nn.sigmoid(gate).reshape(1).astype(jnp.float32)

    return dict(
        weights=[in_w_p, in_b_p, op_w_p, op_b_p, l1_w_p, l1_b_p, l2_w_p, l2_b_p,
                 ln1_w_p, ln1_b_p, ln2_w_p, ln2_b_p],
        gate=g, d_model=D, n_head=H, d_model_padded=Dm, d_heads_padded=Dh)


def identity_init_transformer_encoder_layer(src, prepared, *, block_b=None,
                                            ff_chunk=512, vmem_limit_bytes=None,
                                            single_buffer_weights=True):
    """src: (B, S, D) float32;  prepared: output of prepare_params (call once)."""
    weights = prepared["weights"]
    g = prepared["gate"]
    D = prepared["d_model"]
    H = prepared["n_head"]
    Dm = prepared["d_model_padded"]
    Dh = prepared["d_heads_padded"]
    B, S, D_in = src.shape
    assert D_in == D
    FFp = weights[4].shape[1]

    src_p = src if Dm == D else jnp.pad(src, ((0, 0), (0, 0), (0, Dm - D)))

    if block_b is None:
        # ~1K tokens per grid step, but keep >=2 steps so both v7x TensorCores get work.
        block_b = max(1, min(B, 1024 // max(S, 1)))
        if B >= 2:
            block_b = min(block_b, max(1, B // 2))
    block_b = max(1, min(block_b, B))
    grid = (pl.cdiv(B, block_b),)

    if vmem_limit_bytes is None:
        try:
            cap = int(pltpu.get_tpu_info().vmem_capacity_bytes)
        except Exception:
            cap = 64 * 1024 * 1024
        vmem_limit_bytes = min(cap - (4 << 20), 112 << 20)

    ff_chunk = min(FFp, max(128, (ff_chunk // 128) * 128))
    T = block_b * S
    hd_p = Dh // H

    flops = (2 * B * S * Dm * 3 * Dh          # qkv projection
             + 4 * B * S * S * Dh             # scores + p@v
             + 2 * B * S * Dh * Dm            # out projection
             + 4 * B * S * Dm * FFp)          # feed-forward
    transcendentals = B * H * S * S + B * H * S + 4 * B * S
    bytes_accessed = (2 * B * S * Dm * 4
                      + sum(int(w.size) * w.dtype.itemsize for w in weights) + 4)

    kern = functools.partial(_encoder_layer_kernel, n_head=H, d_real=D,
                             ff_chunk=ff_chunk)

    def _resident(arr, single):
        nd = arr.ndim
        idx = lambda b, _nd=nd: (0,) * _nd
        if single:
            # resident weights: single-buffered (constant index map, fetched once)
            return pl.BlockSpec(arr.shape, idx, pipeline_mode=pl.Buffered(1))
        return pl.BlockSpec(arr.shape, idx)

    def _build(single):
        in_specs = ([pl.BlockSpec((block_b, S, Dm), lambda b: (b, 0, 0))]
                    + [_resident(w, single) for w in weights]
                    + [pl.BlockSpec(memory_space=pltpu.MemorySpace.SMEM)])
        return pl.pallas_call(
            kern,
            out_shape=jax.ShapeDtypeStruct((B, S, Dm), src.dtype),
            grid=grid,
            in_specs=in_specs,
            out_specs=pl.BlockSpec((block_b, S, Dm), lambda b: (b, 0, 0)),
            scratch_shapes=[pltpu.VMEM((T, Dh), jnp.bfloat16)],   # head-major slab
            compiler_params=pltpu.CompilerParams(
                dimension_semantics=("parallel",),
                vmem_limit_bytes=vmem_limit_bytes),
            cost_estimate=pl.CostEstimate(flops=flops,
                                          transcendentals=transcendentals,
                                          bytes_accessed=bytes_accessed),
        )

    try:
        out = _build(single_buffer_weights)(src_p, *weights, g)
    except Exception:
        if not single_buffer_weights:
            raise
        # Fallback in case Buffered(1) is rejected by this Pallas build.
        out = _build(False)(src_p, *weights, g)

    return out if Dm == D else out[..., :D]


def init_params(key, d_model, dim_feedforward):
    """Deterministic synthetic parameters. Linear weights are (in, out) i.e. W.T."""
    ks = jax.random.split(key, 8)
    s = 0.05
    in_w = jax.random.normal(ks[0], (d_model, 3 * d_model), jnp.float32) * s
    in_b = jax.random.normal(ks[1], (1, 3 * d_model), jnp.float32) * s
    op_w = jax.random.normal(ks[2], (d_model, d_model), jnp.float32) * s
    op_b = jax.random.normal(ks[3], (1, d_model), jnp.float32) * s
    l1_w = jax.random.normal(ks[4], (d_model, dim_feedforward), jnp.float32) * s
    l1_b = jax.random.normal(ks[5], (1, dim_feedforward), jnp.float32) * s
    l2_w = jax.random.normal(ks[6], (dim_feedforward, d_model), jnp.float32) * s
    l2_b = jax.random.normal(ks[7], (1, d_model), jnp.float32) * s
    ln1_w = jnp.ones((1, d_model), jnp.float32)
    ln1_b = jnp.zeros((1, d_model), jnp.float32)
    ln2_w = jnp.ones((1, d_model), jnp.float32)
    ln2_b = jnp.zeros((1, d_model), jnp.float32)
    gate = jnp.full((1, 1), -5.0, jnp.float32)   # nn.Parameter(torch.tensor([-5.0]))
    return [in_w, in_b, op_w, op_b, l1_w, l1_b, l2_w, l2_b,
            ln1_w, ln1_b, ln2_w, ln2_b, gate]


def reference(src, params, n_head):
    """Pure-JAX f32 reference of the same forward pass (for correctness check)."""
    (in_w, in_b, op_w, op_b, l1_w, l1_b, l2_w, l2_b,
     ln1_w, ln1_b, ln2_w, ln2_b, gate) = params
    B, S, D = src.shape
    hd = D // n_head
    x2 = src.reshape(B * S, D)
    qkv = x2 @ in_w + in_b
    q, k, v = qkv[:, :D], qkv[:, D:2 * D], qkv[:, 2 * D:]

    def split_heads(t):
        return t.reshape(B, S, n_head, hd).transpose(0, 2, 1, 3)

    qh, kh, vh = split_heads(q), split_heads(k), split_heads(v)
    s = jnp.einsum('bhqd,bhkd->bhqk', qh, kh) / math.sqrt(hd)
    p = jax.nn.softmax(s, axis=-1)
    a = jnp.einsum('bhqk,bhkd->bhqd', p, vh).transpose(0, 2, 1, 3).reshape(B * S, D)
    a = a @ op_w + op_b

    def ln(x, w, b):
        mu = x.mean(-1, keepdims=True)
        var = ((x - mu) ** 2).mean(-1, keepdims=True)
        return (x - mu) / jnp.sqrt(var + 1e-5) * w + b

    x = ln(x2 + a, ln1_w, ln1_b)
    ff = jnp.maximum(x @ l1_w + l1_b, 0.0) @ l2_w + l2_b
    out1 = ln(x + ff, ln2_w, ln2_b).reshape(B, S, D)
    g = jax.nn.sigmoid(gate).reshape(1, 1, 1)
    return g * out1 + (1.0 - g) * src


if __name__ == "__main__":
    B, S, D, H, FF = 2, 8, 32, 4, 2048   # batch, seq, d_model, n_head, dim_feedforward
    key = jax.random.PRNGKey(0)
    k_src, k_par = jax.random.split(key)
    src = jax.random.normal(k_src, (B, S, D), jnp.float32)
    params = init_params(k_par, D, FF)

    # --- test 1: as-initialised gate (sigmoid(-5)) ---
    prepared = prepare_params(params, H)
    out = jax.block_until_ready(identity_init_transformer_encoder_layer(src, prepared))
    ref = reference(src, params, H)
    np.testing.assert_allclose(np.asarray(out), np.asarray(ref), rtol=1e-3, atol=1e-3)

    # --- test 2: gate = 0.0 (g = 0.5) so the encoder-layer path is NOT damped 150x;
    #     validates the attention/FF path itself (looser tol for bf16 matmul operands).
    params_g0 = params[:-1] + [jnp.zeros_like(params[-1])]
    prepared_g0 = prepare_params(params_g0, H)
    out_g0 = jax.block_until_ready(
        identity_init_transformer_encoder_layer(src, prepared_g0))
    ref_g0 = reference(src, params_g0, H)
    np.testing.assert_allclose(np.asarray(out_g0), np.asarray(ref_g0),
                               rtol=2e-2, atol=2e-2)

    # TODO(synk): dropout (p=0.1) omitted — eval-mode identity semantics implemented.
    print("KERNEL_OK")
</pallas_src>

<mosaic_0001>
module attributes {stable_mosaic.version = 11 : i64} {
  func.func @_encoder_layer_kernel(%arg0: i32, %arg1: memref<1x8x128xf32, #tpu.memory_space<vmem>>, %arg2: memref<128x384xbf16, #tpu.memory_space<vmem>>, %arg3: memref<1x384xf32, #tpu.memory_space<vmem>>, %arg4: memref<128x128xbf16, #tpu.memory_space<vmem>>, %arg5: memref<1x128xf32, #tpu.memory_space<vmem>>, %arg6: memref<128x2048xbf16, #tpu.memory_space<vmem>>, %arg7: memref<1x2048xf32, #tpu.memory_space<vmem>>, %arg8: memref<2048x128xbf16, #tpu.memory_space<vmem>>, %arg9: memref<1x128xf32, #tpu.memory_space<vmem>>, %arg10: memref<1x128xf32, #tpu.memory_space<vmem>>, %arg11: memref<1x128xf32, #tpu.memory_space<vmem>>, %arg12: memref<1x128xf32, #tpu.memory_space<vmem>>, %arg13: memref<1x128xf32, #tpu.memory_space<vmem>>, %arg14: memref<1xf32, #tpu.memory_space<smem>>, %arg15: memref<1x8x128xf32, #tpu.memory_space<vmem>>, %arg16: memref<8x128xbf16, #tpu.memory_space<vmem>>) attributes {dimension_semantics = [#tpu.dimension_semantics<parallel>], iteration_bounds = array<i64: 2>, scalar_prefetch = 0 : i64, scratch_operands = 1 : i64, tpu.core_type = #tpu.core_type<tc>, window_params = [{transform_indices = @transform_0, window_bounds = array<i64: 1, 8, 128>}, {pipeline_mode = #tpu.pipeline_mode<synchronous>, transform_indices = @transform_1, window_bounds = array<i64: 128, 384>}, {pipeline_mode = #tpu.pipeline_mode<synchronous>, transform_indices = @transform_2, window_bounds = array<i64: 1, 384>}, {pipeline_mode = #tpu.pipeline_mode<synchronous>, transform_indices = @transform_3, window_bounds = array<i64: 128, 128>}, {pipeline_mode = #tpu.pipeline_mode<synchronous>, transform_indices = @transform_4, window_bounds = array<i64: 1, 128>}, {pipeline_mode = #tpu.pipeline_mode<synchronous>, transform_indices = @transform_5, window_bounds = array<i64: 128, 2048>}, {pipeline_mode = #tpu.pipeline_mode<synchronous>, transform_indices = @transform_6, window_bounds = array<i64: 1, 2048>}, {pipeline_mode = #tpu.pipeline_mode<synchronous>, transform_indices = @transform_7, window_bounds = array<i64: 2048, 128>}, {pipeline_mode = #tpu.pipeline_mode<synchronous>, transform_indices = @transform_8, window_bounds = array<i64: 1, 128>}, {pipeline_mode = #tpu.pipeline_mode<synchronous>, transform_indices = @transform_9, window_bounds = array<i64: 1, 128>}, {pipeline_mode = #tpu.pipeline_mode<synchronous>, transform_indices = @transform_10, window_bounds = array<i64: 1, 128>}, {pipeline_mode = #tpu.pipeline_mode<synchronous>, transform_indices = @transform_11, window_bounds = array<i64: 1, 128>}, {pipeline_mode = #tpu.pipeline_mode<synchronous>, transform_indices = @transform_12, window_bounds = array<i64: 1, 128>}, {transform_indices = @transform_13, window_bounds = array<i64: 1>}, {transform_indices = @transform_14, window_bounds = array<i64: 1, 8, 128>}]} {
    %c0 = arith.constant 0 : index
    %c0_0 = arith.constant 0 : index
    %c0_1 = arith.constant 0 : index
    %0 = vector.load %arg1[%c0, %c0_0, %c0_1] : memref<1x8x128xf32, #tpu.memory_space<vmem>>, vector<1x8x128xf32>
    %1 = vector.shape_cast %0 : vector<1x8x128xf32> to vector<8x128xf32>
    %2 = arith.truncf %1 : vector<8x128xf32> to vector<8x128xbf16>
    %c0_2 = arith.constant 0 : index
    %c0_3 = arith.constant 0 : index
    %3 = vector.load %arg2[%c0_2, %c0_3] : memref<128x384xbf16, #tpu.memory_space<vmem>>, vector<128x384xbf16>
    %cst = arith.constant dense<0.000000e+00> : vector<8x384xf32>
    %4 = tpu.matmul %2, %3, %cst {dimension_numbers = #tpu.dot_dimension_numbers<[1], [0], [0], [1], [0, 0, 1, 1], [], []>} : vector<8x128xbf16>, vector<128x384xbf16>, vector<8x384xf32> -> vector<8x384xf32>
    %c0_4 = arith.constant 0 : index
    %c0_5 = arith.constant 0 : index
    %5 = vector.load %arg3[%c0_4, %c0_5] : memref<1x384xf32, #tpu.memory_space<vmem>>, vector<1x384xf32>
    %6 = vector.broadcast %5 : vector<1x384xf32> to vector<8x384xf32>
    %7 = arith.addf %4, %6 : vector<8x384xf32>
    %8 = vector.extract_strided_slice %7 {offsets = [0, 0], sizes = [8, 128], strides = [1, 1]} : vector<8x384xf32> to vector<8x128xf32>
    %9 = arith.truncf %8 : vector<8x128xf32> to vector<8x128xbf16>
    %10 = vector.extract_strided_slice %7 {offsets = [0, 128], sizes = [8, 128], strides = [1, 1]} : vector<8x384xf32> to vector<8x128xf32>
    %11 = arith.truncf %10 : vector<8x128xf32> to vector<8x128xbf16>
    %12 = vector.extract_strided_slice %7 {offsets = [0, 256], sizes = [8, 128], strides = [1, 1]} : vector<8x384xf32> to vector<8x128xf32>
    %13 = arith.truncf %12 : vector<8x128xf32> to vector<8x128xbf16>
    %14 = vector.extract_strided_slice %9 {offsets = [0, 0], sizes = [8, 32], strides = [1, 1]} : vector<8x128xbf16> to vector<8x32xbf16>
    %15 = vector.shape_cast %14 : vector<8x32xbf16> to vector<1x8x32xbf16>
    %16 = vector.extract_strided_slice %11 {offsets = [0, 0], sizes = [8, 32], strides = [1, 1]} : vector<8x128xbf16> to vector<8x32xbf16>
    %17 = vector.shape_cast %16 : vector<8x32xbf16> to vector<1x8x32xbf16>
    %18 = vector.extract_strided_slice %13 {offsets = [0, 0], sizes = [8, 32], strides = [1, 1]} : vector<8x128xbf16> to vector<8x32xbf16>
    %19 = vector.shape_cast %18 : vector<8x32xbf16> to vector<1x8x32xbf16>
    "tpu.trace_start"() <{level = 10 : i32, message = "bqd,bkd->bqk"}> : () -> ()
    %cst_6 = arith.constant dense<0.000000e+00> : vector<1x8x8xf32>
    %20 = tpu.matmul %15, %17, %cst_6 {dimension_numbers = #tpu.dot_dimension_numbers<[2], [2], [1], [1], [0, 0, 0, 1, 1, 1], [0], [0]>} : vector<1x8x32xbf16>, vector<1x8x32xbf16>, vector<1x8x8xf32> -> vector<1x8x8xf32>
    "tpu.trace_stop"() : () -> ()
    %cst_7 = arith.constant dense<0xFF800000> : vector<1x8xf32>
    %21 = vector.multi_reduction <maximumf>, %20, %cst_7 [2] : vector<1x8x8xf32> to vector<1x8xf32>
    %22 = vector.shape_cast %21 : vector<1x8xf32> to vector<1x8x1xf32>
    %23 = vector.broadcast %22 : vector<1x8x1xf32> to vector<1x8x8xf32>
    %24 = arith.subf %20, %23 : vector<1x8x8xf32>
    %25 = math.exp %24 : vector<1x8x8xf32>
    %cst_8 = arith.constant dense<0.000000e+00> : vector<1x8xf32>
    %26 = vector.multi_reduction <add>, %25, %cst_8 [2] : vector<1x8x8xf32> to vector<1x8xf32>
    %27 = vector.shape_cast %26 : vector<1x8xf32> to vector<1x8x1xf32>
    %28 = tpu.reciprocal %27 {approx = true} : vector<1x8x1xf32> -> vector<1x8x1xf32>
    %29 = arith.truncf %25 : vector<1x8x8xf32> to vector<1x8x8xbf16>
    "tpu.trace_start"() <{level = 10 : i32, message = "bqk,bkd->bqd"}> : () -> ()
    %cst_9 = arith.constant dense<0.000000e+00> : vector<1x8x32xf32>
    %30 = tpu.matmul %29, %19, %cst_9 {dimension_numbers = #tpu.dot_dimension_numbers<[2], [1], [1], [2], [0, 0, 0, 1, 1, 2], [0], [0]>} : vector<1x8x8xbf16>, vector<1x8x32xbf16>, vector<1x8x32xf32> -> vector<1x8x32xf32>
    "tpu.trace_stop"() : () -> ()
    %31 = vector.broadcast %28 : vector<1x8x1xf32> to vector<1x8x32xf32>
    %32 = arith.mulf %30, %31 : vector<1x8x32xf32>
    %33 = vector.shape_cast %32 : vector<1x8x32xf32> to vector<8x32xf32>
    %34 = arith.truncf %33 : vector<8x32xf32> to vector<8x32xbf16>
    %c0_10 = arith.constant 0 : index
    %c0_11 = arith.constant 0 : index
    %35 = vector.load %arg16[%c0_10, %c0_11] : memref<8x128xbf16, #tpu.memory_space<vmem>>, vector<8x32xbf16>
    tpu.vector_store %arg16[%c0_10, %c0_11], %34 {strides = array<i32>} : memref<8x128xbf16, #tpu.memory_space<vmem>>, vector<8x32xbf16>,
    %36 = vector.extract_strided_slice %9 {offsets = [0, 32], sizes = [8, 32], strides = [1, 1]} : vector<8x128xbf16> to vector<8x32xbf16>
    %37 = vector.shape_cast %36 : vector<8x32xbf16> to vector<1x8x32xbf16>
    %38 = vector.extract_strided_slice %11 {offsets = [0, 32], sizes = [8, 32], strides = [1, 1]} : vector<8x128xbf16> to vector<8x32xbf16>
    %39 = vector.shape_cast %38 : vector<8x32xbf16> to vector<1x8x32xbf16>
    %40 = vector.extract_strided_slice %13 {offsets = [0, 32], sizes = [8, 32], strides = [1, 1]} : vector<8x128xbf16> to vector<8x32xbf16>
    %41 = vector.shape_cast %40 : vector<8x32xbf16> to vector<1x8x32xbf16>
    "tpu.trace_start"() <{level = 10 : i32, message = "bqd,bkd->bqk"}> : () -> ()
    %cst_12 = arith.constant dense<0.000000e+00> : vector<1x8x8xf32>
    %42 = tpu.matmul %37, %39, %cst_12 {dimension_numbers = #tpu.dot_dimension_numbers<[2], [2], [1], [1], [0, 0, 0, 1, 1, 1], [0], [0]>} : vector<1x8x32xbf16>, vector<1x8x32xbf16>, vector<1x8x8xf32> -> vector<1x8x8xf32>
    "tpu.trace_stop"() : () -> ()
    %cst_13 = arith.constant dense<0xFF800000> : vector<1x8xf32>
    %43 = vector.multi_reduction <maximumf>, %42, %cst_13 [2] : vector<1x8x8xf32> to vector<1x8xf32>
    %44 = vector.shape_cast %43 : vector<1x8xf32> to vector<1x8x1xf32>
    %45 = vector.broadcast %44 : vector<1x8x1xf32> to vector<1x8x8xf32>
    %46 = arith.subf %42, %45 : vector<1x8x8xf32>
    %47 = math.exp %46 : vector<1x8x8xf32>
    %cst_14 = arith.constant dense<0.000000e+00> : vector<1x8xf32>
    %48 = vector.multi_reduction <add>, %47, %cst_14 [2] : vector<1x8x8xf32> to vector<1x8xf32>
    %49 = vector.shape_cast %48 : vector<1x8xf32> to vector<1x8x1xf32>
    %50 = tpu.reciprocal %49 {approx = true} : vector<1x8x1xf32> -> vector<1x8x1xf32>
    %51 = arith.truncf %47 : vector<1x8x8xf32> to vector<1x8x8xbf16>
    "tpu.trace_start"() <{level = 10 : i32, message = "bqk,bkd->bqd"}> : () -> ()
    %cst_15 = arith.constant dense<0.000000e+00> : vector<1x8x32xf32>
    %52 = tpu.matmul %51, %41, %cst_15 {dimension_numbers = #tpu.dot_dimension_numbers<[2], [1], [1], [2], [0, 0, 0, 1, 1, 2], [0], [0]>} : vector<1x8x8xbf16>, vector<1x8x32xbf16>, vector<1x8x32xf32> -> vector<1x8x32xf32>
    "tpu.trace_stop"() : () -> ()
    %53 = vector.broadcast %50 : vector<1x8x1xf32> to vector<1x8x32xf32>
    %54 = arith.mulf %52, %53 : vector<1x8x32xf32>
    %55 = vector.shape_cast %54 : vector<1x8x32xf32> to vector<8x32xf32>
    %56 = arith.truncf %55 : vector<8x32xf32> to vector<8x32xbf16>
    %c0_16 = arith.constant 0 : index
    %c32 = arith.constant 32 : index
    %57 = vector.load %arg16[%c0_16, %c32] : memref<8x128xbf16, #tpu.memory_space<vmem>>, vector<8x32xbf16>
    tpu.vector_store %arg16[%c0_16, %c32], %56 {strides = array<i32>} : memref<8x128xbf16, #tpu.memory_space<vmem>>, vector<8x32xbf16>,
    %58 = vector.extract_strided_slice %9 {offsets = [0, 64], sizes = [8, 32], strides = [1, 1]} : vector<8x128xbf16> to vector<8x32xbf16>
    %59 = vector.shape_cast %58 : vector<8x32xbf16> to vector<1x8x32xbf16>
    %60 = vector.extract_strided_slice %11 {offsets = [0, 64], sizes = [8, 32], strides = [1, 1]} : vector<8x128xbf16> to vector<8x32xbf16>
    %61 = vector.shape_cast %60 : vector<8x32xbf16> to vector<1x8x32xbf16>
    %62 = vector.extract_strided_slice %13 {offsets = [0, 64], sizes = [8, 32], strides = [1, 1]} : vector<8x128xbf16> to vector<8x32xbf16>
    %63 = vector.shape_cast %62 : vector<8x32xbf16> to vector<1x8x32xbf16>
    "tpu.trace_start"() <{level = 10 : i32, message = "bqd,bkd->bqk"}> : () -> ()
    %cst_17 = arith.constant dense<0.000000e+00> : vector<1x8x8xf32>
    %64 = tpu.matmul %59, %61, %cst_17 {dimension_numbers = #tpu.dot_dimension_numbers<[2], [2], [1], [1], [0, 0, 0, 1, 1, 1], [0], [0]>} : vector<1x8x32xbf16>, vector<1x8x32xbf16>, vector<1x8x8xf32> -> vector<1x8x8xf32>
    "tpu.trace_stop"() : () -> ()
    %cst_18 = arith.constant dense<0xFF800000> : vector<1x8xf32>
    %65 = vector.multi_reduction <maximumf>, %64, %cst_18 [2] : vector<1x8x8xf32> to vector<1x8xf32>
    %66 = vector.shape_cast %65 : vector<1x8xf32> to vector<1x8x1xf32>
    %67 = vector.broadcast %66 : vector<1x8x1xf32> to vector<1x8x8xf32>
    %68 = arith.subf %64, %67 : vector<1x8x8xf32>
    %69 = math.exp %68 : vector<1x8x8xf32>
    %cst_19 = arith.constant dense<0.000000e+00> : vector<1x8xf32>
    %70 = vector.multi_reduction <add>, %69, %cst_19 [2] : vector<1x8x8xf32> to vector<1x8xf32>
    %71 = vector.shape_cast %70 : vector<1x8xf32> to vector<1x8x1xf32>
    %72 = tpu.reciprocal %71 {approx = true} : vector<1x8x1xf32> -> vector<1x8x1xf32>
    %73 = arith.truncf %69 : vector<1x8x8xf32> to vector<1x8x8xbf16>
    "tpu.trace_start"() <{level = 10 : i32, message = "bqk,bkd->bqd"}> : () -> ()
    %cst_20 = arith.constant dense<0.000000e+00> : vector<1x8x32xf32>
    %74 = tpu.matmul %73, %63, %cst_20 {dimension_numbers = #tpu.dot_dimension_numbers<[2], [1], [1], [2], [0, 0, 0, 1, 1, 2], [0], [0]>} : vector<1x8x8xbf16>, vector<1x8x32xbf16>, vector<1x8x32xf32> -> vector<1x8x32xf32>
    "tpu.trace_stop"() : () -> ()
    %75 = vector.broadcast %72 : vector<1x8x1xf32> to vector<1x8x32xf32>
    %76 = arith.mulf %74, %75 : vector<1x8x32xf32>
    %77 = vector.shape_cast %76 : vector<1x8x32xf32> to vector<8x32xf32>
    %78 = arith.truncf %77 : vector<8x32xf32> to vector<8x32xbf16>
    %c0_21 = arith.constant 0 : index
    %c64 = arith.constant 64 : index
    %79 = vector.load %arg16[%c0_21, %c64] : memref<8x128xbf16, #tpu.memory_space<vmem>>, vector<8x32xbf16>
    tpu.vector_store %arg16[%c0_21, %c64], %78 {strides = array<i32>} : memref<8x128xbf16, #tpu.memory_space<vmem>>, vector<8x32xbf16>,
    %80 = vector.extract_strided_slice %9 {offsets = [0, 96], sizes = [8, 32], strides = [1, 1]} : vector<8x128xbf16> to vector<8x32xbf16>
    %81 = vector.shape_cast %80 : vector<8x32xbf16> to vector<1x8x32xbf16>
    %82 = vector.extract_strided_slice %11 {offsets = [0, 96], sizes = [8, 32], strides = [1, 1]} : vector<8x128xbf16> to vector<8x32xbf16>
    %83 = vector.shape_cast %82 : vector<8x32xbf16> to vector<1x8x32xbf16>
    %84 = vector.extract_strided_slice %13 {offsets = [0, 96], sizes = [8, 32], strides = [1, 1]} : vector<8x128xbf16> to vector<8x32xbf16>
    %85 = vector.shape_cast %84 : vector<8x32xbf16> to vector<1x8x32xbf16>
    "tpu.trace_start"() <{level = 10 : i32, message = "bqd,bkd->bqk"}> : () -> ()
    %cst_22 = arith.constant dense<0.000000e+00> : vector<1x8x8xf32>
    %86 = tpu.matmul %81, %83, %cst_22 {dimension_numbers = #tpu.dot_dimension_numbers<[2], [2], [1], [1], [0, 0, 0, 1, 1, 1], [0], [0]>} : vector<1x8x32xbf16>, vector<1x8x32xbf16>, vector<1x8x8xf32> -> vector<1x8x8xf32>
    "tpu.trace_stop"() : () -> ()
    %cst_23 = arith.constant dense<0xFF800000> : vector<1x8xf32>
    %87 = vector.multi_reduction <maximumf>, %86, %cst_23 [2] : vector<1x8x8xf32> to vector<1x8xf32>
    %88 = vector.shape_cast %87 : vector<1x8xf32> to vector<1x8x1xf32>
    %89 = vector.broadcast %88 : vector<1x8x1xf32> to vector<1x8x8xf32>
    %90 = arith.subf %86, %89 : vector<1x8x8xf32>
    %91 = math.exp %90 : vector<1x8x8xf32>
    %cst_24 = arith.constant dense<0.000000e+00> : vector<1x8xf32>
    %92 = vector.multi_reduction <add>, %91, %cst_24 [2] : vector<1x8x8xf32> to vector<1x8xf32>
    %93 = vector.shape_cast %92 : vector<1x8xf32> to vector<1x8x1xf32>
    %94 = tpu.reciprocal %93 {approx = true} : vector<1x8x1xf32> -> vector<1x8x1xf32>
    %95 = arith.truncf %91 : vector<1x8x8xf32> to vector<1x8x8xbf16>
    "tpu.trace_start"() <{level = 10 : i32, message = "bqk,bkd->bqd"}> : () -> ()
    %cst_25 = arith.constant dense<0.000000e+00> : vector<1x8x32xf32>
    %96 = tpu.matmul %95, %85, %cst_25 {dimension_numbers = #tpu.dot_dimension_numbers<[2], [1], [1], [2], [0, 0, 0, 1, 1, 2], [0], [0]>} : vector<1x8x8xbf16>, vector<1x8x32xbf16>, vector<1x8x32xf32> -> vector<1x8x32xf32>
    "tpu.trace_stop"() : () -> ()
    %97 = vector.broadcast %94 : vector<1x8x1xf32> to vector<1x8x32xf32>
    %98 = arith.mulf %96, %97 : vector<1x8x32xf32>
    %99 = vector.shape_cast %98 : vector<1x8x32xf32> to vector<8x32xf32>
    %100 = arith.truncf %99 : vector<8x32xf32> to vector<8x32xbf16>
    %c0_26 = arith.constant 0 : index
    %c96 = arith.constant 96 : index
    %101 = vector.load %arg16[%c0_26, %c96] : memref<8x128xbf16, #tpu.memory_space<vmem>>, vector<8x32xbf16>
    tpu.vector_store %arg16[%c0_26, %c96], %100 {strides = array<i32>} : memref<8x128xbf16, #tpu.memory_space<vmem>>, vector<8x32xbf16>,
    %c0_27 = arith.constant 0 : index
    %c0_28 = arith.constant 0 : index
    %102 = vector.load %arg16[%c0_27, %c0_28] : memref<8x128xbf16, #tpu.memory_space<vmem>>, vector<8x128xbf16>
    %c0_29 = arith.constant 0 : index
    %c0_30 = arith.constant 0 : index
    %103 = vector.load %arg4[%c0_29, %c0_30] : memref<128x128xbf16, #tpu.memory_space<vmem>>, vector<128x128xbf16>
    %cst_31 = arith.constant dense<0.000000e+00> : vector<8x128xf32>
    %104 = tpu.matmul %102, %103, %cst_31 {dimension_numbers = #tpu.dot_dimension_numbers<[1], [0], [0], [1], [0, 0, 1, 1], [], []>} : vector<8x128xbf16>, vector<128x128xbf16>, vector<8x128xf32> -> vector<8x128xf32>
    %c0_32 = arith.constant 0 : index
    %c0_33 = arith.constant 0 : index
    %105 = vector.load %arg5[%c0_32, %c0_33] : memref<1x128xf32, #tpu.memory_space<vmem>>, vector<1x128xf32>
    %106 = vector.broadcast %105 : vector<1x128xf32> to vector<8x128xf32>
    %107 = arith.addf %104, %106 : vector<8x128xf32>
    %108 = arith.addf %1, %107 : vector<8x128xf32>
    %c0_34 = arith.constant 0 : index
    %c0_35 = arith.constant 0 : index
    %109 = vector.load %arg10[%c0_34, %c0_35] : memref<1x128xf32, #tpu.memory_space<vmem>>, vector<1x128xf32>
    %c0_36 = arith.constant 0 : index
    %c0_37 = arith.constant 0 : index
    %110 = vector.load %arg11[%c0_36, %c0_37] : memref<1x128xf32, #tpu.memory_space<vmem>>, vector<1x128xf32>
    %cst_38 = arith.constant dense<0.000000e+00> : vector<8xf32>
    %111 = vector.multi_reduction <add>, %108, %cst_38 [1] : vector<8x128xf32> to vector<8xf32>
    %112 = vector.shape_cast %111 : vector<8xf32> to vector<8x1xf32>
    %cst_39 = arith.constant 3.125000e-02 : f32
    %113 = vector.broadcast %cst_39 : f32 to vector<8x1xf32>
    %114 = arith.mulf %112, %113 : vector<8x1xf32>
    %115 = arith.mulf %108, %108 : vector<8x128xf32>
    %cst_40 = arith.constant dense<0.000000e+00> : vector<8xf32>
    %116 = vector.multi_reduction <add>, %115, %cst_40 [1] : vector<8x128xf32> to vector<8xf32>
    %117 = vector.shape_cast %116 : vector<8xf32> to vector<8x1xf32>
    %cst_41 = arith.constant 3.125000e-02 : f32
    %118 = vector.broadcast %cst_41 : f32 to vector<8x1xf32>
    %119 = arith.mulf %117, %118 : vector<8x1xf32>
    %120 = arith.mulf %114, %114 : vector<8x1xf32>
    %121 = arith.subf %119, %120 : vector<8x1xf32>
    %122 = vector.broadcast %114 : vector<8x1xf32> to vector<8x128xf32>
    %123 = arith.subf %108, %122 : vector<8x128xf32>
    %cst_42 = arith.constant 9.99999974E-6 : f32
    %124 = vector.broadcast %cst_42 : f32 to vector<8x1xf32>
    %125 = arith.addf %121, %124 : vector<8x1xf32>
    %126 = math.rsqrt %125 : vector<8x1xf32>
    %127 = vector.broadcast %126 : vector<8x1xf32> to vector<8x128xf32>
    %128 = arith.mulf %123, %127 : vector<8x128xf32>
    %129 = vector.broadcast %109 : vector<1x128xf32> to vector<8x128xf32>
    %130 = arith.mulf %128, %129 : vector<8x128xf32>
    %131 = vector.broadcast %110 : vector<1x128xf32> to vector<8x128xf32>
    %132 = arith.addf %130, %131 : vector<8x128xf32>
    %133 = arith.truncf %132 : vector<8x128xf32> to vector<8x128xbf16>
    %c0_43 = arith.constant 0 : index
    %c0_44 = arith.constant 0 : index
    %134 = vector.load %arg6[%c0_43, %c0_44] : memref<128x2048xbf16, #tpu.memory_space<vmem>>, vector<128x512xbf16>
    %cst_45 = arith.constant dense<0.000000e+00> : vector<8x512xf32>
    %135 = tpu.matmul %133, %134, %cst_45 {dimension_numbers = #tpu.dot_dimension_numbers<[1], [0], [0], [1], [0, 0, 1, 1], [], []>} : vector<8x128xbf16>, vector<128x512xbf16>, vector<8x512xf32> -> vector<8x512xf32>
    %c0_46 = arith.constant 0 : index
    %c0_47 = arith.constant 0 : index
    %136 = vector.load %arg7[%c0_46, %c0_47] : memref<1x2048xf32, #tpu.memory_space<vmem>>, vector<1x512xf32>
    %137 = vector.broadcast %136 : vector<1x512xf32> to vector<8x512xf32>
    %138 = arith.addf %135, %137 : vector<8x512xf32>
    %cst_48 = arith.constant 0.000000e+00 : f32
    %139 = vector.broadcast %cst_48 : f32 to vector<8x512xf32>
    %140 = arith.maximumf %138, %139 : vector<8x512xf32>
    %141 = arith.truncf %140 : vector<8x512xf32> to vector<8x512xbf16>
    %c0_49 = arith.constant 0 : index
    %c0_50 = arith.constant 0 : index
    %142 = vector.load %arg8[%c0_49, %c0_50] : memref<2048x128xbf16, #tpu.memory_space<vmem>>, vector<512x128xbf16>
    %cst_51 = arith.constant dense<0.000000e+00> : vector<8x128xf32>
    %143 = tpu.matmul %141, %142, %cst_51 {dimension_numbers = #tpu.dot_dimension_numbers<[1], [0], [0], [1], [0, 0, 1, 1], [], []>} : vector<8x512xbf16>, vector<512x128xbf16>, vector<8x128xf32> -> vector<8x128xf32>
    %c0_52 = arith.constant 0 : index
    %c512 = arith.constant 512 : index
    %144 = vector.load %arg6[%c0_52, %c512] : memref<128x2048xbf16, #tpu.memory_space<vmem>>, vector<128x512xbf16>
    %cst_53 = arith.constant dense<0.000000e+00> : vector<8x512xf32>
    %145 = tpu.matmul %133, %144, %cst_53 {dimension_numbers = #tpu.dot_dimension_numbers<[1], [0], [0], [1], [0, 0, 1, 1], [], []>} : vector<8x128xbf16>, vector<128x512xbf16>, vector<8x512xf32> -> vector<8x512xf32>
    %c0_54 = arith.constant 0 : index
    %c512_55 = arith.constant 512 : index
    %146 = vector.load %arg7[%c0_54, %c512_55] : memref<1x2048xf32, #tpu.memory_space<vmem>>, vector<1x512xf32>
    %147 = vector.broadcast %146 : vector<1x512xf32> to vector<8x512xf32>
    %148 = arith.addf %145, %147 : vector<8x512xf32>
    %cst_56 = arith.constant 0.000000e+00 : f32
    %149 = vector.broadcast %cst_56 : f32 to vector<8x512xf32>
    %150 = arith.maximumf %148, %149 : vector<8x512xf32>
    %151 = arith.truncf %150 : vector<8x512xf32> to vector<8x512xbf16>
    %c512_57 = arith.constant 512 : index
    %c0_58 = arith.constant 0 : index
    %152 = vector.load %arg8[%c512_57, %c0_58] : memref<2048x128xbf16, #tpu.memory_space<vmem>>, vector<512x128xbf16>
    %cst_59 = arith.constant dense<0.000000e+00> : vector<8x128xf32>
    %153 = tpu.matmul %151, %152, %cst_59 {dimension_numbers = #tpu.dot_dimension_numbers<[1], [0], [0], [1], [0, 0, 1, 1], [], []>} : vector<8x512xbf16>, vector<512x128xbf16>, vector<8x128xf32> -> vector<8x128xf32>
    %154 = arith.addf %143, %153 : vector<8x128xf32>
    %c0_60 = arith.constant 0 : index
    %c1024 = arith.constant 1024 : index
    %155 = vector.load %arg6[%c0_60, %c1024] : memref<128x2048xbf16, #tpu.memory_space<vmem>>, vector<128x512xbf16>
    %cst_61 = arith.constant dense<0.000000e+00> : vector<8x512xf32>
    %156 = tpu.matmul %133, %155, %cst_61 {dimension_numbers = #tpu.dot_dimension_numbers<[1], [0], [0], [1], [0, 0, 1, 1], [], []>} : vector<8x128xbf16>, vector<128x512xbf16>, vector<8x512xf32> -> vector<8x512xf32>
    %c0_62 = arith.constant 0 : index
    %c1024_63 = arith.constant 1024 : index
    %157 = vector.load %arg7[%c0_62, %c1024_63] : memref<1x2048xf32, #tpu.memory_space<vmem>>, vector<1x512xf32>
    %158 = vector.broadcast %157 : vector<1x512xf32> to vector<8x512xf32>
    %159 = arith.addf %156, %158 : vector<8x512xf32>
    %cst_64 = arith.constant 0.000000e+00 : f32
    %160 = vector.broadcast %cst_64 : f32 to vector<8x512xf32>
    %161 = arith.maximumf %159, %160 : vector<8x512xf32>
    %162 = arith.truncf %161 : vector<8x512xf32> to vector<8x512xbf16>
    %c1024_65 = arith.constant 1024 : index
    %c0_66 = arith.constant 0 : index
    %163 = vector.load %arg8[%c1024_65, %c0_66] : memref<2048x128xbf16, #tpu.memory_space<vmem>>, vector<512x128xbf16>
    %cst_67 = arith.constant dense<0.000000e+00> : vector<8x128xf32>
    %164 = tpu.matmul %162, %163, %cst_67 {dimension_numbers = #tpu.dot_dimension_numbers<[1], [0], [0], [1], [0, 0, 1, 1], [], []>} : vector<8x512xbf16>, vector<512x128xbf16>, vector<8x128xf32> -> vector<8x128xf32>
    %165 = arith.addf %154, %164 : vector<8x128xf32>
    %c0_68 = arith.constant 0 : index
    %c1536 = arith.constant 1536 : index
    %166 = vector.load %arg6[%c0_68, %c1536] : memref<128x2048xbf16, #tpu.memory_space<vmem>>, vector<128x512xbf16>
    %cst_69 = arith.constant dense<0.000000e+00> : vector<8x512xf32>
    %167 = tpu.matmul %133, %166, %cst_69 {dimension_numbers = #tpu.dot_dimension_numbers<[1], [0], [0], [1], [0, 0, 1, 1], [], []>} : vector<8x128xbf16>, vector<128x512xbf16>, vector<8x512xf32> -> vector<8x512xf32>
    %c0_70 = arith.constant 0 : index
    %c1536_71 = arith.constant 1536 : index
    %168 = vector.load %arg7[%c0_70, %c1536_71] : memref<1x2048xf32, #tpu.memory_space<vmem>>, vector<1x512xf32>
    %169 = vector.broadcast %168 : vector<1x512xf32> to vector<8x512xf32>
    %170 = arith.addf %167, %169 : vector<8x512xf32>
    %cst_72 = arith.constant 0.000000e+00 : f32
    %171 = vector.broadcast %cst_72 : f32 to vector<8x512xf32>
    %172 = arith.maximumf %170, %171 : vector<8x512xf32>
    %173 = arith.truncf %172 : vector<8x512xf32> to vector<8x512xbf16>
    %c1536_73 = arith.constant 1536 : index
    %c0_74 = arith.constant 0 : index
    %174 = vector.load %arg8[%c1536_73, %c0_74] : memref<2048x128xbf16, #tpu.memory_space<vmem>>, vector<512x128xbf16>
    %cst_75 = arith.constant dense<0.000000e+00> : vector<8x128xf32>
    %175 = tpu.matmul %173, %174, %cst_75 {dimension_numbers = #tpu.dot_dimension_numbers<[1], [0], [0], [1], [0, 0, 1, 1], [], []>} : vector<8x512xbf16>, vector<512x128xbf16>, vector<8x128xf32> -> vector<8x128xf32>
    %176 = arith.addf %165, %175 : vector<8x128xf32>
    %c0_76 = arith.constant 0 : index
    %c0_77 = arith.constant 0 : index
    %177 = vector.load %arg9[%c0_76, %c0_77] : memref<1x128xf32, #tpu.memory_space<vmem>>, vector<1x128xf32>
    %178 = vector.broadcast %177 : vector<1x128xf32> to vector<8x128xf32>
    %179 = arith.addf %176, %178 : vector<8x128xf32>
    %180 = arith.addf %132, %179 : vector<8x128xf32>
    %c0_78 = arith.constant 0 : index
    %c0_79 = arith.constant 0 : index
    %181 = vector.load %arg12[%c0_78, %c0_79] : memref<1x128xf32, #tpu.memory_space<vmem>>, vector<1x128xf32>
    %c0_80 = arith.constant 0 : index
    %c0_81 = arith.constant 0 : index
    %182 = vector.load %arg13[%c0_80, %c0_81] : memref<1x128xf32, #tpu.memory_space<vmem>>, vector<1x128xf32>
    %cst_82 = arith.constant dense<0.000000e+00> : vector<8xf32>
    %183 = vector.multi_reduction <add>, %180, %cst_82 [1] : vector<8x128xf32> to vector<8xf32>
    %184 = vector.shape_cast %183 : vector<8xf32> to vector<8x1xf32>
    %cst_83 = arith.constant 3.125000e-02 : f32
    %185 = vector.broadcast %cst_83 : f32 to vector<8x1xf32>
    %186 = arith.mulf %184, %185 : vector<8x1xf32>
    %187 = arith.mulf %180, %180 : vector<8x128xf32>
    %cst_84 = arith.constant dense<0.000000e+00> : vector<8xf32>
    %188 = vector.multi_reduction <add>, %187, %cst_84 [1] : vector<8x128xf32> to vector<8xf32>
    %189 = vector.shape_cast %188 : vector<8xf32> to vector<8x1xf32>
    %cst_85 = arith.constant 3.125000e-02 : f32
    %190 = vector.broadcast %cst_85 : f32 to vector<8x1xf32>
    %191 = arith.mulf %189, %190 : vector<8x1xf32>
    %192 = arith.mulf %186, %186 : vector<8x1xf32>
    %193 = arith.subf %191, %192 : vector<8x1xf32>
    %194 = vector.broadcast %186 : vector<8x1xf32> to vector<8x128xf32>
    %195 = arith.subf %180, %194 : vector<8x128xf32>
    %cst_86 = arith.constant 9.99999974E-6 : f32
    %196 = vector.broadcast %cst_86 : f32 to vector<8x1xf32>
    %197 = arith.addf %193, %196 : vector<8x1xf32>
    %198 = math.rsqrt %197 : vector<8x1xf32>
    %199 = vector.broadcast %198 : vector<8x1xf32> to vector<8x128xf32>
    %200 = arith.mulf %195, %199 : vector<8x128xf32>
    %201 = vector.broadcast %181 : vector<1x128xf32> to vector<8x128xf32>
    %202 = arith.mulf %200, %201 : vector<8x128xf32>
    %203 = vector.broadcast %182 : vector<1x128xf32> to vector<8x128xf32>
    %204 = arith.addf %202, %203 : vector<8x128xf32>
    %205 = vector.shape_cast %204 : vector<8x128xf32> to vector<1x8x128xf32>
    %c0_87 = arith.constant 0 : index
    %206 = memref.load %arg14[%c0_87] : memref<1xf32, #tpu.memory_space<smem>>
    %207 = vector.broadcast %206 : f32 to vector<1x8x128xf32>
    %208 = arith.mulf %207, %205 : vector<1x8x128xf32>
    %cst_88 = arith.constant 1.000000e+00 : f32
    %209 = arith.subf %cst_88, %206 : f32
    %c0_89 = arith.constant 0 : index
    %c0_90 = arith.constant 0 : index
    %c0_91 = arith.constant 0 : index
    %210 = vector.load %arg1[%c0_89, %c0_90, %c0_91] : memref<1x8x128xf32, #tpu.memory_space<vmem>>, vector<1x8x128xf32>
    %211 = vector.broadcast %209 : f32 to vector<1x8x128xf32>
    %212 = arith.mulf %211, %210 : vector<1x8x128xf32>
    %213 = arith.addf %208, %212 : vector<1x8x128xf32>
    %c0_92 = arith.constant 0 : index
    %c0_93 = arith.constant 0 : index
    %c0_94 = arith.constant 0 : index
    %214 = vector.load %arg15[%c0_92, %c0_93, %c0_94] : memref<1x8x128xf32, #tpu.memory_space<vmem>>, vector<1x8x128xf32>
    tpu.vector_store %arg15[%c0_92, %c0_93, %c0_94], %213 {strides = array<i32>} : memref<1x8x128xf32, #tpu.memory_space<vmem>>, vector<1x8x128xf32>,
    return
  }
  func.func @transform_0(%arg0: i32) -> (i32, i32, i32) {
    %c0_i32 = arith.constant 0 : i32
    %c0_i32_0 = arith.constant 0 : i32
    %c0_i32_1 = arith.constant 0 : i32
    return %arg0, %c0_i32, %c0_i32_0 : i32, i32, i32
  }
  func.func @transform_1(%arg0: i32) -> (i32, i32) {
    %c0_i32 = arith.constant 0 : i32
    %c0_i32_0 = arith.constant 0 : i32
    %c0_i32_1 = arith.constant 0 : i32
    return %c0_i32, %c0_i32_0 : i32, i32
  }
  func.func @transform_2(%arg0: i32) -> (i32, i32) {
    %c0_i32 = arith.constant 0 : i32
    %c0_i32_0 = arith.constant 0 : i32
    %c0_i32_1 = arith.constant 0 : i32
    return %c0_i32, %c0_i32_0 : i32, i32
  }
  func.func @transform_3(%arg0: i32) -> (i32, i32) {
    %c0_i32 = arith.constant 0 : i32
    %c0_i32_0 = arith.constant 0 : i32
    %c0_i32_1 = arith.constant 0 : i32
    return %c0_i32, %c0_i32_0 : i32, i32
  }
  func.func @transform_4(%arg0: i32) -> (i32, i32) {
    %c0_i32 = arith.constant 0 : i32
    %c0_i32_0 = arith.constant 0 : i32
    %c0_i32_1 = arith.constant 0 : i32
    return %c0_i32, %c0_i32_0 : i32, i32
  }
  func.func @transform_5(%arg0: i32) -> (i32, i32) {
    %c0_i32 = arith.constant 0 : i32
    %c0_i32_0 = arith.constant 0 : i32
    %c0_i32_1 = arith.constant 0 : i32
    return %c0_i32, %c0_i32_0 : i32, i32
  }
  func.func @transform_6(%arg0: i32) -> (i32, i32) {
    %c0_i32 = arith.constant 0 : i32
    %c0_i32_0 = arith.constant 0 : i32
    %c0_i32_1 = arith.constant 0 : i32
    return %c0_i32, %c0_i32_0 : i32, i32
  }
  func.func @transform_7(%arg0: i32) -> (i32, i32) {
    %c0_i32 = arith.constant 0 : i32
    %c0_i32_0 = arith.constant 0 : i32
    %c0_i32_1 = arith.constant 0 : i32
    return %c0_i32, %c0_i32_0 : i32, i32
  }
  func.func @transform_8(%arg0: i32) -> (i32, i32) {
    %c0_i32 = arith.constant 0 : i32
    %c0_i32_0 = arith.constant 0 : i32
    %c0_i32_1 = arith.constant 0 : i32
    return %c0_i32, %c0_i32_0 : i32, i32
  }
  func.func @transform_9(%arg0: i32) -> (i32, i32) {
    %c0_i32 = arith.constant 0 : i32
    %c0_i32_0 = arith.constant 0 : i32
    %c0_i32_1 = arith.constant 0 : i32
    return %c0_i32, %c0_i32_0 : i32, i32
  }
  func.func @transform_10(%arg0: i32) -> (i32, i32) {
    %c0_i32 = arith.constant 0 : i32
    %c0_i32_0 = arith.constant 0 : i32
    %c0_i32_1 = arith.constant 0 : i32
    return %c0_i32, %c0_i32_0 : i32, i32
  }
  func.func @transform_11(%arg0: i32) -> (i32, i32) {
    %c0_i32 = arith.constant 0 : i32
    %c0_i32_0 = arith.constant 0 : i32
    %c0_i32_1 = arith.constant 0 : i32
    return %c0_i32, %c0_i32_0 : i32, i32
  }
  func.func @transform_12(%arg0: i32) -> (i32, i32) {
    %c0_i32 = arith.constant 0 : i32
    %c0_i32_0 = arith.constant 0 : i32
    %c0_i32_1 = arith.constant 0 : i32
    return %c0_i32, %c0_i32_0 : i32, i32
  }
  func.func @transform_13(%arg0: i32) -> i32 {
    %c0_i32 = arith.constant 0 : i32
    %c0_i32_0 = arith.constant 0 : i32
    return %c0_i32 : i32
  }
  func.func @transform_14(%arg0: i32) -> (i32, i32, i32) {
    %c0_i32 = arith.constant 0 : i32
    %c0_i32_0 = arith.constant 0 : i32
    %c0_i32_1 = arith.constant 0 : i32
    return %arg0, %c0_i32, %c0_i32_0 : i32, i32, i32
  }
}

module attributes {stable_mosaic.version = 11 : i64} {
  func.func @_encoder_layer_kernel(%arg0: i32, %arg1: memref<1x8x128xf32, #tpu.memory_space<vmem>>, %arg2: memref<128x384xbf16, #tpu.memory_space<vmem>>, %arg3: memref<1x384xf32, #tpu.memory_space<vmem>>, %arg4: memref<128x128xbf16, #tpu.memory_space<vmem>>, %arg5: memref<1x128xf32, #tpu.memory_space<vmem>>, %arg6: memref<128x2048xbf16, #tpu.memory_space<vmem>>, %arg7: memref<1x2048xf32, #tpu.memory_space<vmem>>, %arg8: memref<2048x128xbf16, #tpu.memory_space<vmem>>, %arg9: memref<1x128xf32, #tpu.memory_space<vmem>>, %arg10: memref<1x128xf32, #tpu.memory_space<vmem>>, %arg11: memref<1x128xf32, #tpu.memory_space<vmem>>, %arg12: memref<1x128xf32, #tpu.memory_space<vmem>>, %arg13: memref<1x128xf32, #tpu.memory_space<vmem>>, %arg14: memref<1xf32, #tpu.memory_space<smem>>, %arg15: memref<1x8x128xf32, #tpu.memory_space<vmem>>, %arg16: memref<8x128xbf16, #tpu.memory_space<vmem>>) attributes {dimension_semantics = [#tpu.dimension_semantics<parallel>], iteration_bounds = array<i64: 2>, scalar_prefetch = 0 : i64, scratch_operands = 1 : i64, tpu.core_type = #tpu.core_type<tc>, window_params = [{transform_indices = @transform_0, window_bounds = array<i64: 1, 8, 128>}, {pipeline_mode = #tpu.pipeline_mode<synchronous>, transform_indices = @transform_1, window_bounds = array<i64: 128, 384>}, {pipeline_mode = #tpu.pipeline_mode<synchronous>, transform_indices = @transform_2, window_bounds = array<i64: 1, 384>}, {pipeline_mode = #tpu.pipeline_mode<synchronous>, transform_indices = @transform_3, window_bounds = array<i64: 128, 128>}, {pipeline_mode = #tpu.pipeline_mode<synchronous>, transform_indices = @transform_4, window_bounds = array<i64: 1, 128>}, {pipeline_mode = #tpu.pipeline_mode<synchronous>, transform_indices = @transform_5, window_bounds = array<i64: 128, 2048>}, {pipeline_mode = #tpu.pipeline_mode<synchronous>, transform_indices = @transform_6, window_bounds = array<i64: 1, 2048>}, {pipeline_mode = #tpu.pipeline_mode<synchronous>, transform_indices = @transform_7, window_bounds = array<i64: 2048, 128>}, {pipeline_mode = #tpu.pipeline_mode<synchronous>, transform_indices = @transform_8, window_bounds = array<i64: 1, 128>}, {pipeline_mode = #tpu.pipeline_mode<synchronous>, transform_indices = @transform_9, window_bounds = array<i64: 1, 128>}, {pipeline_mode = #tpu.pipeline_mode<synchronous>, transform_indices = @transform_10, window_bounds = array<i64: 1, 128>}, {pipeline_mode = #tpu.pipeline_mode<synchronous>, transform_indices = @transform_11, window_bounds = array<i64: 1, 128>}, {pipeline_mode = #tpu.pipeline_mode<synchronous>, transform_indices = @transform_12, window_bounds = array<i64: 1, 128>}, {transform_indices = @transform_13, window_bounds = array<i64: 1>}, {transform_indices = @transform_14, window_bounds = array<i64: 1, 8, 128>}]} {
    %c0 = arith.constant 0 : index
    %c0_0 = arith.constant 0 : index
    %c0_1 = arith.constant 0 : index
    %0 = vector.load %arg1[%c0, %c0_0, %c0_1] : memref<1x8x128xf32, #tpu.memory_space<vmem>>, vector<1x8x128xf32>
    %1 = vector.shape_cast %0 : vector<1x8x128xf32> to vector<8x128xf32>
    %2 = arith.truncf %1 : vector<8x128xf32> to vector<8x128xbf16>
    %c0_2 = arith.constant 0 : index
    %c0_3 = arith.constant 0 : index
    %3 = vector.load %arg2[%c0_2, %c0_3] : memref<128x384xbf16, #tpu.memory_space<vmem>>, vector<128x384xbf16>
    %cst = arith.constant dense<0.000000e+00> : vector<8x384xf32>
    %4 = tpu.matmul %2, %3, %cst {dimension_numbers = #tpu.dot_dimension_numbers<[1], [0], [0], [1], [0, 0, 1, 1], [], []>} : vector<8x128xbf16>, vector<128x384xbf16>, vector<8x384xf32> -> vector<8x384xf32>
    %c0_4 = arith.constant 0 : index
    %c0_5 = arith.constant 0 : index
    %5 = vector.load %arg3[%c0_4, %c0_5] : memref<1x384xf32, #tpu.memory_space<vmem>>, vector<1x384xf32>
    %6 = vector.broadcast %5 : vector<1x384xf32> to vector<8x384xf32>
    %7 = arith.addf %4, %6 : vector<8x384xf32>
    %8 = vector.extract_strided_slice %7 {offsets = [0, 0], sizes = [8, 128], strides = [1, 1]} : vector<8x384xf32> to vector<8x128xf32>
    %9 = arith.truncf %8 : vector<8x128xf32> to vector<8x128xbf16>
    %10 = vector.extract_strided_slice %7 {offsets = [0, 128], sizes = [8, 128], strides = [1, 1]} : vector<8x384xf32> to vector<8x128xf32>
    %11 = arith.truncf %10 : vector<8x128xf32> to vector<8x128xbf16>
    %12 = vector.extract_strided_slice %7 {offsets = [0, 256], sizes = [8, 128], strides = [1, 1]} : vector<8x384xf32> to vector<8x128xf32>
    %13 = arith.truncf %12 : vector<8x128xf32> to vector<8x128xbf16>
    %14 = vector.extract_strided_slice %9 {offsets = [0, 0], sizes = [8, 32], strides = [1, 1]} : vector<8x128xbf16> to vector<8x32xbf16>
    %15 = vector.shape_cast %14 : vector<8x32xbf16> to vector<1x8x32xbf16>
    %16 = vector.extract_strided_slice %11 {offsets = [0, 0], sizes = [8, 32], strides = [1, 1]} : vector<8x128xbf16> to vector<8x32xbf16>
    %17 = vector.shape_cast %16 : vector<8x32xbf16> to vector<1x8x32xbf16>
    %18 = vector.extract_strided_slice %13 {offsets = [0, 0], sizes = [8, 32], strides = [1, 1]} : vector<8x128xbf16> to vector<8x32xbf16>
    %19 = vector.shape_cast %18 : vector<8x32xbf16> to vector<1x8x32xbf16>
    "tpu.trace_start"() <{level = 10 : i32, message = "bqd,bkd->bqk"}> : () -> ()
    %cst_6 = arith.constant dense<0.000000e+00> : vector<1x8x8xf32>
    %20 = tpu.matmul %15, %17, %cst_6 {dimension_numbers = #tpu.dot_dimension_numbers<[2], [2], [1], [1], [0, 0, 0, 1, 1, 1], [0], [0]>} : vector<1x8x32xbf16>, vector<1x8x32xbf16>, vector<1x8x8xf32> -> vector<1x8x8xf32>
    "tpu.trace_stop"() : () -> ()
    %cst_7 = arith.constant dense<0xFF800000> : vector<1x8xf32>
    %21 = vector.multi_reduction <maximumf>, %20, %cst_7 [2] : vector<1x8x8xf32> to vector<1x8xf32>
    %22 = vector.shape_cast %21 : vector<1x8xf32> to vector<1x8x1xf32>
    %23 = vector.broadcast %22 : vector<1x8x1xf32> to vector<1x8x8xf32>
    %24 = arith.subf %20, %23 : vector<1x8x8xf32>
    %25 = math.exp %24 : vector<1x8x8xf32>
    %cst_8 = arith.constant dense<0.000000e+00> : vector<1x8xf32>
    %26 = vector.multi_reduction <add>, %25, %cst_8 [2] : vector<1x8x8xf32> to vector<1x8xf32>
    %27 = vector.shape_cast %26 : vector<1x8xf32> to vector<1x8x1xf32>
    %28 = tpu.reciprocal %27 {approx = true} : vector<1x8x1xf32> -> vector<1x8x1xf32>
    %29 = arith.truncf %25 : vector<1x8x8xf32> to vector<1x8x8xbf16>
    "tpu.trace_start"() <{level = 10 : i32, message = "bqk,bkd->bqd"}> : () -> ()
    %cst_9 = arith.constant dense<0.000000e+00> : vector<1x8x32xf32>
    %30 = tpu.matmul %29, %19, %cst_9 {dimension_numbers = #tpu.dot_dimension_numbers<[2], [1], [1], [2], [0, 0, 0, 1, 1, 2], [0], [0]>} : vector<1x8x8xbf16>, vector<1x8x32xbf16>, vector<1x8x32xf32> -> vector<1x8x32xf32>
    "tpu.trace_stop"() : () -> ()
    %31 = vector.broadcast %28 : vector<1x8x1xf32> to vector<1x8x32xf32>
    %32 = arith.mulf %30, %31 : vector<1x8x32xf32>
    %33 = vector.shape_cast %32 : vector<1x8x32xf32> to vector<8x32xf32>
    %34 = arith.truncf %33 : vector<8x32xf32> to vector<8x32xbf16>
    %c0_10 = arith.constant 0 : index
    %c0_11 = arith.constant 0 : index
    %35 = vector.load %arg16[%c0_10, %c0_11] : memref<8x128xbf16, #tpu.memory_space<vmem>>, vector<8x32xbf16>
    tpu.vector_store %arg16[%c0_10, %c0_11], %34 {strides = array<i32>} : memref<8x128xbf16, #tpu.memory_space<vmem>>, vector<8x32xbf16>,
    %36 = vector.extract_strided_slice %9 {offsets = [0, 32], sizes = [8, 32], strides = [1, 1]} : vector<8x128xbf16> to vector<8x32xbf16>
    %37 = vector.shape_cast %36 : vector<8x32xbf16> to vector<1x8x32xbf16>
    %38 = vector.extract_strided_slice %11 {offsets = [0, 32], sizes = [8, 32], strides = [1, 1]} : vector<8x128xbf16> to vector<8x32xbf16>
    %39 = vector.shape_cast %38 : vector<8x32xbf16> to vector<1x8x32xbf16>
    %40 = vector.extract_strided_slice %13 {offsets = [0, 32], sizes = [8, 32], strides = [1, 1]} : vector<8x128xbf16> to vector<8x32xbf16>
    %41 = vector.shape_cast %40 : vector<8x32xbf16> to vector<1x8x32xbf16>
    "tpu.trace_start"() <{level = 10 : i32, message = "bqd,bkd->bqk"}> : () -> ()
    %cst_12 = arith.constant dense<0.000000e+00> : vector<1x8x8xf32>
    %42 = tpu.matmul %37, %39, %cst_12 {dimension_numbers = #tpu.dot_dimension_numbers<[2], [2], [1], [1], [0, 0, 0, 1, 1, 1], [0], [0]>} : vector<1x8x32xbf16>, vector<1x8x32xbf16>, vector<1x8x8xf32> -> vector<1x8x8xf32>
    "tpu.trace_stop"() : () -> ()
    %cst_13 = arith.constant dense<0xFF800000> : vector<1x8xf32>
    %43 = vector.multi_reduction <maximumf>, %42, %cst_13 [2] : vector<1x8x8xf32> to vector<1x8xf32>
    %44 = vector.shape_cast %43 : vector<1x8xf32> to vector<1x8x1xf32>
    %45 = vector.broadcast %44 : vector<1x8x1xf32> to vector<1x8x8xf32>
    %46 = arith.subf %42, %45 : vector<1x8x8xf32>
    %47 = math.exp %46 : vector<1x8x8xf32>
    %cst_14 = arith.constant dense<0.000000e+00> : vector<1x8xf32>
    %48 = vector.multi_reduction <add>, %47, %cst_14 [2] : vector<1x8x8xf32> to vector<1x8xf32>
    %49 = vector.shape_cast %48 : vector<1x8xf32> to vector<1x8x1xf32>
    %50 = tpu.reciprocal %49 {approx = true} : vector<1x8x1xf32> -> vector<1x8x1xf32>
    %51 = arith.truncf %47 : vector<1x8x8xf32> to vector<1x8x8xbf16>
    "tpu.trace_start"() <{level = 10 : i32, message = "bqk,bkd->bqd"}> : () -> ()
    %cst_15 = arith.constant dense<0.000000e+00> : vector<1x8x32xf32>
    %52 = tpu.matmul %51, %41, %cst_15 {dimension_numbers = #tpu.dot_dimension_numbers<[2], [1], [1], [2], [0, 0, 0, 1, 1, 2], [0], [0]>} : vector<1x8x8xbf16>, vector<1x8x32xbf16>, vector<1x8x32xf32> -> vector<1x8x32xf32>
    "tpu.trace_stop"() : () -> ()
    %53 = vector.broadcast %50 : vector<1x8x1xf32> to vector<1x8x32xf32>
    %54 = arith.mulf %52, %53 : vector<1x8x32xf32>
    %55 = vector.shape_cast %54 : vector<1x8x32xf32> to vector<8x32xf32>
    %56 = arith.truncf %55 : vector<8x32xf32> to vector<8x32xbf16>
    %c0_16 = arith.constant 0 : index
    %c32 = arith.constant 32 : index
    %57 = vector.load %arg16[%c0_16, %c32] : memref<8x128xbf16, #tpu.memory_space<vmem>>, vector<8x32xbf16>
    tpu.vector_store %arg16[%c0_16, %c32], %56 {strides = array<i32>} : memref<8x128xbf16, #tpu.memory_space<vmem>>, vector<8x32xbf16>,
    %58 = vector.extract_strided_slice %9 {offsets = [0, 64], sizes = [8, 32], strides = [1, 1]} : vector<8x128xbf16> to vector<8x32xbf16>
    %59 = vector.shape_cast %58 : vector<8x32xbf16> to vector<1x8x32xbf16>
    %60 = vector.extract_strided_slice %11 {offsets = [0, 64], sizes = [8, 32], strides = [1, 1]} : vector<8x128xbf16> to vector<8x32xbf16>
    %61 = vector.shape_cast %60 : vector<8x32xbf16> to vector<1x8x32xbf16>
    %62 = vector.extract_strided_slice %13 {offsets = [0, 64], sizes = [8, 32], strides = [1, 1]} : vector<8x128xbf16> to vector<8x32xbf16>
    %63 = vector.shape_cast %62 : vector<8x32xbf16> to vector<1x8x32xbf16>
    "tpu.trace_start"() <{level = 10 : i32, message = "bqd,bkd->bqk"}> : () -> ()
    %cst_17 = arith.constant dense<0.000000e+00> : vector<1x8x8xf32>
    %64 = tpu.matmul %59, %61, %cst_17 {dimension_numbers = #tpu.dot_dimension_numbers<[2], [2], [1], [1], [0, 0, 0, 1, 1, 1], [0], [0]>} : vector<1x8x32xbf16>, vector<1x8x32xbf16>, vector<1x8x8xf32> -> vector<1x8x8xf32>
    "tpu.trace_stop"() : () -> ()
    %cst_18 = arith.constant dense<0xFF800000> : vector<1x8xf32>
    %65 = vector.multi_reduction <maximumf>, %64, %cst_18 [2] : vector<1x8x8xf32> to vector<1x8xf32>
    %66 = vector.shape_cast %65 : vector<1x8xf32> to vector<1x8x1xf32>
    %67 = vector.broadcast %66 : vector<1x8x1xf32> to vector<1x8x8xf32>
    %68 = arith.subf %64, %67 : vector<1x8x8xf32>
    %69 = math.exp %68 : vector<1x8x8xf32>
    %cst_19 = arith.constant dense<0.000000e+00> : vector<1x8xf32>
    %70 = vector.multi_reduction <add>, %69, %cst_19 [2] : vector<1x8x8xf32> to vector<1x8xf32>
    %71 = vector.shape_cast %70 : vector<1x8xf32> to vector<1x8x1xf32>
    %72 = tpu.reciprocal %71 {approx = true} : vector<1x8x1xf32> -> vector<1x8x1xf32>
    %73 = arith.truncf %69 : vector<1x8x8xf32> to vector<1x8x8xbf16>
    "tpu.trace_start"() <{level = 10 : i32, message = "bqk,bkd->bqd"}> : () -> ()
    %cst_20 = arith.constant dense<0.000000e+00> : vector<1x8x32xf32>
    %74 = tpu.matmul %73, %63, %cst_20 {dimension_numbers = #tpu.dot_dimension_numbers<[2], [1], [1], [2], [0, 0, 0, 1, 1, 2], [0], [0]>} : vector<1x8x8xbf16>, vector<1x8x32xbf16>, vector<1x8x32xf32> -> vector<1x8x32xf32>
    "tpu.trace_stop"() : () -> ()
    %75 = vector.broadcast %72 : vector<1x8x1xf32> to vector<1x8x32xf32>
    %76 = arith.mulf %74, %75 : vector<1x8x32xf32>
    %77 = vector.shape_cast %76 : vector<1x8x32xf32> to vector<8x32xf32>
    %78 = arith.truncf %77 : vector<8x32xf32> to vector<8x32xbf16>
    %c0_21 = arith.constant 0 : index
    %c64 = arith.constant 64 : index
    %79 = vector.load %arg16[%c0_21, %c64] : memref<8x128xbf16, #tpu.memory_space<vmem>>, vector<8x32xbf16>
    tpu.vector_store %arg16[%c0_21, %c64], %78 {strides = array<i32>} : memref<8x128xbf16, #tpu.memory_space<vmem>>, vector<8x32xbf16>,
    %80 = vector.extract_strided_slice %9 {offsets = [0, 96], sizes = [8, 32], strides = [1, 1]} : vector<8x128xbf16> to vector<8x32xbf16>
    %81 = vector.shape_cast %80 : vector<8x32xbf16> to vector<1x8x32xbf16>
    %82 = vector.extract_strided_slice %11 {offsets = [0, 96], sizes = [8, 32], strides = [1, 1]} : vector<8x128xbf16> to vector<8x32xbf16>
    %83 = vector.shape_cast %82 : vector<8x32xbf16> to vector<1x8x32xbf16>
    %84 = vector.extract_strided_slice %13 {offsets = [0, 96], sizes = [8, 32], strides = [1, 1]} : vector<8x128xbf16> to vector<8x32xbf16>
    %85 = vector.shape_cast %84 : vector<8x32xbf16> to vector<1x8x32xbf16>
    "tpu.trace_start"() <{level = 10 : i32, message = "bqd,bkd->bqk"}> : () -> ()
    %cst_22 = arith.constant dense<0.000000e+00> : vector<1x8x8xf32>
    %86 = tpu.matmul %81, %83, %cst_22 {dimension_numbers = #tpu.dot_dimension_numbers<[2], [2], [1], [1], [0, 0, 0, 1, 1, 1], [0], [0]>} : vector<1x8x32xbf16>, vector<1x8x32xbf16>, vector<1x8x8xf32> -> vector<1x8x8xf32>
    "tpu.trace_stop"() : () -> ()
    %cst_23 = arith.constant dense<0xFF800000> : vector<1x8xf32>
    %87 = vector.multi_reduction <maximumf>, %86, %cst_23 [2] : vector<1x8x8xf32> to vector<1x8xf32>
    %88 = vector.shape_cast %87 : vector<1x8xf32> to vector<1x8x1xf32>
    %89 = vector.broadcast %88 : vector<1x8x1xf32> to vector<1x8x8xf32>
    %90 = arith.subf %86, %89 : vector<1x8x8xf32>
    %91 = math.exp %90 : vector<1x8x8xf32>
    %cst_24 = arith.constant dense<0.000000e+00> : vector<1x8xf32>
    %92 = vector.multi_reduction <add>, %91, %cst_24 [2] : vector<1x8x8xf32> to vector<1x8xf32>
    %93 = vector.shape_cast %92 : vector<1x8xf32> to vector<1x8x1xf32>
    %94 = tpu.reciprocal %93 {approx = true} : vector<1x8x1xf32> -> vector<1x8x1xf32>
    %95 = arith.truncf %91 : vector<1x8x8xf32> to vector<1x8x8xbf16>
    "tpu.trace_start"() <{level = 10 : i32, message = "bqk,bkd->bqd"}> : () -> ()
    %cst_25 = arith.constant dense<0.000000e+00> : vector<1x8x32xf32>
    %96 = tpu.matmul %95, %85, %cst_25 {dimension_numbers = #tpu.dot_dimension_numbers<[2], [1], [1], [2], [0, 0, 0, 1, 1, 2], [0], [0]>} : vector<1x8x8xbf16>, vector<1x8x32xbf16>, vector<1x8x32xf32> -> vector<1x8x32xf32>
    "tpu.trace_stop"() : () -> ()
    %97 = vector.broadcast %94 : vector<1x8x1xf32> to vector<1x8x32xf32>
    %98 = arith.mulf %96, %97 : vector<1x8x32xf32>
    %99 = vector.shape_cast %98 : vector<1x8x32xf32> to vector<8x32xf32>
    %100 = arith.truncf %99 : vector<8x32xf32> to vector<8x32xbf16>
    %c0_26 = arith.constant 0 : index
    %c96 = arith.constant 96 : index
    %101 = vector.load %arg16[%c0_26, %c96] : memref<8x128xbf16, #tpu.memory_space<vmem>>, vector<8x32xbf16>
    tpu.vector_store %arg16[%c0_26, %c96], %100 {strides = array<i32>} : memref<8x128xbf16, #tpu.memory_space<vmem>>, vector<8x32xbf16>,
    %c0_27 = arith.constant 0 : index
    %c0_28 = arith.constant 0 : index
    %102 = vector.load %arg16[%c0_27, %c0_28] : memref<8x128xbf16, #tpu.memory_space<vmem>>, vector<8x128xbf16>
    %c0_29 = arith.constant 0 : index
    %c0_30 = arith.constant 0 : index
    %103 = vector.load %arg4[%c0_29, %c0_30] : memref<128x128xbf16, #tpu.memory_space<vmem>>, vector<128x128xbf16>
    %cst_31 = arith.constant dense<0.000000e+00> : vector<8x128xf32>
    %104 = tpu.matmul %102, %103, %cst_31 {dimension_numbers = #tpu.dot_dimension_numbers<[1], [0], [0], [1], [0, 0, 1, 1], [], []>} : vector<8x128xbf16>, vector<128x128xbf16>, vector<8x128xf32> -> vector<8x128xf32>
    %c0_32 = arith.constant 0 : index
    %c0_33 = arith.constant 0 : index
    %105 = vector.load %arg5[%c0_32, %c0_33] : memref<1x128xf32, #tpu.memory_space<vmem>>, vector<1x128xf32>
    %106 = vector.broadcast %105 : vector<1x128xf32> to vector<8x128xf32>
    %107 = arith.addf %104, %106 : vector<8x128xf32>
    %108 = arith.addf %1, %107 : vector<8x128xf32>
    %c0_34 = arith.constant 0 : index
    %c0_35 = arith.constant 0 : index
    %109 = vector.load %arg10[%c0_34, %c0_35] : memref<1x128xf32, #tpu.memory_space<vmem>>, vector<1x128xf32>
    %c0_36 = arith.constant 0 : index
    %c0_37 = arith.constant 0 : index
    %110 = vector.load %arg11[%c0_36, %c0_37] : memref<1x128xf32, #tpu.memory_space<vmem>>, vector<1x128xf32>
    %cst_38 = arith.constant dense<0.000000e+00> : vector<8xf32>
    %111 = vector.multi_reduction <add>, %108, %cst_38 [1] : vector<8x128xf32> to vector<8xf32>
    %112 = vector.shape_cast %111 : vector<8xf32> to vector<8x1xf32>
    %cst_39 = arith.constant 3.125000e-02 : f32
    %113 = vector.broadcast %cst_39 : f32 to vector<8x1xf32>
    %114 = arith.mulf %112, %113 : vector<8x1xf32>
    %115 = arith.mulf %108, %108 : vector<8x128xf32>
    %cst_40 = arith.constant dense<0.000000e+00> : vector<8xf32>
    %116 = vector.multi_reduction <add>, %115, %cst_40 [1] : vector<8x128xf32> to vector<8xf32>
    %117 = vector.shape_cast %116 : vector<8xf32> to vector<8x1xf32>
    %cst_41 = arith.constant 3.125000e-02 : f32
    %118 = vector.broadcast %cst_41 : f32 to vector<8x1xf32>
    %119 = arith.mulf %117, %118 : vector<8x1xf32>
    %120 = arith.mulf %114, %114 : vector<8x1xf32>
    %121 = arith.subf %119, %120 : vector<8x1xf32>
    %122 = vector.broadcast %114 : vector<8x1xf32> to vector<8x128xf32>
    %123 = arith.subf %108, %122 : vector<8x128xf32>
    %cst_42 = arith.constant 9.99999974E-6 : f32
    %124 = vector.broadcast %cst_42 : f32 to vector<8x1xf32>
    %125 = arith.addf %121, %124 : vector<8x1xf32>
    %126 = math.rsqrt %125 : vector<8x1xf32>
    %127 = vector.broadcast %126 : vector<8x1xf32> to vector<8x128xf32>
    %128 = arith.mulf %123, %127 : vector<8x128xf32>
    %129 = vector.broadcast %109 : vector<1x128xf32> to vector<8x128xf32>
    %130 = arith.mulf %128, %129 : vector<8x128xf32>
    %131 = vector.broadcast %110 : vector<1x128xf32> to vector<8x128xf32>
    %132 = arith.addf %130, %131 : vector<8x128xf32>
    %133 = arith.truncf %132 : vector<8x128xf32> to vector<8x128xbf16>
    %c0_43 = arith.constant 0 : index
    %c0_44 = arith.constant 0 : index
    %134 = vector.load %arg6[%c0_43, %c0_44] : memref<128x2048xbf16, #tpu.memory_space<vmem>>, vector<128x512xbf16>
    %cst_45 = arith.constant dense<0.000000e+00> : vector<8x512xf32>
    %135 = tpu.matmul %133, %134, %cst_45 {dimension_numbers = #tpu.dot_dimension_numbers<[1], [0], [0], [1], [0, 0, 1, 1], [], []>} : vector<8x128xbf16>, vector<128x512xbf16>, vector<8x512xf32> -> vector<8x512xf32>
    %c0_46 = arith.constant 0 : index
    %c0_47 = arith.constant 0 : index
    %136 = vector.load %arg7[%c0_46, %c0_47] : memref<1x2048xf32, #tpu.memory_space<vmem>>, vector<1x512xf32>
    %137 = vector.broadcast %136 : vector<1x512xf32> to vector<8x512xf32>
    %138 = arith.addf %135, %137 : vector<8x512xf32>
    %cst_48 = arith.constant 0.000000e+00 : f32
    %139 = vector.broadcast %cst_48 : f32 to vector<8x512xf32>
    %140 = arith.maximumf %138, %139 : vector<8x512xf32>
    %141 = arith.truncf %140 : vector<8x512xf32> to vector<8x512xbf16>
    %c0_49 = arith.constant 0 : index
    %c0_50 = arith.constant 0 : index
    %142 = vector.load %arg8[%c0_49, %c0_50] : memref<2048x128xbf16, #tpu.memory_space<vmem>>, vector<512x128xbf16>
    %cst_51 = arith.constant dense<0.000000e+00> : vector<8x128xf32>
    %143 = tpu.matmul %141, %142, %cst_51 {dimension_numbers = #tpu.dot_dimension_numbers<[1], [0], [0], [1], [0, 0, 1, 1], [], []>} : vector<8x512xbf16>, vector<512x128xbf16>, vector<8x128xf32> -> vector<8x128xf32>
    %c0_52 = arith.constant 0 : index
    %c512 = arith.constant 512 : index
    %144 = vector.load %arg6[%c0_52, %c512] : memref<128x2048xbf16, #tpu.memory_space<vmem>>, vector<128x512xbf16>
    %cst_53 = arith.constant dense<0.000000e+00> : vector<8x512xf32>
    %145 = tpu.matmul %133, %144, %cst_53 {dimension_numbers = #tpu.dot_dimension_numbers<[1], [0], [0], [1], [0, 0, 1, 1], [], []>} : vector<8x128xbf16>, vector<128x512xbf16>, vector<8x512xf32> -> vector<8x512xf32>
    %c0_54 = arith.constant 0 : index
    %c512_55 = arith.constant 512 : index
    %146 = vector.load %arg7[%c0_54, %c512_55] : memref<1x2048xf32, #tpu.memory_space<vmem>>, vector<1x512xf32>
    %147 = vector.broadcast %146 : vector<1x512xf32> to vector<8x512xf32>
    %148 = arith.addf %145, %147 : vector<8x512xf32>
    %cst_56 = arith.constant 0.000000e+00 : f32
    %149 = vector.broadcast %cst_56 : f32 to vector<8x512xf32>
    %150 = arith.maximumf %148, %149 : vector<8x512xf32>
    %151 = arith.truncf %150 : vector<8x512xf32> to vector<8x512xbf16>
    %c512_57 = arith.constant 512 : index
    %c0_58 = arith.constant 0 : index
    %152 = vector.load %arg8[%c512_57, %c0_58] : memref<2048x128xbf16, #tpu.memory_space<vmem>>, vector<512x128xbf16>
    %cst_59 = arith.constant dense<0.000000e+00> : vector<8x128xf32>
    %153 = tpu.matmul %151, %152, %cst_59 {dimension_numbers = #tpu.dot_dimension_numbers<[1], [0], [0], [1], [0, 0, 1, 1], [], []>} : vector<8x512xbf16>, vector<512x128xbf16>, vector<8x128xf32> -> vector<8x128xf32>
    %154 = arith.addf %143, %153 : vector<8x128xf32>
    %c0_60 = arith.constant 0 : index
    %c1024 = arith.constant 1024 : index
    %155 = vector.load %arg6[%c0_60, %c1024] : memref<128x2048xbf16, #tpu.memory_space<vmem>>, vector<128x512xbf16>
    %cst_61 = arith.constant dense<0.000000e+00> : vector<8x512xf32>
    %156 = tpu.matmul %133, %155, %cst_61 {dimension_numbers = #tpu.dot_dimension_numbers<[1], [0], [0], [1], [0, 0, 1, 1], [], []>} : vector<8x128xbf16>, vector<128x512xbf16>, vector<8x512xf32> -> vector<8x512xf32>
    %c0_62 = arith.constant 0 : index
    %c1024_63 = arith.constant 1024 : index
    %157 = vector.load %arg7[%c0_62, %c1024_63] : memref<1x2048xf32, #tpu.memory_space<vmem>>, vector<1x512xf32>
    %158 = vector.broadcast %157 : vector<1x512xf32> to vector<8x512xf32>
    %159 = arith.addf %156, %158 : vector<8x512xf32>
    %cst_64 = arith.constant 0.000000e+00 : f32
    %160 = vector.broadcast %cst_64 : f32 to vector<8x512xf32>
    %161 = arith.maximumf %159, %160 : vector<8x512xf32>
    %162 = arith.truncf %161 : vector<8x512xf32> to vector<8x512xbf16>
    %c1024_65 = arith.constant 1024 : index
    %c0_66 = arith.constant 0 : index
    %163 = vector.load %arg8[%c1024_65, %c0_66] : memref<2048x128xbf16, #tpu.memory_space<vmem>>, vector<512x128xbf16>
    %cst_67 = arith.constant dense<0.000000e+00> : vector<8x128xf32>
    %164 = tpu.matmul %162, %163, %cst_67 {dimension_numbers = #tpu.dot_dimension_numbers<[1], [0], [0], [1], [0, 0, 1, 1], [], []>} : vector<8x512xbf16>, vector<512x128xbf16>, vector<8x128xf32> -> vector<8x128xf32>
    %165 = arith.addf %154, %164 : vector<8x128xf32>
    %c0_68 = arith.constant 0 : index
    %c1536 = arith.constant 1536 : index
    %166 = vector.load %arg6[%c0_68, %c1536] : memref<128x2048xbf16, #tpu.memory_space<vmem>>, vector<128x512xbf16>
    %cst_69 = arith.constant dense<0.000000e+00> : vector<8x512xf32>
    %167 = tpu.matmul %133, %166, %cst_69 {dimension_numbers = #tpu.dot_dimension_numbers<[1], [0], [0], [1], [0, 0, 1, 1], [], []>} : vector<8x128xbf16>, vector<128x512xbf16>, vector<8x512xf32> -> vector<8x512xf32>
    %c0_70 = arith.constant 0 : index
    %c1536_71 = arith.constant 1536 : index
    %168 = vector.load %arg7[%c0_70, %c1536_71] : memref<1x2048xf32, #tpu.memory_space<vmem>>, vector<1x512xf32>
    %169 = vector.broadcast %168 : vector<1x512xf32> to vector<8x512xf32>
    %170 = arith.addf %167, %169 : vector<8x512xf32>
    %cst_72 = arith.constant 0.000000e+00 : f32
    %171 = vector.broadcast %cst_72 : f32 to vector<8x512xf32>
    %172 = arith.maximumf %170, %171 : vector<8x512xf32>
    %173 = arith.truncf %172 : vector<8x512xf32> to vector<8x512xbf16>
    %c1536_73 = arith.constant 1536 : index
    %c0_74 = arith.constant 0 : index
    %174 = vector.load %arg8[%c1536_73, %c0_74] : memref<2048x128xbf16, #tpu.memory_space<vmem>>, vector<512x128xbf16>
    %cst_75 = arith.constant dense<0.000000e+00> : vector<8x128xf32>
    %175 = tpu.matmul %173, %174, %cst_75 {dimension_numbers = #tpu.dot_dimension_numbers<[1], [0], [0], [1], [0, 0, 1, 1], [], []>} : vector<8x512xbf16>, vector<512x128xbf16>, vector<8x128xf32> -> vector<8x128xf32>
    %176 = arith.addf %165, %175 : vector<8x128xf32>
    %c0_76 = arith.constant 0 : index
    %c0_77 = arith.constant 0 : index
    %177 = vector.load %arg9[%c0_76, %c0_77] : memref<1x128xf32, #tpu.memory_space<vmem>>, vector<1x128xf32>
    %178 = vector.broadcast %177 : vector<1x128xf32> to vector<8x128xf32>
    %179 = arith.addf %176, %178 : vector<8x128xf32>
    %180 = arith.addf %132, %179 : vector<8x128xf32>
    %c0_78 = arith.constant 0 : index
    %c0_79 = arith.constant 0 : index
    %181 = vector.load %arg12[%c0_78, %c0_79] : memref<1x128xf32, #tpu.memory_space<vmem>>, vector<1x128xf32>
    %c0_80 = arith.constant 0 : index
    %c0_81 = arith.constant 0 : index
    %182 = vector.load %arg13[%c0_80, %c0_81] : memref<1x128xf32, #tpu.memory_space<vmem>>, vector<1x128xf32>
    %cst_82 = arith.constant dense<0.000000e+00> : vector<8xf32>
    %183 = vector.multi_reduction <add>, %180, %cst_82 [1] : vector<8x128xf32> to vector<8xf32>
    %184 = vector.shape_cast %183 : vector<8xf32> to vector<8x1xf32>
    %cst_83 = arith.constant 3.125000e-02 : f32
    %185 = vector.broadcast %cst_83 : f32 to vector<8x1xf32>
    %186 = arith.mulf %184, %185 : vector<8x1xf32>
    %187 = arith.mulf %180, %180 : vector<8x128xf32>
    %cst_84 = arith.constant dense<0.000000e+00> : vector<8xf32>
    %188 = vector.multi_reduction <add>, %187, %cst_84 [1] : vector<8x128xf32> to vector<8xf32>
    %189 = vector.shape_cast %188 : vector<8xf32> to vector<8x1xf32>
    %cst_85 = arith.constant 3.125000e-02 : f32
    %190 = vector.broadcast %cst_85 : f32 to vector<8x1xf32>
    %191 = arith.mulf %189, %190 : vector<8x1xf32>
    %192 = arith.mulf %186, %186 : vector<8x1xf32>
    %193 = arith.subf %191, %192 : vector<8x1xf32>
    %194 = vector.broadcast %186 : vector<8x1xf32> to vector<8x128xf32>
    %195 = arith.subf %180, %194 : vector<8x128xf32>
    %cst_86 = arith.constant 9.99999974E-6 : f32
    %196 = vector.broadcast %cst_86 : f32 to vector<8x1xf32>
    %197 = arith.addf %193, %196 : vector<8x1xf32>
    %198 = math.rsqrt %197 : vector<8x1xf32>
    %199 = vector.broadcast %198 : vector<8x1xf32> to vector<8x128xf32>
    %200 = arith.mulf %195, %199 : vector<8x128xf32>
    %201 = vector.broadcast %181 : vector<1x128xf32> to vector<8x128xf32>
    %202 = arith.mulf %200, %201 : vector<8x128xf32>
    %203 = vector.broadcast %182 : vector<1x128xf32> to vector<8x128xf32>
    %204 = arith.addf %202, %203 : vector<8x128xf32>
    %205 = vector.shape_cast %204 : vector<8x128xf32> to vector<1x8x128xf32>
    %c0_87 = arith.constant 0 : index
    %206 = memref.load %arg14[%c0_87] : memref<1xf32, #tpu.memory_space<smem>>
    %207 = vector.broadcast %206 : f32 to vector<1x8x128xf32>
    %208 = arith.mulf %207, %205 : vector<1x8x128xf32>
    %cst_88 = arith.constant 1.000000e+00 : f32
    %209 = arith.subf %cst_88, %206 : f32
    %c0_89 = arith.constant 0 : index
    %c0_90 = arith.constant 0 : index
    %c0_91 = arith.constant 0 : index
    %210 = vector.load %arg1[%c0_89, %c0_90, %c0_91] : memref<1x8x128xf32, #tpu.memory_space<vmem>>, vector<1x8x128xf32>
    %211 = vector.broadcast %209 : f32 to vector<1x8x128xf32>
    %212 = arith.mulf %211, %210 : vector<1x8x128xf32>
    %213 = arith.addf %208, %212 : vector<1x8x128xf32>
    %c0_92 = arith.constant 0 : index
    %c0_93 = arith.constant 0 : index
    %c0_94 = arith.constant 0 : index
    %214 = vector.load %arg15[%c0_92, %c0_93, %c0_94] : memref<1x8x128xf32, #tpu.memory_space<vmem>>, vector<1x8x128xf32>
    tpu.vector_store %arg15[%c0_92, %c0_93, %c0_94], %213 {strides = array<i32>} : memref<1x8x128xf32, #tpu.memory_space<vmem>>, vector<1x8x128xf32>,
    return
  }
  func.func @transform_0(%arg0: i32) -> (i32, i32, i32) {
    %c0_i32 = arith.constant 0 : i32
    %c0_i32_0 = arith.constant 0 : i32
    %c0_i32_1 = arith.constant 0 : i32
    return %arg0, %c0_i32, %c0_i32_0 : i32, i32, i32
  }
  func.func @transform_1(%arg0: i32) -> (i32, i32) {
    %c0_i32 = arith.constant 0 : i32
    %c0_i32_0 = arith.constant 0 : i32
    %c0_i32_1 = arith.constant 0 : i32
    return %c0_i32, %c0_i32_0 : i32, i32
  }
  func.func @transform_2(%arg0: i32) -> (i32, i32) {
    %c0_i32 = arith.constant 0 : i32
    %c0_i32_0 = arith.constant 0 : i32
    %c0_i32_1 = arith.constant 0 : i32
    return %c0_i32, %c0_i32_0 : i32, i32
  }
  func.func @transform_3(%arg0: i32) -> (i32, i32) {
    %c0_i32 = arith.constant 0 : i32
    %c0_i32_0 = arith.constant 0 : i32
    %c0_i32_1 = arith.constant 0 : i32
    return %c0_i32, %c0_i32_0 : i32, i32
  }
  func.func @transform_4(%arg0: i32) -> (i32, i32) {
    %c0_i32 = arith.constant 0 : i32
    %c0_i32_0 = arith.constant 0 : i32
    %c0_i32_1 = arith.constant 0 : i32
    return %c0_i32, %c0_i32_0 : i32, i32
  }
  func.func @transform_5(%arg0: i32) -> (i32, i32) {
    %c0_i32 = arith.constant 0 : i32
    %c0_i32_0 = arith.constant 0 : i32
    %c0_i32_1 = arith.constant 0 : i32
    return %c0_i32, %c0_i32_0 : i32, i32
  }
  func.func @transform_6(%arg0: i32) -> (i32, i32) {
    %c0_i32 = arith.constant 0 : i32
    %c0_i32_0 = arith.constant 0 : i32
    %c0_i32_1 = arith.constant 0 : i32
    return %c0_i32, %c0_i32_0 : i32, i32
  }
  func.func @transform_7(%arg0: i32) -> (i32, i32) {
    %c0_i32 = arith.constant 0 : i32
    %c0_i32_0 = arith.constant 0 : i32
    %c0_i32_1 = arith.constant 0 : i32
    return %c0_i32, %c0_i32_0 : i32, i32
  }
  func.func @transform_8(%arg0: i32) -> (i32, i32) {
    %c0_i32 = arith.constant 0 : i32
    %c0_i32_0 = arith.constant 0 : i32
    %c0_i32_1 = arith.constant 0 : i32
    return %c0_i32, %c0_i32_0 : i32, i32
  }
  func.func @transform_9(%arg0: i32) -> (i32, i32) {
    %c0_i32 = arith.constant 0 : i32
    %c0_i32_0 = arith.constant 0 : i32
    %c0_i32_1 = arith.constant 0 : i32
    return %c0_i32, %c0_i32_0 : i32, i32
  }
  func.func @transform_10(%arg0: i32) -> (i32, i32) {
    %c0_i32 = arith.constant 0 : i32
    %c0_i32_0 = arith.constant 0 : i32
    %c0_i32_1 = arith.constant 0 : i32
    return %c0_i32, %c0_i32_0 : i32, i32
  }
  func.func @transform_11(%arg0: i32) -> (i32, i32) {
    %c0_i32 = arith.constant 0 : i32
    %c0_i32_0 = arith.constant 0 : i32
    %c0_i32_1 = arith.constant 0 : i32
    return %c0_i32, %c0_i32_0 : i32, i32
  }
  func.func @transform_12(%arg0: i32) -> (i32, i32) {
    %c0_i32 = arith.constant 0 : i32
    %c0_i32_0 = arith.constant 0 : i32
    %c0_i32_1 = arith.constant 0 : i32
    return %c0_i32, %c0_i32_0 : i32, i32
  }
  func.func @transform_13(%arg0: i32) -> i32 {
    %c0_i32 = arith.constant 0 : i32
    %c0_i32_0 = arith.constant 0 : i32
    return %c0_i32 : i32
  }
  func.func @transform_14(%arg0: i32) -> (i32, i32, i32) {
    %c0_i32 = arith.constant 0 : i32
    %c0_i32_0 = arith.constant 0 : i32
    %c0_i32_1 = arith.constant 0 : i32
    return %arg0, %c0_i32, %c0_i32_0 : i32, i32, i32
  }
}

</mosaic_0001>

<bundles_post_ra>
// kernel: tpu_custom_call.1
= control target key start
LH: loop header
LB: loop body
LE: loop exit
PB: predicated region body
PF: predicated region fallthrough
CT: control target
= control target key end

     0   :  { %s5863_s0 = inlined_call_operand.hbm [shape: f32[2,8,128], index: 0, kind: input, shape index: {}]   ;;  %s5864_s1 = inlined_call_operand.hbm [shape: bf16[128,384], index: 1, kind: input, shape index: {}]   ;;  %s5865_s2 = inlined_call_operand.vmem [shape: f32[1,384], index: 2, kind: input, shape index: {}]   ;;  %s5866_s3 = inlined_call_operand.hbm [shape: bf16[128,128], index: 3, kind: input, shape index: {}]   ;;  %s5867_s4 = inlined_call_operand.vmem [shape: f32[1,128], index: 4, kind: input, shape index: {}]   ;;  %s5868_s5 = inlined_call_operand.hbm [shape: bf16[128,2048], index: 5, kind: input, shape index: {}]   ;;  %s5869_s6 = inlined_call_operand.hbm [shape: f32[1,2048], index: 6, kind: input, shape index: {}]   ;;  %s5870_s7 = inlined_call_operand.hbm [shape: bf16[2048,128], index: 7, kind: input, shape index: {}]   ;;  %s5871_s8 = inlined_call_operand.vmem [shape: f32[1,128], index: 8, kind: input, shape index: {}]   ;;  %s5872_s9 = inlined_call_operand.vmem [shape: f32[1,128], index: 9, kind: input, shape index: {}]   ;;  %s5873_s10 = inlined_call_operand.vmem [shape: f32[1,128], index: 10, kind: input, shape index: {}]   ;;  %s5874_s11 = inlined_call_operand.vmem [shape: f32[1,128], index: 11, kind: input, shape index: {}]   ;;  %s5875_s12 = inlined_call_operand.vmem [shape: f32[1,128], index: 12, kind: input, shape index: {}]   ;;  %s5876_s13 = inlined_call_operand.<no memory space> [shape: f32[1], index: 13, kind: input, shape index: {}]   ;;  %s5877_s14 = inlined_call_operand.hbm [shape: f32[2,8,128], index: 14, kind: output, shape index: {}]  }
   0x1   :  { %5884 = sst [smem:[#allocation23_spill]] %s5864_s1 }
   0x2   :  { %5885 = sst [smem:[#allocation24_spill]] %s5866_s3 }
   0x3   :  { %5886 = sst [smem:[#allocation25_spill]] %s5868_s5 }
   0x4   :  { %5887 = sst [smem:[#allocation26_spill]] %s5869_s6 }
   0x5   :  { %5888 = sst [smem:[#allocation27_spill]] %s5870_s7 }
   0x6   :  { %5889 = sst [smem:[#allocation28_spill]] %s5877_s14 }
   0x7   :  { %19 = sst [smem:[#allocation3]] %s5876_s13 }
   0x8   :  { %20 = vsyncpa [#allocation5], 0 }
   0x9   :  { %22 = vsyncpa [#allocation5 + $0x1], 0 }
   0xa   :  { %23 = vsyncpa [#allocation8], 0 }
   0xb   :  { %24 = vsyncpa [#allocation11], 0 }
   0xc   :  { %25 = vsyncpa [#allocation14], 0 }
   0xd   :  { %26 = vsyncpa [#allocation6], 0 }
   0xe   :  { %28 = vsyncpa [#allocation6 + $0x1], 0  ;;  %s5430_s15 = smov 0   ;;  %s5432_s16 = smov 0  }
   0xf   :  { %s5434_s17 = smov 0   ;;  %s5436_s18 = smov 0  }
  0x10 LB: > { %5890 = sst [smem:[#allocation21_spill]] %s5328_s17  ;;  %s5334_s13 = smov [#allocation7]   ;;  %s5332_s18 = sphi %s5436_s18, %s5922_s18   ;;  %s5328_s17 = sphi %s5434_s17, %s5919_s17   ;;  %s5324_s16 = sphi %s5432_s16, %s5921_s16   ;;  %s5320_s15 = sphi %s5430_s15, %s5920_s15  }
  0x11   : > { %s376_s19 = sshll.u32 %s5334_s13, 4  ;;  %s5451_s20 = sadd.s32 4294967295, %s5332_s18   ;;  %s377_s19 = int_to_ptr.vmem [resolvable:$true] %s376_s19 }
  0x12   : > { %p4174_p0 = scmp.ge.s32.totalorder %s5332_s18, 1  ;;  %p5879_p1 = scmp.eq.s32.totalorder %s5451_s20, 0 }
  0x13   : > { %p364_p2 = scmp.lt.s32.totalorder %s5332_s18, 3  ;;  %s5335_s23 = smov [#allocation10]  }
  0x14   : > { %s408_s24 = sshll.u32 %s5335_s23, 4  ;;  %s5336_s25 = smov [#allocation9]   ;;  %s5469_s24 = int_to_ptr.vmem [resolvable:$true] %s408_s24 }
  0x15   : > { %p5456_p3 = pnand %p4174_p0, %p364_p2  ;;  %s5471_s26 = sshll.u32 %s5336_s25, 4  ;;  %s393_s26 = int_to_ptr.vmem [resolvable:$true] %s5471_s26 }
  0x16   : > { %s5109_s28 = scalar_lea.vmem %s377_s19, 3072  ;;  %p5117_p11 = scmp.lt.s32.totalorder %s377_s19, %s377_s19 }
  0x17   : > { %s5891_s21 = scalar_select %p5456_p3, 1, 0 }
  0x18   : > { %p4825_p5 = pneg %p5456_p3  ;;  %p5110_p8 = scmp.ne.s32.totalorder %s377_s19, %s5109_s28 }
  0x19   : > { %p5118_p12 = scmp.lt.s32.totalorder %s5109_s28, %s5109_s28 }
  0x1a   : > { %p5465_p6 = pnand %p4825_p5, %p5879_p1 }
  0x1b   : > { %p5119_p13 = por %p5118_p12, %p5117_p11 }
  0x1c   : > { %p5475_p7 = pneg %p5465_p6 }
  0x1e   : > { %p5112_p9 = pnand %p5110_p8, %p5475_p7 }
  0x20   : > { %p5113_p10 = pneg %p5112_p9 }
  0x22   : > { %p5120_p0 = pnand %p5119_p13, %p5113_p10 }
  0x24   : > { %5123 = shalt.err (!%p5120_p0)
}
  0x25   : > { %s5337_s29 = smov 192   ;;  %s5338_s30 = smov 12  }
  0x26   : > { %s5894_s1 = sld [smem:[#allocation23_spill]]  ;;  %s5135_s25 = scalar_lea.vmem %s5469_s24, 16384 }
  0x27   : > { %p5136_p2 = scmp.ne.s32.totalorder %s5469_s24, %s5135_s25  ;;  %p5143_p9 = scmp.lt.s32.totalorder %s5469_s24, %s5469_s24 }
  0x28   : > { %p5144_p10 = scmp.lt.s32.totalorder %s5135_s25, %s5135_s25 }
  0x29   : > { %p5138_p5 = pnand %p5136_p2, %p5475_p7 }
  0x2a   : > { %p5145_p11 = por %p5144_p10, %p5143_p9 }
  0x2b   : > { %p5139_p8 = pneg %p5138_p5 }
  0x2c   : > { %4828 = dma.hbm_to_vmem [thread:$0]  (!%p5465_p6), %s5894_s1, 3072, %s377_s19, [#allocation8], %s5337_s29, %s5337_s29, %s5338_s30  }
  0x2d   : > { %p5146_p12 = pnand %p5145_p11, %p5139_p8 }
  0x2f   : > { %5149 = shalt.err (!%p5146_p12)
}
  0x30   : > { %s5339_s28 = smov 1024   ;;  %s5340_s14 = smov 64  }
  0x31   : > { %s5895_s5 = sld [smem:[#allocation25_spill]]  ;;  %s5161_s30 = scalar_lea.vmem %s393_s26, 1024 }
  0x32   : > { %p5162_p13 = scmp.ne.s32.totalorder %s393_s26, %s5161_s30  ;;  %p5169_p5 = scmp.lt.s32.totalorder %s393_s26, %s393_s26 }
  0x33   : > { %p5170_p8 = scmp.lt.s32.totalorder %s5161_s30, %s5161_s30 }
  0x34   : > { %p5164_p0 = pnand %p5162_p13, %p5475_p7 }
  0x35   : > { %p5171_p9 = por %p5170_p8, %p5169_p5 }
  0x36   : > { %p5165_p2 = pneg %p5164_p0 }
  0x37   : > { %4834 = dma.hbm_to_vmem [thread:$0]  (!%p5465_p6), %s5895_s5, 16384, %s5469_s24, [#allocation11], %s5339_s28, %s5339_s28, %s5340_s14  }
  0x38   : > { %p5172_p10 = pnand %p5171_p9, %p5165_p2 }
  0x3a   : > { %5175 = shalt.err (!%p5172_p10)
}
  0x3b   : > { %s5341_s13 = smov 4   ;;  %s5896_s3 = sld [smem:[#allocation24_spill]] }
  0x3c   : > { %s5342_s24 = smov [#allocation12]   ;;  %s5343_s19 = smov [#allocation13]  }
  0x3d   : > { %s422_s28 = sshll.u32 %s5342_s24, 4  ;;  %s432_s29 = sshll.u32 %s5343_s19, 4  ;;  %s423_s28 = int_to_ptr.vmem [resolvable:$true] %s422_s28  ;;  %s433_s29 = int_to_ptr.vmem [resolvable:$true] %s432_s29 }
  0x3e   : > { %s5187_s30 = scalar_lea.vmem %s423_s28, 256  ;;  %p5195_p0 = scmp.lt.s32.totalorder %s423_s28, %s423_s28 }
  0x3f   : > { %p5188_p11 = scmp.ne.s32.totalorder %s423_s28, %s5187_s30  ;;  %p5196_p2 = scmp.lt.s32.totalorder %s5187_s30, %s5187_s30 }
  0x41   : > { %4831 = dma.hbm_to_vmem [thread:$0]  (!%p5465_p6), %s5896_s3, 1024, %s393_s26, [#allocation8], %s5340_s14, %s5340_s14, %s5341_s13  }
  0x42   : > { %p5190_p12 = pnand %p5188_p11, %p5475_p7  ;;  %p5197_p5 = por %p5196_p2, %p5195_p0 }
  0x44   : > { %p5191_p13 = pneg %p5190_p12 }
  0x46   : > { %p5198_p8 = pnand %p5197_p5, %p5191_p13 }
  0x48   : > { %5201 = shalt.err (!%p5198_p8)
}
  0x49   : > { %s5897_s6 = sld [smem:[#allocation26_spill]]  ;;  %s5213_s25 = scalar_lea.vmem %s433_s29, 16384 }
  0x4a   : > { %p5214_p9 = scmp.ne.s32.totalorder %s433_s29, %s5213_s25  ;;  %p5221_p1 = scmp.lt.s32.totalorder %s433_s29, %s433_s29 }
  0x4b   : > { %p5222_p11 = scmp.lt.s32.totalorder %s5213_s25, %s5213_s25 }
  0x4c   : > { %p5216_p10 = pnand %p5214_p9, %p5475_p7 }
  0x4d   : > { %p5223_p12 = por %p5222_p11, %p5221_p1 }
  0x4e   : > { %p5217_p4 = pneg %p5216_p10 }
  0x4f   : > { %4837 = dma.hbm_to_vmem [thread:$0]  (!%p5465_p6), %s5897_s6, 256, %s423_s28, [#allocation11]  }
  0x50   : > { %p5224_p3 = pnand %p5223_p12, %p5217_p4 }
  0x52   : > { %5227 = shalt.err (!%p5224_p3)
}
  0x53   : > { %s5898_s7 = sld [smem:[#allocation27_spill]]  ;;  %s4173_s22 = sadd.s32 4294967294, %s5332_s18  }
  0x54   : > { %s5529_s27 = sadd.s32 1, %s5332_s18   ;;  %s41_s30 = sadd.s32 1, %s5328_s17 }
  0x55   : > { %s38_s28 = ssub.s32 %s5332_s18, %s5529_s27  ;;  %p48_p3 = scmp.ne.s32.totalorder %s5328_s17, %s5324_s16 }
  0x56   : > { %p39_p1 = scmp.eq.s32.totalorder %s38_s28, 0  ;;  %p49_p4 = scmp.eq.s32.totalorder %s5332_s18, 0 }
  0x57   : > { %p54_p7 = scmp.ne.s32.totalorder %s5324_s16, %s5320_s15  ;;  %p5901_p0 = scmp.eq.s32.totalorder %s5451_s20, 0 }
  0x58   : > { %s5540_s23 = scalar_select %p39_p1, %s5328_s17, %s41_s30  }
  0x59   : > { %4840 = dma.hbm_to_vmem [thread:$0]  (!%p5465_p6), %s5898_s7, 16384, %s433_s29, [#allocation14], %s5340_s14, %s5340_s14, %s5341_s13  }
  0x5a   : > { %5899 = sst [smem:[#allocation22_spill]] %s5540_s23  ;;  %p5542_p13 = por %p49_p4, %p48_p3 }
  0x5b   : > { %p5548_p6 = por %p5901_p0, %p54_p7  ;;  %p351_p2 = scmp.eq.s32.totalorder %s5451_s20, 1 }
  0x5c   : > { %p357_p5 = scmp.eq.s32.totalorder %s4173_s22, 1  ;;  %p4854_p8 = scmp.lt.s32.totalorder %s5332_s18, 2 }
  0x5d   : > { %s5902_s14 = scalar_select %p5548_p6, 1, 0 }
  0x5e   : > { %s464_s13 = sand.u32 1, %s5328_s17   ;;  %p5555_p9 = por %p351_p2, %p48_p3 }
  0x5f   : > { %p5559_p10 = por %p357_p5, %p54_p7  ;;  %s4181_s24 = sshll.u32 %s464_s13, 3 }
  0x60   : > { %s5903_s29 = scalar_select %p5555_p9, 1, 0 }
  0x61   : > { %s5904_s25 = scalar_select %p5559_p10, 1, 0 }
  0x62   : > { %s4182_s19 = sshll.u32 %s5332_s18, 7  ;;  %s468_s22 = scalar_lea.vmem [#allocation4], %s4181_s24 }
  0x63   : > { %s5567_s1 = scalar_lea.hbm %s5863_s0, %s4182_s19  ;;  %s475_s3 = sshll.u32 %s468_s22, 4  ;;  %s476_s3 = int_to_ptr.vmem [resolvable:$true] %s475_s3 }
  0x64   : > { %p5571_p11 = pnand %p4854_p8, %p5542_p13  ;;  %s465_s6 = scalar_lea.sflag [#allocation5], %s464_s13 }
  0x65   : > { %s5228_s7 = scalar_lea.hbm %s5567_s1, 128  ;;  %s5233_s30 = scalar_lea.hbm %s5863_s0, 256 }
  0x66   : > { %p5229_p12 = scmp.ne.s32.totalorder %s5567_s1, %s5228_s7  ;;  %p5230_p1 = pneg %p5571_p11 }
  0x67   : > { %p5234_p7 = scmp.lt.s32.totalorder %s5567_s1, %s5863_s0  ;;  %p5235_p13 = scmp.lt.s32.totalorder %s5233_s30, %s5228_s7 }
  0x68   : > { %p5231_p3 = pnand %p5230_p1, %p5229_p12 }
  0x69   : > { %p5236_p0 = por %p5235_p13, %p5234_p7 }
  0x6a   : > { %p5232_p4 = pneg %p5231_p3 }
  0x6c   : > { %p5237_p2 = pnand %p5236_p0, %p5232_p4 }
  0x6e   : > { %5240 = shalt.err (!%p5237_p2)
}
  0x6f   : > { %s5241_s26 = scalar_lea.vmem %s476_s3, 128  ;;  %s5344_s13 = smov [#allocation4]  }
  0x70   : > { %p5242_p5 = scmp.ne.s32.totalorder %s476_s3, %s5241_s26  ;;  %s5246_s23 = sshll.u32 %s5344_s13, 4  ;;  %s5247_s23 = int_to_ptr.vmem [resolvable:$false] %s5246_s23 }
  0x71   : > { %s5248_s17 = scalar_lea.vmem %s5247_s23, 256  ;;  %p5249_p12 = scmp.lt.s32.totalorder %s476_s3, %s5247_s23 }
  0x72   : > { %p5244_p8 = pnand %p5242_p5, %p5230_p1  ;;  %p5250_p3 = scmp.lt.s32.totalorder %s5248_s17, %s5241_s26 }
  0x74   : > { %p5245_p10 = pneg %p5244_p8  ;;  %p5251_p9 = por %p5250_p3, %p5249_p12 }
  0x76   : > { %p5252_p6 = pnand %p5251_p9, %p5245_p10 }
  0x78   : > { %5255 = shalt.err (!%p5252_p6)
}
  0x79   : > { %4844 = dma.hbm_to_vmem [thread:$0]  (!%p5571_p11), %s5567_s1, 128, %s476_s3, %s465_s6  }
  0x7a   : > { %p5906_p4 = scmp.ne.s32.totalorder %s5891_s21, 0 }
  0x7b   : > { %s5592_s7 = sand.u32 (!%p5906_p4), 1, %s5324_s16   ;;  %p5907_p6 = scmp.ne.s32.totalorder (!%p5906_p4), %s5902_s14, 0 }
  0x7c   : > { %484 = sbr.rel (%p5906_p4) target bundleno = 2916 (0xb64), region = 76  ;;  %s4184_s19 = sshll.u32 (!%p5906_p4), %s5592_s7, 3 }
  0x7d   : > { %s487_s23 = scalar_lea.sflag (!%p5906_p4), [#allocation5], %s5592_s7  ;;  %s5598_s17 = scalar_lea.vmem (!%p5906_p4), [#allocation4], %s4184_s19 }
  0x81   : > { %5299 = dma.done.wait (%p5907_p6), %s487_s23, 128  }
  0x82   : > { %5301 = vsyncadd (%p5907_p6), %s487_s23, 4294967168  ;;  %p5908_p9 = scmp.eq.s32.totalorder %s5451_s20, 0 }
  0x84   : > { %5303 = dma.done.wait (%p5908_p9), [#allocation8], 4096   ;;  %p5909_p10 = pmov %p5908_p9 }
  0x85   : > { %p5910_p11 = pmov %p5908_p9 }
  0x86   : > { %5305 = vsyncadd (%p5909_p10), [#allocation8], 4294963200 }
  0x87   : > { %5307 = dma.done.wait (%p5910_p11), [#allocation11], 16640   ;;  %p5911_p1 = pmov %p5908_p9 }
  0x89   : > { %5309 = vsyncadd (%p5911_p1), [#allocation11], 4294950656  ;;  %p5912_p7 = pmov %p5911_p1 }
  0x8a   : > { %p5913_p13 = pmov %p5911_p1 }
  0x8b   : > { %5311 = dma.done.wait (%p5912_p7), [#allocation14], 16384  }
  0x8c   : > { %5313 = vsyncadd (%p5913_p13), [#allocation14], 4294950912  ;;  %v5345_v0 = vmov 0   ;;  %v5346_v1 = vmov 0.0   ;;  %v4909_v2 = vld [vmem:[#allocation7 + $0xac] ss:$12 sps:$4 sm:$0xff]   ;;  %v592_v28 = vlaneseq }
  0x8d   : > { %767 = vmatprep.mubr.bf16.mxu0 %v5345_v0  ;;  %4713 = vmatprep.subr.bf16.mxu1 %v5346_v1  ;;  %v4911_v3 = vld [vmem:[#allocation7 + $0xa8] ss:$12 sps:$4 sm:$0xff]   ;;  %v4914_v5 = vld [vmem:[#allocation7 + $0x90] ss:$12 sps:$4 sm:$0xff]   ;;  %v4917_v7 = vld [vmem:[#allocation7 + $0x78] ss:$12 sps:$4 sm:$0xff]  }
  0x8e   : > { %735 = vmatprep.subr.bf16.mxu0 %v4909_v2  ;;  %v4912_v4 = vld [vmem:[#allocation7 + $0x94] ss:$12 sps:$4 sm:$0xff]   ;;  %v4915_v6 = vld [vmem:[#allocation7 + $0x7c] ss:$12 sps:$4 sm:$0xff]   ;;  %v4918_v8 = vld [vmem:[#allocation7 + $0x64] ss:$12 sps:$4 sm:$0xff]  }
  0x8f   : > { %736 = vmatpush1.bf16.msra.mxu0 %v4911_v3  ;;  %v4920_v9 = vld [vmem:[#allocation7 + $0x60] ss:$12 sps:$4 sm:$0xff]   ;;  %v4933_v10 = vld [vmem:[#allocation7 + $0xb0] ss:$12 sps:$4 sm:$0xff]   ;;  %v4934_v12 = vld [vmem:[#allocation7 + $0x98] ss:$12 sps:$4 sm:$0xff]  }
  0x90   : > { %737 = vmatprep.subr.bf16.mxu0 %v4912_v4  ;;  %v4921_v11 = vld [vmem:[#allocation7 + $0x4c] ss:$12 sps:$4 sm:$0xff]   ;;  %4714 = vmatpush3.bf16.msra.mxu1 %v4933_v10  ;;  %v4923_v13 = vld [vmem:[#allocation7 + $0x48] ss:$12 sps:$4 sm:$0xff]   ;;  %v4926_v15 = vld [vmem:[#allocation7 + $0x30] ss:$12 sps:$4 sm:$0xff]  }
  0x91   : > { %4715 = vmatprep.subr.bf16.mxu1 %v5346_v1  ;;  %v4924_v14 = vld [vmem:[#allocation7 + $0x34] ss:$12 sps:$4 sm:$0xff]   ;;  %v4927_v17 = vld [vmem:[#allocation7 + $0x1c] ss:$12 sps:$4 sm:$0xff]   ;;  %v4929_v19 = vld [vmem:[#allocation7 + $0x18] ss:$12 sps:$4 sm:$0xff]  }
  0x92   : > { %v4935_v16 = vld [vmem:[#allocation7 + $0x80] ss:$12 sps:$4 sm:$0xff]   ;;  %v4936_v18 = vld [vmem:[#allocation7 + $0x68] ss:$12 sps:$4 sm:$0xff]   ;;  %v4930_v20 = vld [vmem:[#allocation7 + $0x4] ss:$12 sps:$4 sm:$0xff]  }
  0x93   : > { %738 = vmatpush1.bf16.msra.mxu0 %v4914_v5  ;;  %v4937_v21 = vld [vmem:[#allocation7 + $0x50] ss:$12 sps:$4 sm:$0xff]   ;;  %v4932_v22 = vld [vmem:[#allocation7] ss:$12 sps:$4 sm:$0xff]   ;;  %v4938_v24 = vld [vmem:[#allocation7 + $0x38] ss:$12 sps:$4 sm:$0xff]  }
  0x94   : > { %739 = vmatprep.subr.bf16.mxu0 %v4915_v6  ;;  %4716 = vmatpush3.bf16.msra.mxu1 %v4934_v12  ;;  %v556_v23 = vld [vmem:[%s5598_s17] sm:$0xff]  ;;  %v4939_v26 = vld [vmem:[#allocation7 + $0x20] ss:$12 sps:$4 sm:$0xff]   ;;  %vm5347_vm0 = vmmov 0   ;;  %v5634_v29 = vshrl.u32 %v592_v28, 7  ;;  %vm819_vm1 = vcmask 261120  }
  0x95   : > { %4717 = vmatprep.subr.bf16.mxu1 %v5346_v1  ;;  %v557_v25 = vpack.c.bf16 %v556_v23, %v556_v23  ;;  %v4940_v27 = vld [vmem:[#allocation7 + $0x8] ss:$12 sps:$4 sm:$0xff]   ;;  %4729 = vmatprep.mubr.msk.bf16.mxu1 %vm5347_vm0, %v5346_v1  ;;  %v590_v31 = vld [vmem:[%s5865_s2] sm:$0x7]  ;;  %s5348_s5 = smov 96   ;;  %s5349_s6 = smov 64  }
  0x96   : > { %v5637_v30 = vsub.s32 0, %v5634_v29  ;;  %v5643_v32 = vsub.s32 1, %v5634_v29  ;;  %s5350_s21 = smov 32   ;;  %v5658_v44 = vsub.s32 2, %v5634_v29  ;;  %vm881_vm2 = vcmask 1043456   ;;  %s4032_s1 = sld [smem:[#allocation3]] }
  0x97   : > { %740 = vmatpush1.bf16.msra.mxu0 %v4917_v7  ;;  %vm866_vm3 = vcmask 64512   ;;  %vm927_vm4 = vcmask 257024   ;;  %vm1049_vm5 = vcmask 519424   ;;  %vm1168_vm6 = vcmask 781824   ;;  %s4497_s28 = sshll.u32 %s5451_s20, 7  ;;  %s554_s30 = scalar_lea.vmem [#allocation15], %s4184_s19 }
  0x98   : > { %741 = vmatprep.subr.bf16.mxu0 %v4918_v8  ;;  %4718 = vmatpush3.bf16.msra.mxu1 %v4935_v16  ;;  %v595_v33 = vrot.slane %v590_v31, %v5637_v30  ;;  %v599_v34 = vrot.slane %v590_v31, %v5643_v32  ;;  %v603_v45 = vrot.slane %v590_v31, %v5658_v44  ;;  %vm1287_vm7 = vcmask 1044224   ;;  %s4055_s24 = sshll.u32 %s554_s30, 4  ;;  %s5914_s13 = sld [smem:[#allocation28_spill]]  ;;  %s4056_s24 = int_to_ptr.vmem [resolvable:$true] %s4055_s24 }
  0x99   : > { %4719 = vmatprep.subr.bf16.mxu1 %v5346_v1  ;;  %p5915_p2 = scmp.ne.s32.totalorder %s5903_s29, 0 }
  0x9b   : > { %742 = vmatpush1.bf16.msra.mxu0 %v4920_v9 }
  0x9c   : > { %743 = vmatprep.subr.bf16.mxu0 %v4921_v11  ;;  %4720 = vmatpush3.bf16.msra.mxu1 %v4936_v18  ;;  %s4035_s3 = ssub.f32 1.0, %s4032_s1 }
  0x9d   : > { %4721 = vmatprep.subr.bf16.mxu1 %v5346_v1 }
  0x9e   : > { %s4053_s23 = scalar_lea.hbm %s5914_s13, %s4497_s28 }
  0x9f   : > { %744 = vmatpush1.bf16.msra.mxu0 %v4923_v13 }
  0xa0   : > { %745 = vmatprep.subr.bf16.mxu0 %v4924_v14  ;;  %4722 = vmatpush3.bf16.msra.mxu1 %v4937_v21 }
  0xa1   : > { %4723 = vmatprep.subr.bf16.mxu1 %v5346_v1 }
  0xa3   : > { %746 = vmatpush1.bf16.msra.mxu0 %v4926_v15 }
  0xa4   : > { %747 = vmatprep.subr.bf16.mxu0 %v4927_v17  ;;  %4724 = vmatpush3.bf16.msra.mxu1 %v4938_v24 }
  0xa5   : > { %4725 = vmatprep.subr.bf16.mxu1 %v5346_v1 }
  0xa7   : > { %748 = vmatpush1.bf16.msra.mxu0 %v4929_v19 }
  0xa8   : > { %749 = vmatprep.subr.bf16.mxu0 %v4930_v20  ;;  %4726 = vmatpush3.bf16.msra.mxu1 %v4939_v26 }
  0xa9   : > { %4727 = vmatprep.subr.bf16.mxu1 %v5346_v1 }
  0xab   : > { %750 = vmatpush1.bf16.msra.mxu0 %v4932_v22 }
  0xac   : > { %4757 = vmatprep.subr.bf16.mxu0 %v5346_v1  ;;  %4728 = vmatpush3.bf16.msra.mxu1 %v4940_v27 }
  0xad   : > { %4733 = vmatprep.subr.bf16.mxu1 %v5346_v1 }
  0xae   : > { %768 = vmatmul.mubr.bf16.vlgmr.msra.gmra.mxu0 %v557_v25 }
  0xaf   : > { %4759 = vmatprep.mubr.msk.bf16.mxu0 %vm5347_vm0, %v5346_v1  ;;  %4730 = vmatmul.mubr.bf16.vlgmr.msra.gmra.mxu1 %v557_v25 }
  0xb0   : > { %4735 = vmatprep.mubr.msk.bf16.mxu1 %vm5347_vm0, %v5346_v1 }
 0x16e   : > { %v769_v35 = vpop.f32.mrf.mxu0 }
 0x16f   : > { %v770_v36 = vadd.f32 %v769_v35, %v595_v33  ;;  %v810_v46 = vpop.f32.mrf.mxu1 }
 0x170   : > { %v771_v37 = vpop.f32.mrf.mxu0  ;;  %v811_v47 = vadd.f32 %v810_v46, %v603_v45 }
 0x171   : > { %v816_v38 = vpack.c.bf16 %v770_v36, %v770_v36  ;;  %v772_v39 = vadd.f32 %v771_v37, %v599_v34  ;;  %v4731_v48 = vpop.f32.mrf.mxu1 }
 0x172   : > { %v773_v40 = vpop.f32.mrf.mxu0  ;;  %v5661_v49 = vpack.c.bf16 %v811_v47, %v811_v47 }
 0x173   : > { %v817_v41 = vpack.c.bf16 %v772_v39, %v772_v39  ;;  %930 = vrot.lane.b32.xlu1 %v816_v38, %s5348_s5  ;;  %v813_v50 = vpop.f32.mrf.mxu1 }
 0x174   : > { %v774_v42 = vpop.f32.mrf.mxu0  ;;  %v883_v51 = vsel %vm881_vm2, %v5661_v49, 0 }
 0x175   : > { %v824_v43 = vsel %vm819_vm1, %v817_v41, 0  ;;  %v4732_v52 = vpop.f32.mrf.mxu1 }
 0x176   : > { %4734 = vmatpush3.bf16.xpose.msra.mxu1 %v824_v43 }
 0x177   : > { %1053 = vrot.lane.b32.xlu1 %v817_v41, %s5349_s6  ;;  %4739 = vmatprep.subr.bf16.mxu1 %v5346_v1 }
 0x17b   : > { %1051 = vrot.lane.b32.xlu1 %v816_v38, %s5349_s6 }
 0x17d   : > { %4736 = vmatmul.mubr.msk.bf16.vlgmr.msra.gmra.mxu1 %vm819_vm1, %v816_v38 }
 0x17e   : > { %4741 = vmatprep.mubr.msk.bf16.mxu1 %vm5347_vm0, %v5346_v1  ;;  %4740 = vmatpush3.bf16.msra.mxu1 %v883_v51 }
 0x17f   : > { %1172 = vrot.lane.b32.xlu1 %v817_v41, %s5350_s21  ;;  %4745 = vmatprep.subr.bf16.mxu1 %v5346_v1 }
 0x183   : > { %1170 = vrot.lane.b32.xlu1 %v816_v38, %s5350_s21 }
 0x1e5   : > { %v931_v53 = vpop.permute.xlu1 %930 }
 0x1e9   : > { %v1054_v54 = vpop.permute.xlu1 %1053 }
 0x1ea   : > { %v1059_v55 = vsel %vm819_vm1, %v1054_v54, 0 }
 0x1eb   : > { %4758 = vmatpush3.bf16.xpose.msra.mxu0 %v1059_v55 }
 0x1ec   : > { %4769 = vmatprep.subr.bf16.mxu0 %v5346_v1 }
 0x1ed   : > { %v1052_v56 = vpop.permute.xlu1 %1051 }
 0x1f1   : > { %v1173_v57 = vpop.permute.xlu1 %1172 }
 0x1f2   : > { %v1178_v58 = vsel %vm819_vm1, %v1173_v57, 0  ;;  %4760 = vmatmul.mubr.msk.bf16.vlgmr.msra.gmra.mxu0 %vm819_vm1, %v1052_v56 }
 0x1f3   : > { %4770 = vmatpush3.bf16.xpose.msra.mxu0 %v1178_v58  ;;  %4771 = vmatprep.mubr.msk.bf16.mxu0 %vm5347_vm0, %v5346_v1  ;;  %v4941_v58 = vld [vmem:[#allocation9 + $0x38] sm:$0xff]  }
 0x1f4   : > { %4781 = vmatprep.subr.bf16.mxu0 %v5346_v1 }
 0x1f5   : > { %v1171_v59 = vpop.permute.xlu1 %1170 }
 0x1fa   : > { %4772 = vmatmul.mubr.msk.bf16.vlgmr.msra.gmra.mxu0 %vm819_vm1, %v1171_v59  ;;  %v4942_v59 = vld [vmem:[#allocation9 + $0x30] sm:$0xff]  }
 0x1fb   : > { %4797 = vmatprep.mubr.msk.bf16.mxu0 %vm5347_vm0, %v5346_v1  ;;  %4782 = vmatpush3.bf16.msra.mxu0 %v4941_v58  ;;  %v1457_v58 = vld [vmem:[#allocation10 + $0x308] sm:$0xff] }
 0x1fc   : > { %4783 = vmatprep.subr.bf16.mxu0 %v5346_v1 }
 0x1ff   : > { %4784 = vmatpush3.bf16.msra.mxu0 %v4942_v59 }
 0x200   : > { %4785 = vmatprep.subr.bf16.mxu0 %v5346_v1 }
 0x23d   : > { %v860_v60 = vpop.f32.mrf.mxu1 }
 0x23e   : > { %v867_v61 = vsel %vm866_vm3, %v860_v60, -inf }
 0x23f   : > { %868 = vmax.xlane.f32.xlu0 %v867_v61  ;;  %v4737_v62 = vpop.f32.mrf.mxu1 }
 0x241   : > { %v863_v63 = vpop.f32.mrf.mxu1 }
 0x243   : > { %v4738_v2 = vpop.f32.mrf.mxu1 }
 0x255   : > { %933 = vrot.lane.b32.xlu0 %v817_v41, %s5348_s5 }
 0x2b2   : > { %v1095_v3 = vpop.f32.mrf.mxu0 }
 0x2b3   : > { %v1101_v4 = vsel %vm866_vm3, %v1095_v3, -inf }
 0x2b4   : > { %v4761_v5 = vpop.f32.mrf.mxu0  ;;  %1102 = vmax.xlane.f32.xlu0 %v1101_v4 }
 0x2b5   : > { %v4943_v5 = vld [vmem:[#allocation9 + $0x28] sm:$0xff]  }
 0x2b6   : > { %v1098_v6 = vpop.f32.mrf.mxu0  ;;  %4786 = vmatpush3.bf16.msra.mxu0 %v4943_v5 }
 0x2b7   : > { %v4944_v6 = vld [vmem:[#allocation9 + $0x20] sm:$0xff]   ;;  %4787 = vmatprep.subr.bf16.mxu0 %v5346_v1 }
 0x2b8   : > { %v4762_v7 = vpop.f32.mrf.mxu0 }
 0x2ba   : > { %v1214_v8 = vpop.f32.mrf.mxu0  ;;  %4788 = vmatpush3.bf16.msra.mxu0 %v4944_v6  ;;  %v1455_v6 = vld [vmem:[#allocation10 + $0x2c8] sm:$0xff] }
 0x2bb   : > { %v1220_v9 = vsel %vm866_vm3, %v1214_v8, -inf  ;;  %4789 = vmatprep.subr.bf16.mxu0 %v5346_v1 }
 0x2bc   : > { %1221 = vmax.xlane.f32.xlu1 %v1220_v9  ;;  %v4773_v10 = vpop.f32.mrf.mxu0  ;;  %v4945_v9 = vld [vmem:[#allocation9 + $0x18] sm:$0xff]  }
 0x2be   : > { %v1217_v11 = vpop.f32.mrf.mxu0  ;;  %4790 = vmatpush3.bf16.msra.mxu0 %v4945_v9 }
 0x2bf   : > { %4791 = vmatprep.subr.bf16.mxu0 %v5346_v1 }
 0x2c0   : > { %v4774_v12 = vpop.f32.mrf.mxu0 }
 0x2c1   : > { %v4946_v12 = vld [vmem:[#allocation9 + $0x10] sm:$0xff]  }
 0x2c2   : > { %4792 = vmatpush3.bf16.msra.mxu0 %v4946_v12  ;;  %v1449_v12 = vld [vmem:[#allocation10 + $0x208] sm:$0xff] }
 0x2c3   : > { %4793 = vmatprep.subr.bf16.mxu0 %v5346_v1 }
 0x2c8   : > { %v869_v13 = vpop.xlane.xlu0 %868 }
 0x2c9   : > { %v870_v14 = vsub.f32 %v860_v60, %v869_v13 }
 0x2ca   : > { %993 = vrot.lane.b32.xlu0 %v5661_v49, %s5348_s5 }
 0x2cb   : > { %v871_v15 = vmul.f32 1.442695, %v870_v14 }
 0x2cc   : > { %v934_v17 = vpop.permute.xlu0 %933 }
 0x2cd   : > { %5077 = vpow2.f32 %v871_v15  ;;  %v939_v19 = vsel %vm819_vm1, %v934_v17, 0 }
 0x2da   : > { %v5078_v16 = vpop.eup %5077 }
 0x2db   : > { %v877_v18 = vpack.c.bf16 %v5078_v16, %v5078_v16  ;;  %v873_v54 = vsel %vm866_vm3, %v5078_v16, 0.0 }
 0x2dd   : > { %4742 = vmatmul.mubr.msk.bf16.vlgmr.msra.gmra.mxu1 %vm866_vm3, %v877_v18  ;;  %v4947_v18 = vld [vmem:[#allocation9 + $0x8] sm:$0xff]  }
 0x2de   : > { %4746 = vmatpush3.bf16.xpose.msra.mxu1 %v939_v19  ;;  %4747 = vmatprep.mubr.msk.bf16.mxu1 %vm5347_vm0, %v5346_v1 }
 0x2df   : > { %4751 = vmatprep.subr.bf16.mxu1 %v5346_v1  ;;  %4794 = vmatpush3.bf16.msra.mxu0 %v4947_v18  ;;  %v1444_v18 = vld [vmem:[#allocation10 + $0x180] sm:$0xff] }
 0x2e0   : > { %4795 = vmatprep.subr.bf16.mxu0 %v5346_v1 }
 0x2e5   : > { %4748 = vmatmul.mubr.msk.bf16.vlgmr.msra.gmra.mxu1 %vm819_vm1, %v931_v53 }
 0x2e6   : > { %4753 = vmatprep.mubr.msk.bf16.mxu1 %vm5347_vm0, %v5346_v1 }
 0x33d   : > { %v1103_v20 = vpop.xlane.xlu0 %1102 }
 0x33e   : > { %v1104_v35 = vsub.f32 %v1095_v3, %v1103_v20 }
 0x340   : > { %v1105_v36 = vmul.f32 1.442695, %v1104_v35 }
 0x341   : > { %v994_v21 = vpop.permute.xlu0 %993 }
 0x342   : > { %v999_v22 = vsel %vm881_vm2, %v994_v21, 0  ;;  %5079 = vpow2.f32 %v1105_v36  ;;  %v4948_v21 = vld [vmem:[#allocation9] sm:$0xff]  }
 0x343   : > { %4752 = vmatpush3.bf16.msra.mxu1 %v999_v22  ;;  %4796 = vmatpush3.bf16.msra.mxu0 %v4948_v21 }
 0x344   : > { %4763 = vmatprep.subr.bf16.mxu1 %v5346_v1 }
 0x345   : > { %v1222_v39 = vpop.xlane.xlu1 %1221 }
 0x346   : > { %v1223_v40 = vsub.f32 %v1214_v8, %v1222_v39  ;;  %v1462_v39 = vld [vmem:[#allocation10 + $0x3c0] sm:$0xff] }
 0x348   : > { %v1224_v43 = vmul.f32 1.442695, %v1223_v40  ;;  %v1461_v40 = vld [vmem:[#allocation10 + $0x388] sm:$0xff] }
 0x34f   : > { %v5080_v37 = vpop.eup %5079 }
 0x350   : > { %v1107_v38 = vsel %vm866_vm3, %v5080_v37, 0.0  ;;  %v1111_v55 = vpack.c.bf16 %v5080_v37, %v5080_v37 }
 0x39d   : > { %v919_v23 = vpop.f32.mrf.mxu1 }
 0x39f   : > { %v4743_v24 = vpop.f32.mrf.mxu1 }
 0x3a1   : > { %v922_v25 = vpop.f32.mrf.mxu1 }
 0x3a3   : > { %v4744_v26 = vpop.f32.mrf.mxu1 }
 0x3a5   : > { %v975_v27 = vpop.f32.mrf.mxu1 }
 0x3a6   : > { %v981_v28 = vsel %vm866_vm3, %v975_v27, -inf }
 0x3a7   : > { %982 = vmax.xlane.f32.xlu1 %v981_v28  ;;  %v4749_v31 = vpop.f32.mrf.mxu1 }
 0x3a9   : > { %v978_v33 = vpop.f32.mrf.mxu1 }
 0x3ab   : > { %v4750_v34 = vpop.f32.mrf.mxu1 }
 0x3b8   : > { %1112 = vrot.lane.b32.xlu1 %v5661_v49, %s5349_s6 }
 0x3bc   : > { %1231 = vrot.lane.b32.xlu1 %v5661_v49, %s5350_s21 }
 0x3e0   : > { %1108 = vadd.xlane.f32.xlu1 %v1107_v38  ;;  %v1460_v38 = vld [vmem:[#allocation10 + $0x380] sm:$0xff] }
 0x430   : > { %v983_v41 = vpop.xlane.xlu1 %982 }
 0x431   : > { %v984_v42 = vsub.f32 %v975_v27, %v983_v41  ;;  %v4265_v41 = vcombine.low %v1460_v38, %v1462_v39 }
 0x433   : > { %v985_v45 = vmul.f32 1.442695, %v984_v42  ;;  %v4266_v42 = vcombine.high %v1460_v38, %v1462_v39  ;;  %v1437_v38 = vld [vmem:[#allocation10 + $0x88] sm:$0xff] }
 0x434   : > { %v1113_v47 = vpop.permute.xlu1 %1112 }
 0x435   : > { %5081 = vpow2.f32 %v985_v45  ;;  %v1118_v51 = vsel %vm881_vm2, %v1113_v47, 0  ;;  %v4226_v47 = vld [vmem:[%s5867_s4] ss:$0 sm:$0xff] }
 0x436   : > { %5083 = vpow2.f32 %v1224_v43  ;;  %v1463_v43 = vld [vmem:[#allocation10 + $0x3c8] sm:$0xff] }
 0x437   : > { %v4267_v45 = vcombine.low %v1461_v40, %v1463_v43 }
 0x438   : > { %v1232_v53 = vpop.permute.xlu1 %1231 }
 0x439   : > { %v1237_v56 = vsel %vm881_vm2, %v1232_v53, 0 }
 0x442   : > { %v5082_v46 = vpop.eup %5081 }
 0x443   : > { %v987_v48 = vsel %vm866_vm3, %v5082_v46, 0.0  ;;  %v991_v49 = vpack.c.bf16 %v5082_v46, %v5082_v46  ;;  %v5084_v50 = vpop.eup %5083  ;;  %v4268_v46 = vcombine.high %v1461_v40, %v1463_v43  ;;  %v1439_v40 = vld [vmem:[#allocation10 + $0xc8] sm:$0xff] }
 0x444   : > { %988 = vadd.xlane.f32.xlu0 %v987_v48  ;;  %v1226_v52 = vsel %vm866_vm3, %v5084_v50, 0.0  ;;  %v1230_v57 = vpack.c.bf16 %v5084_v50, %v5084_v50  ;;  %v4244_v43 = vcombine.high %v1437_v38, %v1439_v40 }
 0x445   : > { %4754 = vmatmul.mubr.msk.bf16.vlgmr.msra.gmra.mxu1 %vm866_vm3, %v991_v49  ;;  %1687 = vmatprep.subr.bf16.mxu0 %v4268_v46  ;;  %v1434_v46 = vld [vmem:[#allocation10 + $0x40] sm:$0xff] }
 0x446   : > { %4764 = vmatpush3.bf16.msra.mxu1 %v1118_v51  ;;  %4765 = vmatprep.mubr.msk.bf16.mxu1 %vm5347_vm0, %v5346_v1  ;;  %v5097_v51 = vld [vmem:[%s5598_s17] sm:$0xff] }
 0x447   : > { %4775 = vmatprep.subr.bf16.mxu1 %v5346_v1 }
 0x448   : > { %1227 = vadd.xlane.f32.xlu0 %v1226_v52 }
 0x44c   : > { %874 = vadd.xlane.f32.xlu0 %v873_v54 }
 0x44d   : > { %4766 = vmatmul.mubr.msk.bf16.vlgmr.msra.gmra.mxu1 %vm866_vm3, %v1111_v55 }
 0x44e   : > { %4776 = vmatpush3.bf16.msra.mxu1 %v1237_v56  ;;  %4777 = vmatprep.mubr.msk.bf16.mxu1 %vm5347_vm0, %v5346_v1  ;;  %v1456_v56 = vld [vmem:[#allocation10 + $0x300] sm:$0xff] }
 0x44f   : > { %1646 = vmatprep.subr.bf16.mxu1 %v4266_v42  ;;  %v4243_v42 = vcombine.low %v1437_v38, %v1439_v40  ;;  %v1812_v38 = vld [vmem:[#allocation10 + $0x190] sm:$0xff]  ;;  %v1813_v40 = vld [vmem:[#allocation10 + $0x198] sm:$0xff] }
 0x455   : > { %4778 = vmatmul.mubr.msk.bf16.vlgmr.msra.gmra.mxu1 %vm866_vm3, %v1230_v57  ;;  %v1458_v57 = vld [vmem:[#allocation10 + $0x340] sm:$0xff] }
 0x456   : > { %1678 = vmatprep.mubr.bf16.mxu1 %v5345_v0  ;;  %1647 = vmatpush1.bf16.msra.mxu1 %v4265_v41  ;;  %v4262_v59 = vcombine.high %v1456_v56, %v1458_v57 }
 0x458   : > { %1648 = vmatprep.subr.bf16.mxu1 %v4262_v59  ;;  %v1831_v59 = vld [vmem:[#allocation10 + $0x3d8] sm:$0xff] }
 0x469   : > { %v1109_v4 = vpop.xlane.xlu1 %1108 }
 0x4cd   : > { %v989_v60 = vpop.xlane.xlu0 %988 }
 0x4d1   : > { %v1228_v61 = vpop.xlane.xlu0 %1227 }
 0x4d5   : > { %v875_v62 = vpop.xlane.xlu0 %874 }
 0x4d6   : > { %5085 = vrcp.f32 %v875_v62 }
 0x4d7   : > { %5087 = vrcp.f32 %v989_v60  ;;  %v1459_v60 = vld [vmem:[#allocation10 + $0x348] sm:$0xff] }
 0x4d8   : > { %5089 = vrcp.f32 %v1109_v4  ;;  %v4263_v62 = vcombine.low %v1457_v58, %v1459_v60  ;;  %v1453_v4 = vld [vmem:[#allocation10 + $0x288] sm:$0xff] }
 0x4d9   : > { %5091 = vrcp.f32 %v1228_v61  ;;  %v4261_v61 = vcombine.low %v1456_v56, %v1458_v57  ;;  %v4260_v9 = vcombine.high %v1453_v4, %v1455_v6  ;;  %v1829_v56 = vld [vmem:[#allocation10 + $0x398] sm:$0xff] }
 0x4db   : > { %1649 = vmatpush1.bf16.msra.mxu1 %v4261_v61  ;;  %v4300_v61 = vcombine.high %v1829_v56, %v1831_v59 }
 0x4e3   : > { %v5086_v63 = vpop.eup %5085 }
 0x4e4   : > { %v925_v2 = vmul.f32 %v5086_v63, %v919_v23  ;;  %v5088_v7 = vpop.eup %5087  ;;  %v4264_v63 = vcombine.high %v1457_v58, %v1459_v60  ;;  %v4299_v60 = vcombine.low %v1829_v56, %v1831_v59  ;;  %v1804_v56 = vld [vmem:[#allocation10 + $0x90] sm:$0xff]  ;;  %v1807_v59 = vld [vmem:[#allocation10 + $0xd8] sm:$0xff] }
 0x4e5   : > { %v5090_v16 = vpop.eup %5089 }
 0x4e6   : > { %v926_v3 = vpack.c.bf16 %v925_v2, %v925_v2  ;;  %v5092_v25 = vpop.eup %5091  ;;  %v1452_v2 = vld [vmem:[#allocation10 + $0x280] sm:$0xff] }
 0x4e8   : > { %928 = vst.msk [vmem:[#allocation2] sm:$0xf] %vm927_vm4, %v926_v3  ;;  %v1454_v3 = vld [vmem:[#allocation10 + $0x2c0] sm:$0xff] }
 0x4e9   : > { %v4258_v5 = vcombine.high %v1452_v2, %v1454_v3 }
 0x4eb   : > { %1650 = vmatprep.subr.bf16.mxu1 %v4258_v5 }
 0x505   : > { %v1035_v8 = vpop.f32.mrf.mxu1 }
 0x506   : > { %v1041_v10 = vmul.f32 %v5088_v7, %v1035_v8  ;;  %v4257_v7 = vcombine.low %v1452_v2, %v1454_v3  ;;  %v4259_v8 = vcombine.low %v1453_v4, %v1455_v6 }
 0x507   : > { %v4755_v11 = vpop.f32.mrf.mxu1 }
 0x508   : > { %v4500_v13 = vpack.c.bf16 %v1041_v10, %v1041_v10  ;;  %1651 = vmatpush1.bf16.msra.mxu1 %v4257_v7  ;;  %v1448_v10 = vld [vmem:[#allocation10 + $0x200] sm:$0xff] }
 0x509   : > { %v1038_v14 = vpop.f32.mrf.mxu1  ;;  %v1450_v11 = vld [vmem:[#allocation10 + $0x240] sm:$0xff] }
 0x50a   : > { %1046 = vrot.lane.b32.xlu1 %v4500_v13, %s5350_s21  ;;  %v4254_v13 = vcombine.high %v1448_v10, %v1450_v11  ;;  %v1451_v14 = vld [vmem:[#allocation10 + $0x248] sm:$0xff] }
 0x50b   : > { %v4756_v15 = vpop.f32.mrf.mxu1 }
 0x50c   : > { %v4253_v15 = vcombine.low %v1448_v10, %v1450_v11  ;;  %1652 = vmatprep.subr.bf16.mxu1 %v4254_v13  ;;  %v4236_v11 = vld [vmem:[%s5873_s10] ss:$0 sm:$0xff]  ;;  %v1824_v13 = vld [vmem:[#allocation10 + $0x310] sm:$0xff] }
 0x50d   : > { %v1154_v17 = vpop.f32.mrf.mxu1 }
 0x50e   : > { %v1160_v19 = vmul.f32 %v5090_v16, %v1154_v17  ;;  %v4255_v16 = vcombine.low %v1449_v12, %v1451_v14  ;;  %v4256_v17 = vcombine.high %v1449_v12, %v1451_v14  ;;  %1653 = vmatpush1.bf16.msra.mxu1 %v4253_v15  ;;  %v1826_v14 = vld [vmem:[#allocation10 + $0x350] sm:$0xff]  ;;  %v1825_v15 = vld [vmem:[#allocation10 + $0x318] sm:$0xff] }
 0x50f   : > { %v4767_v20 = vpop.f32.mrf.mxu1 }
 0x510   : > { %v4501_v22 = vpack.c.bf16 %v1160_v19, %v1160_v19  ;;  %v1446_v19 = vld [vmem:[#allocation10 + $0x1c0] sm:$0xff]  ;;  %v1445_v20 = vld [vmem:[#allocation10 + $0x188] sm:$0xff] }
 0x511   : > { %v1157_v23 = vpop.f32.mrf.mxu1  ;;  %v4250_v21 = vcombine.high %v1444_v18, %v1446_v19 }
 0x512   : > { %1165 = vrot.lane.b32.xlu0 %v4501_v22, %s5349_s6  ;;  %v1447_v22 = vld [vmem:[#allocation10 + $0x1c8] sm:$0xff]  ;;  %v4249_v23 = vcombine.low %v1444_v18, %v1446_v19  ;;  %v4294_v18 = vcombine.high %v1824_v13, %v1826_v14 }
 0x513   : > { %v4768_v24 = vpop.f32.mrf.mxu1  ;;  %1654 = vmatprep.subr.bf16.mxu1 %v4250_v21  ;;  %v1822_v21 = vld [vmem:[#allocation10 + $0x2d0] sm:$0xff] }
 0x514   : > { %v4251_v24 = vcombine.low %v1445_v20, %v1447_v22  ;;  %1655 = vmatpush1.bf16.msra.mxu1 %v4249_v23  ;;  %v1823_v23 = vld [vmem:[#allocation10 + $0x2d8] sm:$0xff] }
 0x515   : > { %v1273_v26 = vpop.f32.mrf.mxu1 }
 0x516   : > { %v1279_v27 = vmul.f32 %v5092_v25, %v1273_v26  ;;  %v4252_v25 = vcombine.high %v1445_v20, %v1447_v22  ;;  %v1440_v26 = vld [vmem:[#allocation10 + $0x100] sm:$0xff]  ;;  %v1820_v20 = vld [vmem:[#allocation10 + $0x290] sm:$0xff]  ;;  %v1821_v22 = vld [vmem:[#allocation10 + $0x298] sm:$0xff] }
 0x517   : > { %v4779_v28 = vpop.f32.mrf.mxu1 }
 0x518   : > { %v4502_v31 = vpack.c.bf16 %v1279_v27, %v1279_v27  ;;  %v1442_v27 = vld [vmem:[#allocation10 + $0x140] sm:$0xff]  ;;  %v1441_v28 = vld [vmem:[#allocation10 + $0x108] sm:$0xff] }
 0x519   : > { %v1276_v33 = vpop.f32.mrf.mxu1 }
 0x51a   : > { %1284 = vrot.lane.b32.xlu1 %v4502_v31, %s5348_s5  ;;  %v4246_v31 = vcombine.high %v1440_v26, %v1442_v27  ;;  %v1443_v33 = vld [vmem:[#allocation10 + $0x148] sm:$0xff]  ;;  %s4042_s5 = scalar_lea.sflag [#allocation6], %s5592_s7 }
 0x51b   : > { %v4780_v34 = vpop.f32.mrf.mxu1 }
 0x51c   : > { %v4245_v34 = vcombine.low %v1440_v26, %v1442_v27  ;;  %1656 = vmatprep.subr.bf16.mxu1 %v4246_v31  ;;  %v4290_v26 = vcombine.high %v1820_v20, %v1822_v21  ;;  %v4292_v27 = vcombine.high %v1821_v22, %v1823_v23  ;;  %v1818_v31 = vld [vmem:[#allocation10 + $0x250] sm:$0xff] }
 0x51e   : > { %1657 = vmatpush1.bf16.msra.mxu1 %v4245_v34  ;;  %v1819_v34 = vld [vmem:[#allocation10 + $0x258] sm:$0xff] }
 0x57c   : > { %v1047_v35 = vpop.permute.xlu1 %1046 }
 0x57d   : > { %1050 = vst.msk [vmem:[#allocation2] sm:$0xf] %vm1049_vm5, %v1047_v35  ;;  %v4247_v35 = vcombine.low %v1441_v28, %v1443_v33 }
 0x584   : > { %v1166_v36 = vpop.permute.xlu0 %1165 }
 0x585   : > { %1169 = vst.msk [vmem:[#allocation2] sm:$0xf] %vm1168_vm6, %v1166_v36  ;;  %v4248_v36 = vcombine.high %v1441_v28, %v1443_v33  ;;  %v1816_v28 = vld [vmem:[#allocation10 + $0x210] sm:$0xff]  ;;  %v1817_v33 = vld [vmem:[#allocation10 + $0x218] sm:$0xff] }
 0x58c   : > { %v1285_v1 = vpop.permute.xlu1 %1284 }
 0x58d   : > { %1288 = vst.msk [vmem:[#allocation2] sm:$0xf] %vm1287_vm7, %v1285_v1  ;;  %v1436_v1 = vld [vmem:[#allocation10 + $0x80] sm:$0xff] }
 0x594   : > { %v1289_v37 = vld [vmem:[#allocation2] sm:$0xf] }
 0x595   : > { %4798 = vmatmul.mubr.bf16.vlgmr.msra.gmra.mxu0 %v1289_v37  ;;  %v1438_v37 = vld [vmem:[#allocation10 + $0xc0] sm:$0xff] }
 0x596   : > { %1719 = vmatprep.mubr.bf16.mxu0 %v5345_v0  ;;  %1688 = vmatpush1.bf16.msra.mxu0 %v4267_v45  ;;  %v4242_v39 = vcombine.high %v1436_v1, %v1438_v37  ;;  %v4241_v41 = vcombine.low %v1436_v1, %v1438_v37  ;;  %v1432_v45 = vld [vmem:[#allocation10] sm:$0xff]  ;;  %v4286_v1 = vcombine.high %v1816_v28, %v1818_v31 }
 0x597   : > { %1689 = vmatprep.subr.bf16.mxu0 %v4264_v63  ;;  %v4288_v37 = vcombine.high %v1817_v33, %v1819_v34 }
 0x598   : > { %1658 = vmatprep.subr.bf16.mxu1 %v4242_v39  ;;  %v1814_v39 = vld [vmem:[#allocation10 + $0x1d0] sm:$0xff] }
 0x599   : > { %1659 = vmatpush1.bf16.msra.mxu1 %v4241_v41  ;;  %v1815_v41 = vld [vmem:[#allocation10 + $0x1d8] sm:$0xff] }
 0x59a   : > { %1690 = vmatpush1.bf16.msra.mxu0 %v4263_v62 }
 0x59b   : > { %1691 = vmatprep.subr.bf16.mxu0 %v4260_v9  ;;  %v4235_v9 = vld [vmem:[%s5872_s9] ss:$0 sm:$0xff] }
 0x59e   : > { %1692 = vmatpush1.bf16.msra.mxu0 %v4259_v8 }
 0x59f   : > { %1693 = vmatprep.subr.bf16.mxu0 %v4256_v17 }
 0x5a2   : > { %1694 = vmatpush1.bf16.msra.mxu0 %v4255_v16  ;;  %v1827_v16 = vld [vmem:[#allocation10 + $0x358] sm:$0xff] }
 0x5a3   : > { %1695 = vmatprep.subr.bf16.mxu0 %v4252_v25  ;;  %v4296_v19 = vcombine.high %v1825_v15, %v1827_v16  ;;  %v4295_v25 = vcombine.low %v1825_v15, %v1827_v16  ;;  %v4952_v15 = vld [vmem:[#allocation13 + $0x1b8] sm:$0xff]   ;;  %v4953_v16 = vld [vmem:[#allocation13 + $0x170] sm:$0xff]  }
 0x5a6   : > { %1696 = vmatpush1.bf16.msra.mxu0 %v4251_v24  ;;  %v4293_v24 = vcombine.low %v1824_v13, %v1826_v14  ;;  %v4950_v13 = vld [vmem:[#allocation13 + $0x1f8] sm:$0xff]  }
 0x5a7   : > { %1697 = vmatprep.subr.bf16.mxu0 %v4248_v36  ;;  %v4291_v36 = vcombine.low %v1821_v22, %v1823_v23  ;;  %v4951_v14 = vld [vmem:[#allocation13 + $0x138] sm:$0xff]   ;;  %v4958_v22 = vld [vmem:[#allocation13 + $0x1e8] sm:$0xff]  }
 0x5a8   : > { %v4959_v23 = vld [vmem:[#allocation13 + $0x128] sm:$0xff]  }
 0x5aa   : > { %1698 = vmatpush1.bf16.msra.mxu0 %v4247_v35  ;;  %v4289_v35 = vcombine.low %v1820_v20, %v1822_v21  ;;  %v4956_v20 = vld [vmem:[#allocation13 + $0x1b0] sm:$0xff]   ;;  %v4957_v21 = vld [vmem:[#allocation13 + $0x168] sm:$0xff]  }
 0x5ab   : > { %1699 = vmatprep.subr.bf16.mxu0 %v4244_v43  ;;  %v4287_v43 = vcombine.low %v1817_v33, %v1819_v34  ;;  %v4966_v33 = vld [vmem:[#allocation13 + $0x1d8] sm:$0xff]  }
 0x5ac   : > { %v4967_v34 = vld [vmem:[#allocation13 + $0x118] sm:$0xff]  }
 0x5ae   : > { %1700 = vmatpush1.bf16.msra.mxu0 %v4243_v42  ;;  %v4285_v42 = vcombine.low %v1816_v28, %v1818_v31  ;;  %v4964_v28 = vld [vmem:[#allocation13 + $0x1a0] sm:$0xff]   ;;  %v4965_v31 = vld [vmem:[#allocation13 + $0x158] sm:$0xff]  }
 0x655   : > { %v1395_v48 = vpop.f32.mrf.mxu0 }
 0x656   : > { %v1396_v49 = vadd.f32 %v4226_v47, %v1395_v48  ;;  %v1433_v47 = vld [vmem:[#allocation10 + $0x8] sm:$0xff]  ;;  %v4238_v48 = vcombine.high %v1432_v45, %v1434_v46 }
 0x657   : > { %v4799_v50 = vpop.f32.mrf.mxu0 }
 0x658   : > { %v5727_v52 = vadd.f32 %v5097_v51, %v1396_v49  ;;  %v1435_v49 = vld [vmem:[#allocation10 + $0x48] sm:$0xff]  ;;  %v4237_v50 = vcombine.low %v1432_v45, %v1434_v46  ;;  %1660 = vmatprep.subr.bf16.mxu1 %v4238_v48  ;;  %v4282_v45 = vcombine.high %v1812_v38, %v1814_v39  ;;  %v4284_v46 = vcombine.high %v1813_v40, %v1815_v41  ;;  %v1810_v48 = vld [vmem:[#allocation10 + $0x150] sm:$0xff] }
 0x659   : > { %v1398_v53 = vpop.f32.mrf.mxu0  ;;  %v4239_v51 = vcombine.low %v1433_v47, %v1435_v49 }
 0x65a   : > { %1404 = vadd.xlane.f32.xlu1 %v5727_v52  ;;  %v1407_v54 = vmul.f32 %v5727_v52, %v5727_v52  ;;  %v4240_v53 = vcombine.high %v1433_v47, %v1435_v49  ;;  %1661 = vmatpush1.bf16.msra.mxu1 %v4237_v50  ;;  %v1808_v47 = vld [vmem:[#allocation10 + $0x110] sm:$0xff]  ;;  %v1809_v49 = vld [vmem:[#allocation10 + $0x118] sm:$0xff] }
 0x65b   : > { %v4800_v55 = vpop.f32.mrf.mxu0  ;;  %v1811_v50 = vld [vmem:[#allocation10 + $0x158] sm:$0xff] }
 0x65c   : > { %1408 = vadd.xlane.f32.xlu0 %v1407_v54  ;;  %1701 = vmatprep.subr.bf16.mxu0 %v4240_v53  ;;  %v1828_v54 = vld [vmem:[#allocation10 + $0x390] sm:$0xff]  ;;  %v4283_v53 = vcombine.low %v1813_v40, %v1815_v41  ;;  %v4974_v40 = vld [vmem:[#allocation13 + $0x1c8] sm:$0xff]  }
 0x65d   : > { %v1830_v55 = vld [vmem:[#allocation10 + $0x3d0] sm:$0xff]  ;;  %1702 = vmatpush1.bf16.msra.mxu0 %v4239_v51  ;;  %v4281_v51 = vcombine.low %v1812_v38, %v1814_v39  ;;  %v4972_v38 = vld [vmem:[#allocation13 + $0x190] sm:$0xff]   ;;  %v4973_v39 = vld [vmem:[#allocation13 + $0x148] sm:$0xff]  }
 0x65e   : > { %v4297_v57 = vcombine.low %v1828_v54, %v1830_v55  ;;  %v4298_v58 = vcombine.high %v1828_v54, %v1830_v55  ;;  %2055 = vmatprep.subr.bf16.mxu0 %v4300_v61  ;;  %v4278_v54 = vcombine.high %v1808_v47, %v1810_v48  ;;  %v4280_v55 = vcombine.high %v1809_v49, %v1811_v50  ;;  %v4975_v41 = vld [vmem:[#allocation13 + $0x108] sm:$0xff]  }
 0x65f   : > { %v4279_v61 = vcombine.low %v1809_v49, %v1811_v50  ;;  %v4982_v49 = vld [vmem:[#allocation13 + $0xf8] sm:$0xff]  }
 0x660   : > { %2014 = vmatprep.subr.bf16.mxu1 %v4298_v58  ;;  %v1805_v58 = vld [vmem:[#allocation10 + $0x98] sm:$0xff] }
 0x6e3   : > { %v1405_v62 = vpop.xlane.xlu1 %1404 }
 0x6e4   : > { %v1406_v63 = vmul.f32 0.03125, %v1405_v62 }
 0x6e5   : > { %v1409_v2 = vpop.xlane.xlu0 %1408 }
 0x6e6   : > { %v1411_v3 = vmul.f32 %v1406_v63, %v1406_v63  ;;  %v1410_v4 = vmul.f32 0.03125, %v1409_v2  ;;  %v1413_v7 = vsub.f32 %v5727_v52, %v1406_v63  ;;  %v4276_v63 = vcombine.high %v1805_v58, %v1807_v59  ;;  %v1800_v2 = vld [vmem:[#allocation10 + $0x10] sm:$0xff] }
 0x6e8   : > { %v1412_v5 = vsub.f32 %v1410_v4, %v1411_v3  ;;  %v1802_v3 = vld [vmem:[#allocation10 + $0x50] sm:$0xff]  ;;  %v1801_v4 = vld [vmem:[#allocation10 + $0x18] sm:$0xff] }
 0x6ea   : > { %v1414_v6 = vadd.f32 1e-05, %v1412_v5  ;;  %v1803_v5 = vld [vmem:[#allocation10 + $0x58] sm:$0xff] }
 0x6ec   : > { %5093 = vrsqrt.f32 %v1414_v6 }
 0x6f9   : > { %v5094_v8 = vpop.eup %5093 }
 0x6fa   : > { %v1416_v10 = vmul.f32 %v5094_v8, %v1413_v7  ;;  %v4275_v7 = vcombine.low %v1805_v58, %v1807_v59  ;;  %v4270_v8 = vcombine.high %v1800_v2, %v1802_v3  ;;  %v5756_v59 = vsub.s32 3, %v5634_v29 }
 0x6fc   : > { %v1423_v12 = vmul.f32 %v4235_v9, %v1416_v10  ;;  %v4272_v9 = vcombine.high %v1801_v4, %v1803_v5  ;;  %v4269_v10 = vcombine.low %v1800_v2, %v1802_v3 }
 0x6fe   : > { %v5739_v17 = vadd.f32 %v4236_v11, %v1423_v12  ;;  %v4271_v11 = vcombine.low %v1801_v4, %v1803_v5  ;;  %v4949_v12 = vld [vmem:[#allocation13 + $0x178] sm:$0xff]  }
 0x700   : > { %v5743_v52 = vpack.c.bf16 %v5739_v17, %v5739_v17 }
 0x702   : > { %1679 = vmatmul.mubr.bf16.vlgmr.msra.gmra.mxu1 %v5743_v52  ;;  %1720 = vmatmul.mubr.bf16.vlgmr.msra.gmra.mxu0 %v5743_v52 }
 0x703   : > { %2015 = vmatpush1.bf16.msra.mxu1 %v4297_v57  ;;  %2056 = vmatpush1.bf16.msra.mxu0 %v4299_v60  ;;  %v1806_v57 = vld [vmem:[#allocation10 + $0xd0] sm:$0xff]  ;;  %v4277_v60 = vcombine.low %v1808_v47, %v1810_v48  ;;  %v4981_v48 = vld [vmem:[#allocation13 + $0x78] sm:$0xff]  }
 0x704   : > { %2016 = vmatprep.subr.bf16.mxu1 %v4294_v18  ;;  %2057 = vmatprep.subr.bf16.mxu0 %v4296_v19  ;;  %v4274_v62 = vcombine.high %v1804_v56, %v1806_v57  ;;  %v4273_v6 = vcombine.low %v1804_v56, %v1806_v57  ;;  %v4954_v18 = vld [vmem:[#allocation13 + $0x1f0] sm:$0xff]   ;;  %v4980_v47 = vld [vmem:[#allocation13 + $0x180] sm:$0xff]  }
 0x705   : > { %2046 = vmatprep.mubr.bf16.mxu1 %v5345_v0  ;;  %2087 = vmatprep.mubr.bf16.mxu0 %v5345_v0  ;;  %v4955_v19 = vld [vmem:[#allocation13 + $0x130] sm:$0xff]  }
 0x707   : > { %2017 = vmatpush1.bf16.msra.mxu1 %v4293_v24  ;;  %2058 = vmatpush1.bf16.msra.mxu0 %v4295_v25  ;;  %v4960_v24 = vld [vmem:[#allocation13 + $0x1a8] sm:$0xff]   ;;  %v4961_v25 = vld [vmem:[#allocation13 + $0x160] sm:$0xff]  }
 0x708   : > { %2018 = vmatprep.subr.bf16.mxu1 %v4290_v26  ;;  %2059 = vmatprep.subr.bf16.mxu0 %v4292_v27  ;;  %v4962_v26 = vld [vmem:[#allocation13 + $0x1e0] sm:$0xff]  }
 0x709   : > { %v4963_v27 = vld [vmem:[#allocation13 + $0x120] sm:$0xff]  }
 0x70b   : > { %2019 = vmatpush1.bf16.msra.mxu1 %v4289_v35  ;;  %2060 = vmatpush1.bf16.msra.mxu0 %v4291_v36  ;;  %v4968_v35 = vld [vmem:[#allocation13 + $0x198] sm:$0xff]   ;;  %v4969_v36 = vld [vmem:[#allocation13 + $0x150] sm:$0xff]  }
 0x70c   : > { %2020 = vmatprep.subr.bf16.mxu1 %v4286_v1  ;;  %2061 = vmatprep.subr.bf16.mxu0 %v4288_v37  ;;  %v4970_v1 = vld [vmem:[#allocation13 + $0x1d0] sm:$0xff]  }
 0x70d   : > { %v4971_v37 = vld [vmem:[#allocation13 + $0x110] sm:$0xff]  }
 0x70f   : > { %2021 = vmatpush1.bf16.msra.mxu1 %v4285_v42  ;;  %2062 = vmatpush1.bf16.msra.mxu0 %v4287_v43  ;;  %v4976_v42 = vld [vmem:[#allocation13 + $0x188] sm:$0xff]   ;;  %v4977_v43 = vld [vmem:[#allocation13 + $0x140] sm:$0xff]  }
 0x710   : > { %2022 = vmatprep.subr.bf16.mxu1 %v4282_v45  ;;  %2063 = vmatprep.subr.bf16.mxu0 %v4284_v46  ;;  %v4978_v45 = vld [vmem:[#allocation13 + $0x1c0] sm:$0xff]  }
 0x711   : > { %v4979_v46 = vld [vmem:[#allocation13 + $0x100] sm:$0xff]  }
 0x713   : > { %2023 = vmatpush1.bf16.msra.mxu1 %v4281_v51  ;;  %2064 = vmatpush1.bf16.msra.mxu0 %v4283_v53 }
 0x714   : > { %2024 = vmatprep.subr.bf16.mxu1 %v4278_v54  ;;  %2065 = vmatprep.subr.bf16.mxu0 %v4280_v55 }
 0x717   : > { %2025 = vmatpush1.bf16.msra.mxu1 %v4277_v60  ;;  %2066 = vmatpush1.bf16.msra.mxu0 %v4279_v61  ;;  %v1832_v60 = vld [vmem:[#allocation12 + $0x4] sm:$0xf]  ;;  %v5758_v61 = vld [vmem:[#allocation12] sm:$0xf] }
 0x718   : > { %2026 = vmatprep.subr.bf16.mxu1 %v4274_v62  ;;  %2067 = vmatprep.subr.bf16.mxu0 %v4276_v63  ;;  %v1837_v62 = vrot.slane %v1832_v60, %v5637_v30  ;;  %v1845_v63 = vrot.slane %v1832_v60, %v5658_v44  ;;  %v1473_v2 = vrot.slane %v5758_v61, %v5643_v32 }
 0x719   : > { %v1481_v3 = vrot.slane %v5758_v61, %v5756_v59  ;;  %v1841_v4 = vrot.slane %v1832_v60, %v5643_v32  ;;  %v1849_v5 = vrot.slane %v1832_v60, %v5756_v59  ;;  %v5004_v60 = vld [vmem:[#allocation13 + $0x90] sm:$0xff]  }
 0x71b   : > { %2027 = vmatpush1.bf16.msra.mxu1 %v4273_v6  ;;  %2068 = vmatpush1.bf16.msra.mxu0 %v4275_v7 }
 0x71c   : > { %2028 = vmatprep.subr.bf16.mxu1 %v4270_v8  ;;  %2069 = vmatprep.subr.bf16.mxu0 %v4272_v9 }
 0x71f   : > { %2029 = vmatpush1.bf16.msra.mxu1 %v4269_v10  ;;  %2070 = vmatpush1.bf16.msra.mxu0 %v4271_v11 }
 0x720   : > { %4537 = vmatprep.subr.bf16.mxu1 %v4949_v12  ;;  %4559 = vmatprep.subr.bf16.mxu0 %v4950_v13 }
 0x722   : > { %2047 = vmatmul.mubr.bf16.vlgmr.msra.gmra.mxu1 %v5743_v52  ;;  %2088 = vmatmul.mubr.bf16.vlgmr.msra.gmra.mxu0 %v5743_v52 }
 0x723   : > { %4538 = vmatpush3.bf16.msra.mxu1 %v4951_v14  ;;  %4560 = vmatpush3.bf16.msra.mxu0 %v4952_v15 }
 0x724   : > { %4539 = vmatprep.subr.bf16.mxu1 %v4953_v16  ;;  %4561 = vmatprep.subr.bf16.mxu0 %v4954_v18 }
 0x727   : > { %4540 = vmatpush3.bf16.msra.mxu1 %v4955_v19  ;;  %4562 = vmatpush3.bf16.msra.mxu0 %v4956_v20 }
 0x728   : > { %4541 = vmatprep.subr.bf16.mxu1 %v4957_v21  ;;  %4563 = vmatprep.subr.bf16.mxu0 %v4958_v22 }
 0x72b   : > { %4542 = vmatpush3.bf16.msra.mxu1 %v4959_v23  ;;  %4564 = vmatpush3.bf16.msra.mxu0 %v4960_v24 }
 0x72c   : > { %4543 = vmatprep.subr.bf16.mxu1 %v4961_v25  ;;  %4565 = vmatprep.subr.bf16.mxu0 %v4962_v26 }
 0x72f   : > { %4544 = vmatpush3.bf16.msra.mxu1 %v4963_v27  ;;  %4566 = vmatpush3.bf16.msra.mxu0 %v4964_v28  ;;  %v4983_v28 = vld [vmem:[#allocation13 + $0x38] sm:$0xff]  }
 0x730   : > { %4545 = vmatprep.subr.bf16.mxu1 %v4965_v31  ;;  %4567 = vmatprep.subr.bf16.mxu0 %v4966_v33  ;;  %v4984_v31 = vld [vmem:[#allocation13 + $0xb8] sm:$0xff]  }
 0x733   : > { %4546 = vmatpush3.bf16.msra.mxu1 %v4967_v34  ;;  %4568 = vmatpush3.bf16.msra.mxu0 %v4968_v35  ;;  %v4985_v35 = vld [vmem:[#allocation13 + $0x70] sm:$0xff]  }
 0x734   : > { %4547 = vmatprep.subr.bf16.mxu1 %v4969_v36  ;;  %4569 = vmatprep.subr.bf16.mxu0 %v4970_v1  ;;  %v4986_v36 = vld [vmem:[#allocation13 + $0xf0] sm:$0xff]  }
 0x737   : > { %4548 = vmatpush3.bf16.msra.mxu1 %v4971_v37  ;;  %4570 = vmatpush3.bf16.msra.mxu0 %v4972_v38  ;;  %v4987_v38 = vld [vmem:[#allocation13 + $0x30] sm:$0xff]  }
 0x738   : > { %4549 = vmatprep.subr.bf16.mxu1 %v4973_v39  ;;  %4571 = vmatprep.subr.bf16.mxu0 %v4974_v40  ;;  %v4988_v39 = vld [vmem:[#allocation13 + $0xb0] sm:$0xff]   ;;  %v4989_v40 = vld [vmem:[#allocation13 + $0x68] sm:$0xff]  }
 0x73b   : > { %4550 = vmatpush3.bf16.msra.mxu1 %v4975_v41  ;;  %4572 = vmatpush3.bf16.msra.mxu0 %v4976_v42  ;;  %v4990_v41 = vld [vmem:[#allocation13 + $0xe8] sm:$0xff]  }
 0x73c   : > { %4551 = vmatprep.subr.bf16.mxu1 %v4977_v43  ;;  %4573 = vmatprep.subr.bf16.mxu0 %v4978_v45  ;;  %v4991_v42 = vld [vmem:[#allocation13 + $0x28] sm:$0xff]   ;;  %v4993_v45 = vld [vmem:[#allocation13 + $0x60] sm:$0xff]  }
 0x73d   : > { %v4992_v43 = vld [vmem:[#allocation13 + $0xa8] sm:$0xff]  }
 0x73f   : > { %4552 = vmatpush3.bf16.msra.mxu1 %v4979_v46  ;;  %4574 = vmatpush3.bf16.msra.mxu0 %v4980_v47  ;;  %v4994_v46 = vld [vmem:[#allocation13 + $0xe0] sm:$0xff]  }
 0x740   : > { %4581 = vmatprep.subr.bf16.mxu1 %v4981_v48  ;;  %4603 = vmatprep.subr.bf16.mxu0 %v4982_v49  ;;  %v4995_v47 = vld [vmem:[#allocation13 + $0x20] sm:$0xff]   ;;  %v4997_v49 = vld [vmem:[#allocation13 + $0x58] sm:$0xff]  }
 0x741   : > { %v4996_v48 = vld [vmem:[#allocation13 + $0xa0] sm:$0xff]  }
 0x7c2   : > { %v5751_v50 = vpop.f32.mrf.mxu1  ;;  %v5753_v51 = vpop.f32.mrf.mxu0 }
 0x7c4   : > { %v1682_v53 = vpop.f32.mrf.mxu1  ;;  %v1723_v54 = vpop.f32.mrf.mxu0 }
 0x7c5   : > { %v1683_v9 = vadd.f32 %v1682_v53, %v1473_v2  ;;  %v1724_v10 = vadd.f32 %v1723_v54, %v1481_v3  ;;  %v4998_v53 = vld [vmem:[#allocation13 + $0xd8] sm:$0xff]   ;;  %v5005_v2 = vld [vmem:[#allocation13 + $0x48] sm:$0xff]  }
 0x7c6   : > { %v1684_v55 = vpop.f32.mrf.mxu1  ;;  %v1725_v56 = vpop.f32.mrf.mxu0  ;;  %v4999_v54 = vld [vmem:[#allocation13 + $0x18] sm:$0xff]   ;;  %v5006_v3 = vld [vmem:[#allocation13 + $0xc8] sm:$0xff]  }
 0x7c7   : > { %v1729_v22 = vmax.f32 %v1683_v9, 0.0  ;;  %v1731_v23 = vmax.f32 %v1724_v10, 0.0  ;;  %v5000_v55 = vld [vmem:[#allocation13 + $0x98] sm:$0xff]   ;;  %v5001_v56 = vld [vmem:[#allocation13 + $0x50] sm:$0xff]  }
 0x7c8   : > { %v1685_v57 = vpop.f32.mrf.mxu1  ;;  %v1726_v58 = vpop.f32.mrf.mxu0  ;;  %v2740_v9 = vld [vmem:[#allocation10 + $0x3a0] sm:$0xff] }
 0x7c9   : > { %v1733_v1 = vpack.c.bf16 %v1729_v22, %v1729_v22  ;;  %v1735_v37 = vpack.c.bf16 %v1731_v23, %v1731_v23  ;;  %v5002_v57 = vld [vmem:[#allocation13 + $0xd0] sm:$0xff]  }
 0x7ca   : > { %v5003_v58 = vld [vmem:[#allocation13 + $0x10] sm:$0xff]  }
 0x7cb   : > { %v2742_v10 = vld [vmem:[#allocation10 + $0x3e0] sm:$0xff] }
 0x7e2   : > { %v2048_v6 = vpop.f32.mrf.mxu1  ;;  %v2089_v29 = vpop.f32.mrf.mxu0 }
 0x7e3   : > { %v2049_v7 = vadd.f32 %v2048_v6, %v1837_v62  ;;  %v2090_v8 = vadd.f32 %v2089_v29, %v1845_v63  ;;  %v1469_v62 = vrot.slane %v5758_v61, %v5637_v30  ;;  %v1477_v63 = vrot.slane %v5758_v61, %v5658_v44  ;;  %v2743_v61 = vld [vmem:[#allocation10 + $0x3e8] sm:$0xff] }
 0x7e4   : > { %v2050_v11 = vpop.f32.mrf.mxu1  ;;  %v2091_v12 = vpop.f32.mrf.mxu0 }
 0x7e5   : > { %v2051_v13 = vadd.f32 %v2050_v11, %v1841_v4  ;;  %v2092_v14 = vadd.f32 %v2091_v12, %v1849_v5  ;;  %v2096_v15 = vmax.f32 %v2049_v7, 0.0  ;;  %v2098_v16 = vmax.f32 %v2090_v8, 0.0  ;;  %v5007_v4 = vld [vmem:[#allocation13 + $0x8] sm:$0xff]   ;;  %v5009_v7 = vld [vmem:[#allocation13 + $0x40] sm:$0xff]   ;;  %v2741_v11 = vld [vmem:[#allocation10 + $0x3a8] sm:$0xff] }
 0x7e6   : > { %v2052_v18 = vpop.f32.mrf.mxu1  ;;  %v2093_v19 = vpop.f32.mrf.mxu0  ;;  %v5008_v5 = vld [vmem:[#allocation13 + $0x88] sm:$0xff]   ;;  %v1681_v6 = vadd.f32 %v5751_v50, %v1469_v62  ;;  %v1722_v29 = vadd.f32 %v5753_v51, %v1477_v63  ;;  %v5010_v8 = vld [vmem:[#allocation13 + $0xc0] sm:$0xff]   ;;  %v4396_v50 = vcombine.high %v2741_v11, %v2743_v61  ;;  %v2738_v51 = vld [vmem:[#allocation10 + $0x360] sm:$0xff]  ;;  %v4395_v22 = vcombine.low %v2741_v11, %v2743_v61 }
 0x7e7   : > { %v2097_v20 = vmax.f32 %v2051_v13, 0.0  ;;  %v2099_v21 = vmax.f32 %v2092_v14, 0.0  ;;  %v2100_v33 = vpack.c.bf16 %v2096_v15, %v2096_v15  ;;  %v2102_v34 = vpack.c.bf16 %v2098_v16, %v2098_v16  ;;  %v5011_v12 = vld [vmem:[#allocation13] sm:$0xff]   ;;  %v2736_v18 = vld [vmem:[#allocation10 + $0x320] sm:$0xff]  ;;  %v2737_v19 = vld [vmem:[#allocation10 + $0x328] sm:$0xff] }
 0x7e8   : > { %v2053_v24 = vpop.f32.mrf.mxu1  ;;  %v2094_v25 = vpop.f32.mrf.mxu0  ;;  %v5012_v13 = vld [vmem:[#allocation13 + $0x80] sm:$0xff]   ;;  %v1728_v14 = vmax.f32 %v1681_v6, 0.0  ;;  %v1730_v15 = vmax.f32 %v1722_v29, 0.0  ;;  %v4394_v16 = vcombine.high %v2740_v9, %v2742_v10  ;;  %v4390_v23 = vcombine.high %v2736_v18, %v2738_v51  ;;  %v2723_v62 = vld [vmem:[#allocation10 + $0x168] sm:$0xff]  ;;  %v2718_v6 = vld [vmem:[#allocation10 + $0xe0] sm:$0xff] }
 0x7e9   : > { %v2101_v26 = vpack.c.bf16 %v2097_v20, %v2097_v20  ;;  %v2103_v27 = vpack.c.bf16 %v2099_v21, %v2099_v21  ;;  %v2739_v20 = vld [vmem:[#allocation10 + $0x368] sm:$0xff]  ;;  %v4393_v21 = vcombine.low %v2740_v9, %v2742_v10  ;;  %v2712_v61 = vld [vmem:[#allocation10 + $0x20] sm:$0xff] }
 0x7ea   : > { %v1732_v24 = vpack.c.bf16 %v1728_v14, %v1728_v14  ;;  %v1734_v25 = vpack.c.bf16 %v1730_v15, %v1730_v15  ;;  %v2717_v29 = vld [vmem:[#allocation10 + $0xa8] sm:$0xff] }
 0x7eb   : > { %2392 = vmatprep.mubr.bf16.mxu1 %v2101_v26  ;;  %2432 = vmatprep.mubr.bf16.mxu0 %v2103_v27  ;;  %v4392_v26 = vcombine.high %v2737_v19, %v2739_v20  ;;  %v2732_v27 = vld [vmem:[#allocation10 + $0x2a0] sm:$0xff]  ;;  %v2715_v14 = vld [vmem:[#allocation10 + $0x68] sm:$0xff] }
 0x7ec   : > { %2393 = vmatmul.mubr.bf16.vlgmr.msra.gmra.mxu1 %v2100_v33  ;;  %2433 = vmatmul.mubr.bf16.vlgmr.msra.gmra.mxu0 %v2102_v34  ;;  %v2735_v33 = vld [vmem:[#allocation10 + $0x2e8] sm:$0xff]  ;;  %v4389_v34 = vcombine.low %v2736_v18, %v2738_v51 }
 0x7ed   : > { %4582 = vmatpush3.bf16.msra.mxu1 %v4983_v28  ;;  %4604 = vmatpush3.bf16.msra.mxu0 %v4984_v31  ;;  %v2734_v28 = vld [vmem:[#allocation10 + $0x2e0] sm:$0xff]  ;;  %v2733_v31 = vld [vmem:[#allocation10 + $0x2a8] sm:$0xff] }
 0x7ee   : > { %2664 = vmatprep.mubr.bf16.mxu1 %v1733_v1  ;;  %2704 = vmatprep.mubr.bf16.mxu0 %v1735_v37  ;;  %v4388_v1 = vcombine.high %v2733_v31, %v2735_v33  ;;  %v2728_v37 = vld [vmem:[#allocation10 + $0x220] sm:$0xff] }
 0x7ef   : > { %4583 = vmatprep.subr.bf16.mxu1 %v4985_v35  ;;  %4605 = vmatprep.subr.bf16.mxu0 %v4986_v36  ;;  %v4391_v35 = vcombine.low %v2737_v19, %v2739_v20  ;;  %v4386_v36 = vcombine.high %v2732_v27, %v2734_v28  ;;  %v5013_v20 = vld [vmem:[#allocation13 + $0x278] sm:$0xff]  }
 0x7f1   : > { %4584 = vmatpush3.bf16.msra.mxu1 %v4987_v38  ;;  %4606 = vmatpush3.bf16.msra.mxu0 %v4988_v39  ;;  %v2730_v38 = vld [vmem:[#allocation10 + $0x260] sm:$0xff]  ;;  %v2729_v39 = vld [vmem:[#allocation10 + $0x228] sm:$0xff] }
 0x7f2   : > { %4585 = vmatprep.subr.bf16.mxu1 %v4989_v40  ;;  %4607 = vmatprep.subr.bf16.mxu0 %v4990_v41  ;;  %v2731_v40 = vld [vmem:[#allocation10 + $0x268] sm:$0xff]  ;;  %v4385_v41 = vcombine.low %v2732_v27, %v2734_v28  ;;  %v5020_v27 = vld [vmem:[#allocation13 + $0x2b0] sm:$0xff]   ;;  %v5021_v28 = vld [vmem:[#allocation13 + $0x268] sm:$0xff]  }
 0x7f5   : > { %4586 = vmatpush3.bf16.msra.mxu1 %v4991_v42  ;;  %4608 = vmatpush3.bf16.msra.mxu0 %v4992_v43  ;;  %v4387_v42 = vcombine.low %v2733_v31, %v2735_v33  ;;  %v4382_v43 = vcombine.high %v2728_v37, %v2730_v38  ;;  %v5022_v31 = vld [vmem:[#allocation13 + $0x2e8] sm:$0xff]  }
 0x7f6   : > { %4587 = vmatprep.subr.bf16.mxu1 %v4993_v45  ;;  %4609 = vmatprep.subr.bf16.mxu0 %v4994_v46  ;;  %v4384_v45 = vcombine.high %v2729_v39, %v2731_v40  ;;  %v2724_v46 = vld [vmem:[#allocation10 + $0x1a0] sm:$0xff]  ;;  %v5023_v33 = vld [vmem:[#allocation13 + $0x228] sm:$0xff]  }
 0x7f9   : > { %4588 = vmatpush3.bf16.msra.mxu1 %v4995_v47  ;;  %4610 = vmatpush3.bf16.msra.mxu0 %v4996_v48  ;;  %v2726_v47 = vld [vmem:[#allocation10 + $0x1e0] sm:$0xff]  ;;  %v2725_v48 = vld [vmem:[#allocation10 + $0x1a8] sm:$0xff] }
 0x7fa   : > { %4589 = vmatprep.subr.bf16.mxu1 %v4997_v49  ;;  %4611 = vmatprep.subr.bf16.mxu0 %v4998_v53  ;;  %v2727_v49 = vld [vmem:[#allocation10 + $0x1e8] sm:$0xff]  ;;  %v4381_v53 = vcombine.low %v2728_v37, %v2730_v38  ;;  %v4377_v63 = vcombine.low %v2724_v46, %v2726_v47  ;;  %v5028_v37 = vld [vmem:[#allocation13 + $0x2a0] sm:$0xff]  }
 0x7fb   : > { %v5029_v38 = vld [vmem:[#allocation13 + $0x258] sm:$0xff]  }
 0x7fd   : > { %4590 = vmatpush3.bf16.msra.mxu1 %v4999_v54  ;;  %4612 = vmatpush3.bf16.msra.mxu0 %v5000_v55  ;;  %v4383_v54 = vcombine.low %v2729_v39, %v2731_v40  ;;  %v4378_v55 = vcombine.high %v2724_v46, %v2726_v47  ;;  %v5030_v39 = vld [vmem:[#allocation13 + $0x2d8] sm:$0xff]   ;;  %v5036_v46 = vld [vmem:[#allocation13 + $0x290] sm:$0xff]   ;;  %v5037_v47 = vld [vmem:[#allocation13 + $0x248] sm:$0xff]  }
 0x7fe   : > { %4591 = vmatprep.subr.bf16.mxu1 %v5001_v56  ;;  %4613 = vmatprep.subr.bf16.mxu0 %v5002_v57  ;;  %v4380_v56 = vcombine.high %v2725_v48, %v2727_v49  ;;  %v2720_v57 = vld [vmem:[#allocation10 + $0x120] sm:$0xff]  ;;  %v5031_v40 = vld [vmem:[#allocation13 + $0x218] sm:$0xff]  }
 0x801   : > { %4592 = vmatpush3.bf16.msra.mxu1 %v5003_v58  ;;  %4614 = vmatpush3.bf16.msra.mxu0 %v5004_v60  ;;  %v2722_v58 = vld [vmem:[#allocation10 + $0x160] sm:$0xff]  ;;  %v2721_v60 = vld [vmem:[#allocation10 + $0x128] sm:$0xff] }
 0x802   : > { %4593 = vmatprep.subr.bf16.mxu1 %v5005_v2  ;;  %4615 = vmatprep.subr.bf16.mxu0 %v5006_v3  ;;  %v4379_v2 = vcombine.low %v2725_v48, %v2727_v49  ;;  %v4374_v3 = vcombine.high %v2720_v57, %v2722_v58  ;;  %v4375_v9 = vcombine.low %v2721_v60, %v2723_v62  ;;  %v5038_v48 = vld [vmem:[#allocation13 + $0x2c8] sm:$0xff]  }
 0x803   : > { %v5039_v49 = vld [vmem:[#allocation13 + $0x208] sm:$0xff]  }
 0x805   : > { %4594 = vmatpush3.bf16.msra.mxu1 %v5007_v4  ;;  %4616 = vmatpush3.bf16.msra.mxu0 %v5008_v5  ;;  %v4376_v4 = vcombine.high %v2721_v60, %v2723_v62  ;;  %v2716_v5 = vld [vmem:[#allocation10 + $0xa0] sm:$0xff]  ;;  %v5780_v60 = vld [vmem:[#allocation10 + $0x3f0] sm:$0xff]  ;;  %v5782_v62 = vld [vmem:[#allocation10 + $0x3b8] sm:$0xff] }
 0x806   : > { %4595 = vmatprep.subr.bf16.mxu1 %v5009_v7  ;;  %4617 = vmatprep.subr.bf16.mxu0 %v5010_v8  ;;  %v2719_v7 = vld [vmem:[#allocation10 + $0xe8] sm:$0xff]  ;;  %v4373_v8 = vcombine.low %v2720_v57, %v2722_v58  ;;  %v4370_v10 = vcombine.high %v2716_v5, %v2718_v6  ;;  %v4369_v15 = vcombine.low %v2716_v5, %v2718_v6  ;;  %v5044_v57 = vld [vmem:[#allocation13 + $0x280] sm:$0xff]  }
 0x807   : > { %v4372_v11 = vcombine.high %v2717_v29, %v2719_v7  ;;  %v5778_v58 = vld [vmem:[#allocation10 + $0x3b0] sm:$0xff] }
 0x809   : > { %4596 = vmatpush3.bf16.msra.mxu1 %v5011_v12  ;;  %4618 = vmatpush3.bf16.msra.mxu0 %v5012_v13  ;;  %v2714_v12 = vld [vmem:[#allocation10 + $0x60] sm:$0xff]  ;;  %v2713_v13 = vld [vmem:[#allocation10 + $0x28] sm:$0xff] }
 0x80a   : > { %2926 = vmatprep.subr.bf16.mxu1 %v4394_v16  ;;  %2967 = vmatprep.subr.bf16.mxu0 %v4396_v50  ;;  %v4371_v16 = vcombine.low %v2717_v29, %v2719_v7  ;;  %v4366_v50 = vcombine.high %v2712_v61, %v2714_v12  ;;  %v4368_v18 = vcombine.high %v2713_v13, %v2715_v14 }
 0x80b   : > { %v4365_v51 = vcombine.low %v2712_v61, %v2714_v12  ;;  %v4367_v19 = vcombine.low %v2713_v13, %v2715_v14 }
 0x80c   : > { %2665 = vmatmul.mubr.bf16.vlgmr.msra.gmra.mxu1 %v1732_v24  ;;  %2705 = vmatmul.mubr.bf16.vlgmr.msra.gmra.mxu0 %v1734_v25  ;;  %v5017_v24 = vld [vmem:[#allocation13 + $0x270] sm:$0xff]  }
 0x80d   : > { %2927 = vmatpush1.bf16.msra.mxu1 %v4393_v21  ;;  %2968 = vmatpush1.bf16.msra.mxu0 %v4395_v22  ;;  %v5014_v21 = vld [vmem:[#allocation13 + $0x2f8] sm:$0xff]   ;;  %v5018_v25 = vld [vmem:[#allocation13 + $0x2f0] sm:$0xff]  }
 0x80e   : > { %2928 = vmatprep.subr.bf16.mxu1 %v4390_v23  ;;  %2969 = vmatprep.subr.bf16.mxu0 %v4392_v26  ;;  %v5015_v22 = vld [vmem:[#allocation13 + $0x238] sm:$0xff]   ;;  %v5019_v26 = vld [vmem:[#allocation13 + $0x230] sm:$0xff]  }
 0x80f   : > { %2958 = vmatprep.mubr.bf16.mxu1 %v5345_v0  ;;  %2999 = vmatprep.mubr.bf16.mxu0 %v5345_v0  ;;  %v5016_v23 = vld [vmem:[#allocation13 + $0x2b8] sm:$0xff]  }
 0x811   : > { %2929 = vmatpush1.bf16.msra.mxu1 %v4389_v34  ;;  %2970 = vmatpush1.bf16.msra.mxu0 %v4391_v35  ;;  %v5024_v34 = vld [vmem:[#allocation13 + $0x2a8] sm:$0xff]   ;;  %v5025_v35 = vld [vmem:[#allocation13 + $0x260] sm:$0xff]  }
 0x812   : > { %2930 = vmatprep.subr.bf16.mxu1 %v4386_v36  ;;  %2971 = vmatprep.subr.bf16.mxu0 %v4388_v1  ;;  %v5026_v36 = vld [vmem:[#allocation13 + $0x2e0] sm:$0xff]  }
 0x813   : > { %v5027_v1 = vld [vmem:[#allocation13 + $0x220] sm:$0xff]  }
 0x815   : > { %2931 = vmatpush1.bf16.msra.mxu1 %v4385_v41  ;;  %2972 = vmatpush1.bf16.msra.mxu0 %v4387_v42  ;;  %v5032_v41 = vld [vmem:[#allocation13 + $0x298] sm:$0xff]   ;;  %v5033_v42 = vld [vmem:[#allocation13 + $0x250] sm:$0xff]  }
 0x816   : > { %2932 = vmatprep.subr.bf16.mxu1 %v4382_v43  ;;  %2973 = vmatprep.subr.bf16.mxu0 %v4384_v45  ;;  %v5034_v43 = vld [vmem:[#allocation13 + $0x2d0] sm:$0xff]  }
 0x817   : > { %v5035_v45 = vld [vmem:[#allocation13 + $0x210] sm:$0xff]  }
 0x819   : > { %2933 = vmatpush1.bf16.msra.mxu1 %v4381_v53  ;;  %2974 = vmatpush1.bf16.msra.mxu0 %v4383_v54  ;;  %v5040_v53 = vld [vmem:[#allocation13 + $0x288] sm:$0xff]   ;;  %v5041_v54 = vld [vmem:[#allocation13 + $0x240] sm:$0xff]  }
 0x81a   : > { %2934 = vmatprep.subr.bf16.mxu1 %v4378_v55  ;;  %2975 = vmatprep.subr.bf16.mxu0 %v4380_v56  ;;  %v5042_v55 = vld [vmem:[#allocation13 + $0x2c0] sm:$0xff]  }
 0x81b   : > { %v5043_v56 = vld [vmem:[#allocation13 + $0x200] sm:$0xff]  }
 0x81d   : > { %2935 = vmatpush1.bf16.msra.mxu1 %v4377_v63  ;;  %2976 = vmatpush1.bf16.msra.mxu0 %v4379_v2  ;;  %v4458_v63 = vcombine.high %v5778_v58, %v5780_v60  ;;  %v5786_v2 = vld [vmem:[#allocation10 + $0x3f8] sm:$0xff] }
 0x81e   : > { %2936 = vmatprep.subr.bf16.mxu1 %v4374_v3  ;;  %2977 = vmatprep.subr.bf16.mxu0 %v4376_v4  ;;  %v4457_v3 = vcombine.low %v5778_v58, %v5780_v60  ;;  %v4459_v4 = vcombine.low %v5782_v62, %v5786_v2  ;;  %v4460_v5 = vcombine.high %v5782_v62, %v5786_v2 }
 0x821   : > { %2937 = vmatpush1.bf16.msra.mxu1 %v4373_v8  ;;  %2978 = vmatpush1.bf16.msra.mxu0 %v4375_v9 }
 0x822   : > { %2938 = vmatprep.subr.bf16.mxu1 %v4370_v10  ;;  %2979 = vmatprep.subr.bf16.mxu0 %v4372_v11 }
 0x825   : > { %2939 = vmatpush1.bf16.msra.mxu1 %v4369_v15  ;;  %2980 = vmatpush1.bf16.msra.mxu0 %v4371_v16 }
 0x826   : > { %2940 = vmatprep.subr.bf16.mxu1 %v4366_v50  ;;  %2981 = vmatprep.subr.bf16.mxu0 %v4368_v18 }
 0x829   : > { %2941 = vmatpush1.bf16.msra.mxu1 %v4365_v51  ;;  %2982 = vmatpush1.bf16.msra.mxu0 %v4367_v19 }
 0x82a   : > { %4625 = vmatprep.subr.bf16.mxu1 %v5013_v20  ;;  %4647 = vmatprep.subr.bf16.mxu0 %v5014_v21 }
 0x82c   : > { %2959 = vmatmul.mubr.bf16.vlgmr.msra.gmra.mxu1 %v5743_v52  ;;  %3000 = vmatmul.mubr.bf16.vlgmr.msra.gmra.mxu0 %v5743_v52 }
 0x82d   : > { %4626 = vmatpush3.bf16.msra.mxu1 %v5015_v22  ;;  %4648 = vmatpush3.bf16.msra.mxu0 %v5016_v23 }
 0x82e   : > { %4627 = vmatprep.subr.bf16.mxu1 %v5017_v24  ;;  %4649 = vmatprep.subr.bf16.mxu0 %v5018_v25 }
 0x831   : > { %4628 = vmatpush3.bf16.msra.mxu1 %v5019_v26  ;;  %4650 = vmatpush3.bf16.msra.mxu0 %v5020_v27  ;;  %v2744_v26 = vld [vmem:[#allocation12 + $0x8] sm:$0xf] }
 0x832   : > { %4629 = vmatprep.subr.bf16.mxu1 %v5021_v28  ;;  %4651 = vmatprep.subr.bf16.mxu0 %v5022_v31  ;;  %v2749_v27 = vrot.slane %v2744_v26, %v5637_v30  ;;  %v2757_v28 = vrot.slane %v2744_v26, %v5658_v44  ;;  %v2753_v31 = vrot.slane %v2744_v26, %v5643_v32 }
 0x835   : > { %4630 = vmatpush3.bf16.msra.mxu1 %v5023_v33  ;;  %4652 = vmatpush3.bf16.msra.mxu0 %v5024_v34  ;;  %v2761_v33 = vrot.slane %v2744_v26, %v5756_v59  ;;  %v3362_v26 = vld [vmem:[#allocation10 + $0x138] sm:$0xff] }
 0x836   : > { %4631 = vmatprep.subr.bf16.mxu1 %v5025_v35  ;;  %4653 = vmatprep.subr.bf16.mxu0 %v5026_v36 }
 0x839   : > { %4632 = vmatpush3.bf16.msra.mxu1 %v5027_v1  ;;  %4654 = vmatpush3.bf16.msra.mxu0 %v5028_v37 }
 0x83a   : > { %4633 = vmatprep.subr.bf16.mxu1 %v5029_v38  ;;  %4655 = vmatprep.subr.bf16.mxu0 %v5030_v39 }
 0x83d   : > { %4634 = vmatpush3.bf16.msra.mxu1 %v5031_v40  ;;  %4656 = vmatpush3.bf16.msra.mxu0 %v5032_v41 }
 0x83e   : > { %4635 = vmatprep.subr.bf16.mxu1 %v5033_v42  ;;  %4657 = vmatprep.subr.bf16.mxu0 %v5034_v43 }
 0x841   : > { %4636 = vmatpush3.bf16.msra.mxu1 %v5035_v45  ;;  %4658 = vmatpush3.bf16.msra.mxu0 %v5036_v46  ;;  %v3377_v46 = vld [vmem:[#allocation10 + $0x330] sm:$0xff] }
 0x842   : > { %4637 = vmatprep.subr.bf16.mxu1 %v5037_v47  ;;  %4659 = vmatprep.subr.bf16.mxu0 %v5038_v48 }
 0x845   : > { %4638 = vmatpush3.bf16.msra.mxu1 %v5039_v49  ;;  %4660 = vmatpush3.bf16.msra.mxu0 %v5040_v53  ;;  %v3379_v49 = vld [vmem:[#allocation10 + $0x370] sm:$0xff]  ;;  %v3378_v53 = vld [vmem:[#allocation10 + $0x338] sm:$0xff] }
 0x846   : > { %4639 = vmatprep.subr.bf16.mxu1 %v5041_v54  ;;  %4661 = vmatprep.subr.bf16.mxu0 %v5042_v55  ;;  %v3380_v54 = vld [vmem:[#allocation10 + $0x378] sm:$0xff] }
 0x849   : > { %4640 = vmatpush3.bf16.msra.mxu1 %v5043_v56  ;;  %4662 = vmatpush3.bf16.msra.mxu0 %v5044_v57 }
 0x84a   : > { %3567 = vmatprep.subr.bf16.mxu1 %v4458_v63  ;;  %3608 = vmatprep.subr.bf16.mxu0 %v4460_v5 }
 0x8ac   : > { %v4553_v6 = vpop.f32.mrf.mxu1  ;;  %v4575_v29 = vpop.f32.mrf.mxu0 }
 0x8ae   : > { %v4554_v7 = vpop.f32.mrf.mxu1  ;;  %v4576_v8 = vpop.f32.mrf.mxu0 }
 0x8af   : > { %v4555_v9 = vadd.f32 %v4554_v7, %v4553_v6  ;;  %v4577_v10 = vadd.f32 %v4576_v8, %v4575_v29  ;;  %v4454_v29 = vcombine.high %v3377_v46, %v3379_v49  ;;  %v4456_v7 = vcombine.high %v3378_v53, %v3380_v54  ;;  %v3373_v8 = vld [vmem:[#allocation10 + $0x2b0] sm:$0xff] }
 0x8b0   : > { %v4556_v11 = vpop.f32.mrf.mxu1  ;;  %v4578_v61 = vpop.f32.mrf.mxu0 }
 0x8b1   : > { %v2435_v12 = vadd.f32 %v4577_v10, %v4555_v9  ;;  %v3375_v9 = vld [vmem:[#allocation10 + $0x2f0] sm:$0xff]  ;;  %v3374_v10 = vld [vmem:[#allocation10 + $0x2b8] sm:$0xff]  ;;  %v4453_v61 = vcombine.low %v3377_v46, %v3379_v49 }
 0x8b2   : > { %v4557_v13 = vpop.f32.mrf.mxu1  ;;  %v4579_v14 = vpop.f32.mrf.mxu0  ;;  %v3376_v11 = vld [vmem:[#allocation10 + $0x2f8] sm:$0xff]  ;;  %v4449_v58 = vcombine.low %v3373_v8, %v3375_v9 }
 0x8b3   : > { %v4450_v13 = vcombine.high %v3373_v8, %v3375_v9  ;;  %v4452_v14 = vcombine.high %v3374_v10, %v3376_v11  ;;  %v4451_v60 = vcombine.low %v3374_v10, %v3376_v11  ;;  %v3356_v46 = vld [vmem:[#allocation10 + $0x78] sm:$0xff]  ;;  %v5052_v8 = vld [vmem:[#allocation13 + $0x3b0] sm:$0xff]  }
 0x8b4   : > { %v5053_v9 = vld [vmem:[#allocation13 + $0x368] sm:$0xff]  }
 0x8b5   : > { %v5054_v10 = vld [vmem:[#allocation13 + $0x3e8] sm:$0xff]  }
 0x8b6   : > { %v5055_v11 = vld [vmem:[#allocation13 + $0x328] sm:$0xff]  }
 0x8cc   : > { %v4597_v15 = vpop.f32.mrf.mxu1  ;;  %v4619_v16 = vpop.f32.mrf.mxu0 }
 0x8ce   : > { %v4598_v50 = vpop.f32.mrf.mxu1  ;;  %v4620_v18 = vpop.f32.mrf.mxu0 }
 0x8cf   : > { %v4599_v51 = vadd.f32 %v4598_v50, %v4597_v15  ;;  %v4621_v19 = vadd.f32 %v4620_v18, %v4619_v16  ;;  %v3369_v15 = vld [vmem:[#allocation10 + $0x230] sm:$0xff]  ;;  %v3370_v50 = vld [vmem:[#allocation10 + $0x238] sm:$0xff] }
 0x8d0   : > { %v4600_v20 = vpop.f32.mrf.mxu1  ;;  %v4622_v21 = vpop.f32.mrf.mxu0  ;;  %v3371_v16 = vld [vmem:[#allocation10 + $0x270] sm:$0xff]  ;;  %v3372_v18 = vld [vmem:[#allocation10 + $0x278] sm:$0xff] }
 0x8d1   : > { %v2667_v22 = vadd.f32 %v4599_v51, %v2435_v12  ;;  %v4455_v12 = vcombine.low %v3378_v53, %v3380_v54  ;;  %v4446_v62 = vcombine.high %v3369_v15, %v3371_v16  ;;  %v4448_v2 = vcombine.high %v3370_v50, %v3372_v18  ;;  %v3366_v51 = vld [vmem:[#allocation10 + $0x1b8] sm:$0xff] }
 0x8d2   : > { %v4601_v23 = vpop.f32.mrf.mxu1  ;;  %v4623_v24 = vpop.f32.mrf.mxu0  ;;  %v4445_v20 = vcombine.low %v3369_v15, %v3371_v16  ;;  %v4447_v21 = vcombine.low %v3370_v50, %v3372_v18  ;;  %v5061_v15 = vld [vmem:[#allocation13 + $0x358] sm:$0xff]  }
 0x8d3   : > { %v5794_v25 = vadd.f32 %v4621_v19, %v2667_v22  ;;  %v3368_v19 = vld [vmem:[#allocation10 + $0x1f8] sm:$0xff]  ;;  %v3361_v23 = vld [vmem:[#allocation10 + $0x130] sm:$0xff]  ;;  %v5062_v16 = vld [vmem:[#allocation13 + $0x3d8] sm:$0xff]  }
 0x8d4   : > { %v3363_v24 = vld [vmem:[#allocation10 + $0x170] sm:$0xff]  ;;  %v5063_v50 = vld [vmem:[#allocation13 + $0x318] sm:$0xff]  }
 0x8d5   : > { %v5064_v18 = vld [vmem:[#allocation13 + $0x398] sm:$0xff]  }
 0x8ec   : > { %v2960_v34 = vpop.f32.mrf.mxu1  ;;  %v3001_v35 = vpop.f32.mrf.mxu0 }
 0x8ed   : > { %v2961_v36 = vadd.f32 %v2960_v34, %v2749_v27  ;;  %v3002_v1 = vadd.f32 %v3001_v35, %v2757_v28  ;;  %v3364_v27 = vld [vmem:[#allocation10 + $0x178] sm:$0xff]  ;;  %v3357_v35 = vld [vmem:[#allocation10 + $0xb0] sm:$0xff] }
 0x8ee   : > { %v2962_v37 = vpop.f32.mrf.mxu1  ;;  %v3003_v38 = vpop.f32.mrf.mxu0  ;;  %v4440_v34 = vcombine.high %v3362_v26, %v3364_v27 }
 0x8ef   : > { %v2963_v39 = vadd.f32 %v2962_v37, %v2753_v31  ;;  %v3004_v40 = vadd.f32 %v3003_v38, %v2761_v33  ;;  %v3008_v41 = vmax.f32 %v2961_v36, 0.0  ;;  %v3010_v42 = vmax.f32 %v3002_v1, 0.0  ;;  %v3359_v36 = vld [vmem:[#allocation10 + $0xf0] sm:$0xff]  ;;  %v3358_v1 = vld [vmem:[#allocation10 + $0xb8] sm:$0xff] }
 0x8f0   : > { %v2964_v43 = vpop.f32.mrf.mxu1  ;;  %v3005_v45 = vpop.f32.mrf.mxu0  ;;  %v4443_v31 = vcombine.low %v3366_v51, %v3368_v19  ;;  %v4438_v33 = vcombine.high %v3361_v23, %v3363_v24  ;;  %v3360_v37 = vld [vmem:[#allocation10 + $0xf8] sm:$0xff]  ;;  %v4437_v38 = vcombine.low %v3361_v23, %v3363_v24 }
 0x8f1   : > { %v3009_v47 = vmax.f32 %v2963_v39, 0.0  ;;  %v3011_v48 = vmax.f32 %v3004_v40, 0.0  ;;  %v3012_v5 = vpack.c.bf16 %v3008_v41, %v3008_v41  ;;  %v3014_v6 = vpack.c.bf16 %v3010_v42, %v3010_v42  ;;  %v3353_v42 = vld [vmem:[#allocation10 + $0x30] sm:$0xff]  ;;  %v3354_v45 = vld [vmem:[#allocation10 + $0x38] sm:$0xff] }
 0x8f2   : > { %v2965_v55 = vpop.f32.mrf.mxu1  ;;  %v3006_v56 = vpop.f32.mrf.mxu0  ;;  %v4439_v39 = vcombine.low %v3362_v26, %v3364_v27  ;;  %v4434_v40 = vcombine.high %v3357_v35, %v3359_v36  ;;  %v4436_v41 = vcombine.high %v3358_v1, %v3360_v37  ;;  %v3355_v43 = vld [vmem:[#allocation10 + $0x70] sm:$0xff]  ;;  %v4432_v53 = vcombine.high %v3354_v45, %v3356_v46 }
 0x8f3   : > { %v3013_v57 = vpack.c.bf16 %v3009_v47, %v3009_v47  ;;  %v3015_v63 = vpack.c.bf16 %v3011_v48, %v3011_v48  ;;  %v4433_v47 = vcombine.low %v3357_v35, %v3359_v36  ;;  %v4435_v48 = vcombine.low %v3358_v1, %v3360_v37  ;;  %v5045_v56 = vld [vmem:[#allocation13 + $0x378] sm:$0xff]  }
 0x8f4   : > { %v4430_v49 = vcombine.high %v3353_v42, %v3355_v43  ;;  %v4429_v54 = vcombine.low %v3353_v42, %v3355_v43  ;;  %v4431_v55 = vcombine.low %v3354_v45, %v3356_v46 }
 0x8f5   : > { %3304 = vmatprep.mubr.bf16.mxu1 %v3013_v57  ;;  %3344 = vmatprep.mubr.bf16.mxu0 %v3015_v63  ;;  %v5046_v57 = vld [vmem:[#allocation13 + $0x3f8] sm:$0xff]  }
 0x8f6   : > { %3305 = vmatmul.mubr.bf16.vlgmr.msra.gmra.mxu1 %v3012_v5  ;;  %3345 = vmatmul.mubr.bf16.vlgmr.msra.gmra.mxu0 %v3014_v6  ;;  %v5047_v63 = vld [vmem:[#allocation13 + $0x338] sm:$0xff]   ;;  %v5049_v6 = vld [vmem:[#allocation13 + $0x370] sm:$0xff]  }
 0x8f7   : > { %3568 = vmatpush1.bf16.msra.mxu1 %v4457_v3  ;;  %3609 = vmatpush1.bf16.msra.mxu0 %v4459_v4  ;;  %v3365_v3 = vld [vmem:[#allocation10 + $0x1b0] sm:$0xff]  ;;  %v5048_v5 = vld [vmem:[#allocation13 + $0x3b8] sm:$0xff]  }
 0x8f8   : > { %3569 = vmatprep.subr.bf16.mxu1 %v4454_v29  ;;  %3610 = vmatprep.subr.bf16.mxu0 %v4456_v7  ;;  %v3367_v4 = vld [vmem:[#allocation10 + $0x1f0] sm:$0xff]  ;;  %v5050_v29 = vld [vmem:[#allocation13 + $0x3f0] sm:$0xff]  }
 0x8f9   : > { %3599 = vmatprep.mubr.bf16.mxu1 %v5345_v0  ;;  %3640 = vmatprep.mubr.bf16.mxu0 %v5345_v0  ;;  %v4442_v22 = vcombine.high %v3365_v3, %v3367_v4  ;;  %v4444_v0 = vcombine.high %v3366_v51, %v3368_v19  ;;  %v4441_v28 = vcombine.low %v3365_v3, %v3367_v4  ;;  %v5051_v7 = vld [vmem:[#allocation13 + $0x330] sm:$0xff]   ;;  %v5069_v3 = vld [vmem:[#allocation13 + $0x348] sm:$0xff]  }
 0x8fa   : > { %v5070_v4 = vld [vmem:[#allocation13 + $0x3c8] sm:$0xff]  }
 0x8fb   : > { %3570 = vmatpush1.bf16.msra.mxu1 %v4453_v61  ;;  %3611 = vmatpush1.bf16.msra.mxu0 %v4455_v12  ;;  %v5057_v61 = vld [vmem:[#allocation13 + $0x360] sm:$0xff]   ;;  %v5071_v51 = vld [vmem:[#allocation13 + $0x308] sm:$0xff]  }
 0x8fc   : > { %3571 = vmatprep.subr.bf16.mxu1 %v4450_v13  ;;  %3612 = vmatprep.subr.bf16.mxu0 %v4452_v14  ;;  %v5058_v12 = vld [vmem:[#allocation13 + $0x3e0] sm:$0xff]   ;;  %v5072_v19 = vld [vmem:[#allocation13 + $0x388] sm:$0xff]  }
 0x8fd   : > { %v5059_v13 = vld [vmem:[#allocation13 + $0x320] sm:$0xff]  }
 0x8fe   : > { %v5060_v14 = vld [vmem:[#allocation13 + $0x3a0] sm:$0xff]  }
 0x8ff   : > { %3572 = vmatpush1.bf16.msra.mxu1 %v4449_v58  ;;  %3613 = vmatpush1.bf16.msra.mxu0 %v4451_v60  ;;  %v5065_v58 = vld [vmem:[#allocation13 + $0x350] sm:$0xff]  }
 0x900   : > { %3573 = vmatprep.subr.bf16.mxu1 %v4446_v62  ;;  %3614 = vmatprep.subr.bf16.mxu0 %v4448_v2  ;;  %v5066_v60 = vld [vmem:[#allocation13 + $0x3d0] sm:$0xff]  }
 0x901   : > { %v5067_v62 = vld [vmem:[#allocation13 + $0x310] sm:$0xff]  }
 0x902   : > { %v5068_v2 = vld [vmem:[#allocation13 + $0x390] sm:$0xff]  }
 0x903   : > { %3574 = vmatpush1.bf16.msra.mxu1 %v4445_v20  ;;  %3615 = vmatpush1.bf16.msra.mxu0 %v4447_v21  ;;  %v5073_v20 = vld [vmem:[#allocation13 + $0x340] sm:$0xff]  }
 0x904   : > { %3575 = vmatprep.subr.bf16.mxu1 %v4442_v22  ;;  %3616 = vmatprep.subr.bf16.mxu0 %v4444_v0  ;;  %v5074_v21 = vld [vmem:[#allocation13 + $0x3c0] sm:$0xff]  }
 0x905   : > { %v5075_v22 = vld [vmem:[#allocation13 + $0x300] sm:$0xff]  }
 0x906   : > { %v5076_v0 = vld [vmem:[#allocation13 + $0x380] sm:$0xff]  }
 0x907   : > { %3576 = vmatpush1.bf16.msra.mxu1 %v4441_v28  ;;  %3617 = vmatpush1.bf16.msra.mxu0 %v4443_v31 }
 0x908   : > { %3577 = vmatprep.subr.bf16.mxu1 %v4438_v33  ;;  %3618 = vmatprep.subr.bf16.mxu0 %v4440_v34 }
 0x90b   : > { %3578 = vmatpush1.bf16.msra.mxu1 %v4437_v38  ;;  %3619 = vmatpush1.bf16.msra.mxu0 %v4439_v39  ;;  %v3385_v38 = vld [vmem:[#allocation12 + $0xc] sm:$0xf] }
 0x90c   : > { %3579 = vmatprep.subr.bf16.mxu1 %v4434_v40  ;;  %3620 = vmatprep.subr.bf16.mxu0 %v4436_v41  ;;  %v3390_v39 = vrot.slane %v3385_v38, %v5637_v30  ;;  %v3398_v40 = vrot.slane %v3385_v38, %v5658_v44  ;;  %v3394_v41 = vrot.slane %v3385_v38, %v5643_v32 }
 0x90d   : > { %v3402_v42 = vrot.slane %v3385_v38, %v5756_v59 }
 0x90f   : > { %3580 = vmatpush1.bf16.msra.mxu1 %v4433_v47  ;;  %3621 = vmatpush1.bf16.msra.mxu0 %v4435_v48 }
 0x910   : > { %3581 = vmatprep.subr.bf16.mxu1 %v4430_v49  ;;  %3622 = vmatprep.subr.bf16.mxu0 %v4432_v53 }
 0x913   : > { %3582 = vmatpush1.bf16.msra.mxu1 %v4429_v54  ;;  %3623 = vmatpush1.bf16.msra.mxu0 %v4431_v55 }
 0x914   : > { %4669 = vmatprep.subr.bf16.mxu1 %v5045_v56  ;;  %4691 = vmatprep.subr.bf16.mxu0 %v5046_v57 }
 0x916   : > { %3600 = vmatmul.mubr.bf16.vlgmr.msra.gmra.mxu1 %v5743_v52  ;;  %3641 = vmatmul.mubr.bf16.vlgmr.msra.gmra.mxu0 %v5743_v52  ;;  %v5056_v52 = vld [vmem:[#allocation13 + $0x3a8] sm:$0xff]  }
 0x917   : > { %4670 = vmatpush3.bf16.msra.mxu1 %v5047_v63  ;;  %4692 = vmatpush3.bf16.msra.mxu0 %v5048_v5 }
 0x918   : > { %4671 = vmatprep.subr.bf16.mxu1 %v5049_v6  ;;  %4693 = vmatprep.subr.bf16.mxu0 %v5050_v29 }
 0x91b   : > { %4672 = vmatpush3.bf16.msra.mxu1 %v5051_v7  ;;  %4694 = vmatpush3.bf16.msra.mxu0 %v5052_v8 }
 0x91c   : > { %4673 = vmatprep.subr.bf16.mxu1 %v5053_v9  ;;  %4695 = vmatprep.subr.bf16.mxu0 %v5054_v10 }
 0x91f   : > { %4674 = vmatpush3.bf16.msra.mxu1 %v5055_v11  ;;  %4696 = vmatpush3.bf16.msra.mxu0 %v5056_v52 }
 0x920   : > { %4675 = vmatprep.subr.bf16.mxu1 %v5057_v61  ;;  %4697 = vmatprep.subr.bf16.mxu0 %v5058_v12 }
 0x923   : > { %4676 = vmatpush3.bf16.msra.mxu1 %v5059_v13  ;;  %4698 = vmatpush3.bf16.msra.mxu0 %v5060_v14 }
 0x924   : > { %4677 = vmatprep.subr.bf16.mxu1 %v5061_v15  ;;  %4699 = vmatprep.subr.bf16.mxu0 %v5062_v16  ;;  %v4493_v16 = vld [vmem:[%s5871_s8] ss:$0 sm:$0xff] }
 0x927   : > { %4678 = vmatpush3.bf16.msra.mxu1 %v5063_v50  ;;  %4700 = vmatpush3.bf16.msra.mxu0 %v5064_v18 }
 0x928   : > { %4679 = vmatprep.subr.bf16.mxu1 %v5065_v58  ;;  %4701 = vmatprep.subr.bf16.mxu0 %v5066_v60 }
 0x92b   : > { %4680 = vmatpush3.bf16.msra.mxu1 %v5067_v62  ;;  %4702 = vmatpush3.bf16.msra.mxu0 %v5068_v2 }
 0x92c   : > { %4681 = vmatprep.subr.bf16.mxu1 %v5069_v3  ;;  %4703 = vmatprep.subr.bf16.mxu0 %v5070_v4 }
 0x92f   : > { %4682 = vmatpush3.bf16.msra.mxu1 %v5071_v51  ;;  %4704 = vmatpush3.bf16.msra.mxu0 %v5072_v19 }
 0x930   : > { %4683 = vmatprep.subr.bf16.mxu1 %v5073_v20  ;;  %4705 = vmatprep.subr.bf16.mxu0 %v5074_v21 }
 0x933   : > { %4684 = vmatpush3.bf16.msra.mxu1 %v5075_v22  ;;  %4706 = vmatpush3.bf16.msra.mxu0 %v5076_v0 }
 0x9b6   : > { %v4641_v23 = vpop.f32.mrf.mxu1  ;;  %v4663_v24 = vpop.f32.mrf.mxu0 }
 0x9b8   : > { %v4642_v26 = vpop.f32.mrf.mxu1  ;;  %v4664_v27 = vpop.f32.mrf.mxu0 }
 0x9b9   : > { %v4643_v28 = vadd.f32 %v4642_v26, %v4641_v23  ;;  %v4665_v31 = vadd.f32 %v4664_v27, %v4663_v24  ;;  %v4495_v23 = vld [vmem:[%s5875_s12] ss:$0 sm:$0xff]  ;;  %v4036_v24 = vld [vmem:[%s5598_s17] sm:$0xff]  ;;  %v4037_v26 = vstv %s4035_s3  ;;  %s5256_s17 = scalar_lea.vmem %s4056_s24, 128 }
 0x9ba   : > { %v4644_v33 = vpop.f32.mrf.mxu1  ;;  %v4666_v34 = vpop.f32.mrf.mxu0  ;;  %p5257_p0 = scmp.ne.s32.totalorder %s4056_s24, %s5256_s17 }
 0x9bb   : > { %v3347_v35 = vadd.f32 %v4665_v31, %v4643_v28  ;;  %v4033_v28 = vstv %s4032_s1  ;;  %v4038_v33 = vmul.f32 %v4037_v26, %v4036_v24  ;;  %s5351_s1 = smov [#allocation15]  }
 0x9bc   : > { %v4645_v36 = vpop.f32.mrf.mxu1  ;;  %v4667_v1 = vpop.f32.mrf.mxu0  ;;  %p5258_p5 = pnand %p5257_p0, %p5915_p2  ;;  %s5260_s3 = sshll.u32 %s5351_s1, 4  ;;  %s5261_s3 = int_to_ptr.vmem [resolvable:$false] %s5260_s3 }
 0x9bd   : > { %v3352_v37 = vadd.f32 %v3347_v35, %v5794_v25  ;;  %s5262_s20 = scalar_lea.vmem %s5261_s3, 256  ;;  %p5263_p12 = scmp.lt.s32.totalorder %s4056_s24, %s5261_s3 }
 0x9be   : > { %p5259_p8 = pneg %p5258_p5  ;;  %p5264_p3 = scmp.lt.s32.totalorder %s5262_s20, %s5256_s17 }
 0x9c0   : > { %p5265_p4 = por %p5264_p3, %p5263_p12 }
 0x9c2   : > { %p5266_p6 = pnand %p5265_p4, %p5259_p8 }
 0x9d6   : > { %v3601_v43 = vpop.f32.mrf.mxu1  ;;  %v3642_v45 = vpop.f32.mrf.mxu0 }
 0x9d7   : > { %v3602_v46 = vadd.f32 %v3601_v43, %v3390_v39  ;;  %v3643_v47 = vadd.f32 %v3642_v45, %v3398_v40 }
 0x9d8   : > { %v3603_v48 = vpop.f32.mrf.mxu1  ;;  %v3644_v49 = vpop.f32.mrf.mxu0 }
 0x9d9   : > { %v3604_v53 = vadd.f32 %v3603_v48, %v3394_v41  ;;  %v3645_v54 = vadd.f32 %v3644_v49, %v3402_v42  ;;  %v3649_v55 = vmax.f32 %v3602_v46, 0.0  ;;  %v3651_v56 = vmax.f32 %v3643_v47, 0.0 }
 0x9da   : > { %v3605_v25 = vpop.f32.mrf.mxu1  ;;  %v3646_v57 = vpop.f32.mrf.mxu0 }
 0x9db   : > { %v3650_v63 = vmax.f32 %v3604_v53, 0.0  ;;  %v3652_v30 = vmax.f32 %v3645_v54, 0.0  ;;  %v3653_v29 = vpack.c.bf16 %v3649_v55, %v3649_v55  ;;  %v3655_v59 = vpack.c.bf16 %v3651_v56, %v3651_v56 }
 0x9dc   : > { %v3606_v5 = vpop.f32.mrf.mxu1  ;;  %v3647_v44 = vpop.f32.mrf.mxu0 }
 0x9dd   : > { %v3654_v6 = vpack.c.bf16 %v3650_v63, %v3650_v63  ;;  %v3656_v32 = vpack.c.bf16 %v3652_v30, %v3652_v30 }
 0x9df   : > { %3945 = vmatprep.mubr.bf16.mxu1 %v3654_v6  ;;  %3985 = vmatprep.mubr.bf16.mxu0 %v3656_v32 }
 0x9e0   : > { %3946 = vmatmul.mubr.bf16.vlgmr.msra.gmra.mxu1 %v3653_v29  ;;  %3986 = vmatmul.mubr.bf16.vlgmr.msra.gmra.mxu0 %v3655_v59 }
 0xaa0   : > { %v4685_v7 = vpop.f32.mrf.mxu1  ;;  %v4707_v8 = vpop.f32.mrf.mxu0 }
 0xaa2   : > { %v4686_v9 = vpop.f32.mrf.mxu1  ;;  %v4708_v10 = vpop.f32.mrf.mxu0 }
 0xaa3   : > { %v4687_v11 = vadd.f32 %v4686_v9, %v4685_v7  ;;  %v4709_v52 = vadd.f32 %v4708_v10, %v4707_v8 }
 0xaa4   : > { %v4688_v61 = vpop.f32.mrf.mxu1  ;;  %v4710_v12 = vpop.f32.mrf.mxu0 }
 0xaa5   : > { %v3988_v13 = vadd.f32 %v4709_v52, %v4687_v11 }
 0xaa6   : > { %v4689_v14 = vpop.f32.mrf.mxu1  ;;  %v4711_v15 = vpop.f32.mrf.mxu0 }
 0xaa7   : > { %v3993_v50 = vadd.f32 %v3988_v13, %v3352_v37 }
 0xaa9   : > { %v4001_v18 = vadd.f32 %v4493_v16, %v3993_v50 }
 0xaab   : > { %v4002_v58 = vadd.f32 %v4001_v18, %v5739_v17  ;;  %v4494_v17 = vld [vmem:[%s5874_s11] ss:$0 sm:$0xff] }
 0xaad   : > { %4005 = vadd.xlane.f32.xlu0 %v4002_v58  ;;  %v4008_v60 = vmul.f32 %v4002_v58, %v4002_v58 }
 0xaaf   : > { %4009 = vadd.xlane.f32.xlu1 %v4008_v60 }
 0xb36   : > { %v4006_v62 = vpop.xlane.xlu0 %4005 }
 0xb37   : > { %v4007_v2 = vmul.f32 0.03125, %v4006_v62 }
 0xb38   : > { %v4010_v3 = vpop.xlane.xlu1 %4009 }
 0xb39   : > { %v4012_v4 = vmul.f32 %v4007_v2, %v4007_v2  ;;  %v4011_v51 = vmul.f32 0.03125, %v4010_v3  ;;  %v4014_v21 = vsub.f32 %v4002_v58, %v4007_v2 }
 0xb3b   : > { %v4013_v19 = vsub.f32 %v4011_v51, %v4012_v4 }
 0xb3d   : > { %v4015_v20 = vadd.f32 1e-05, %v4013_v19 }
 0xb3f   : > { %5095 = vrsqrt.f32 %v4015_v20 }
 0xb4c   : > { %v5096_v22 = vpop.eup %5095 }
 0xb4d   : > { %v4017_v0 = vmul.f32 %v5096_v22, %v4014_v21 }
 0xb4f   : > { %v4024_v27 = vmul.f32 %v4494_v17, %v4017_v0 }
 0xb51   : > { %v4031_v31 = vadd.f32 %v4495_v23, %v4024_v27 }
 0xb53   : > { %v4034_v34 = vmul.f32 %v4033_v28, %v4031_v31 }
 0xb55   : > { %v4039_v35 = vadd.f32 %v4038_v33, %v4034_v34 }
 0xb57   : > { %4040 = vst [vmem:[%s554_s30] sm:$0xff] %v4039_v35 }
 0xb58   : > { %5269 = shalt.err (!%p5266_p6)
}
 0xb59   : > { %s5270_s19 = scalar_lea.hbm %s4053_s23, 128  ;;  %s5274_s21 = scalar_lea.hbm %s5914_s13, 256 }
 0xb5a   : > { %p5271_p9 = scmp.ne.s32.totalorder %s4053_s23, %s5270_s19  ;;  %p5275_p1 = scmp.lt.s32.totalorder %s4053_s23, %s5914_s13 }
 0xb5b   : > { %p5276_p7 = scmp.lt.s32.totalorder %s5274_s21, %s5270_s19 }
 0xb5c   : > { %p5272_p10 = pnand %p5271_p9, %p5915_p2 }
 0xb5d   : > { %p5277_p13 = por %p5276_p7, %p5275_p1 }
 0xb5e   : > { %p5273_p11 = pneg %p5272_p10 }
 0xb60   : > { %p5278_p0 = pnand %p5277_p13, %p5273_p11 }
 0xb62   : > { %5281 = shalt.err (!%p5278_p0)
}
 0xb63   : > { %4823 = dma.vmem_to_hbm [thread:$0]  (%p5915_p2), %s4056_s24, 128, %s4053_s23, %s4042_s5  }
 0xb64 PF: > { %s4067_s30 = sand.u32 1, %s5320_s15   ;;  %p5916_p5 = scmp.ne.s32.totalorder %s5904_s25, 0 }
 0xb65   : > { %p5917_p8 = scmp.ge.s32.totalorder %s5332_s18, 2  ;;  %s4068_s22 = scalar_lea.sflag [#allocation6], %s4067_s30 }
 0xb67   : > { %p4846_p12 = pnand %p5917_p8, %p5916_p5 }
 0xb69   : > { %p4847_p3 = pneg %p4846_p12 }
 0xb6b   : > { %5315 = dma.done.wait (%p4847_p3), %s4068_s22, 128  }
 0xb6c   : > { %5317 = vsyncadd (%p4847_p3), %s4068_s22, 4294967168  ;;  %s5918_s26 = sld [smem:[#allocation21_spill]]  ;;  %p31_p4 = scmp.ge.s32.totalorder %s5529_s27, 4  }
 0xb6d   : > { %s5919_s17 = sld [smem:[#allocation22_spill]]  ;;  %s5920_s15 = smov %s5324_s16 }
 0xb6e   : > { %s5922_s18 = smov %s5529_s27  ;;  %33 = sbr.rel (!%p31_p4) target bundleno = 16 (0x10), region = 141 }
 0xb72   : > { %s5921_s16 = smov %s5918_s26 }
 0xb73   :  { %4073 = vsyncpa [#allocation5], 1 }
 0xb74   :  { %4075 = vsyncpa [#allocation5 + $0x1], 1 }
 0xb75   :  { %4076 = vsyncpa [#allocation8], 1 }
 0xb76   :  { %4077 = vsyncpa [#allocation11], 1 }
 0xb77   :  { %4078 = vsyncpa [#allocation14], 1 }
 0xb78   :  { %4079 = vsyncpa [#allocation6], 1 }
 0xb79   :  { %4081 = vsyncpa [#allocation6 + $0x1], 1 }

// kernel: tpu_custom_call.1
= control target key start
LH: loop header
LB: loop body
LE: loop exit
PB: predicated region body
PF: predicated region fallthrough
CT: control target
= control target key end

     0   :  { %s5863_s0 = inlined_call_operand.hbm [shape: f32[2,8,128], index: 0, kind: input, shape index: {}]   ;;  %s5864_s1 = inlined_call_operand.hbm [shape: bf16[128,384], index: 1, kind: input, shape index: {}]   ;;  %s5865_s2 = inlined_call_operand.vmem [shape: f32[1,384], index: 2, kind: input, shape index: {}]   ;;  %s5866_s3 = inlined_call_operand.hbm [shape: bf16[128,128], index: 3, kind: input, shape index: {}]   ;;  %s5867_s4 = inlined_call_operand.vmem [shape: f32[1,128], index: 4, kind: input, shape index: {}]   ;;  %s5868_s5 = inlined_call_operand.hbm [shape: bf16[128,2048], index: 5, kind: input, shape index: {}]   ;;  %s5869_s6 = inlined_call_operand.hbm [shape: f32[1,2048], index: 6, kind: input, shape index: {}]   ;;  %s5870_s7 = inlined_call_operand.hbm [shape: bf16[2048,128], index: 7, kind: input, shape index: {}]   ;;  %s5871_s8 = inlined_call_operand.vmem [shape: f32[1,128], index: 8, kind: input, shape index: {}]   ;;  %s5872_s9 = inlined_call_operand.vmem [shape: f32[1,128], index: 9, kind: input, shape index: {}]   ;;  %s5873_s10 = inlined_call_operand.vmem [shape: f32[1,128], index: 10, kind: input, shape index: {}]   ;;  %s5874_s11 = inlined_call_operand.vmem [shape: f32[1,128], index: 11, kind: input, shape index: {}]   ;;  %s5875_s12 = inlined_call_operand.vmem [shape: f32[1,128], index: 12, kind: input, shape index: {}]   ;;  %s5876_s13 = inlined_call_operand.<no memory space> [shape: f32[1], index: 13, kind: input, shape index: {}]   ;;  %s5877_s14 = inlined_call_operand.hbm [shape: f32[2,8,128], index: 14, kind: output, shape index: {}]  }
   0x1   :  { %5884 = sst [smem:[#allocation23_spill]] %s5864_s1 }
   0x2   :  { %5885 = sst [smem:[#allocation24_spill]] %s5866_s3 }
   0x3   :  { %5886 = sst [smem:[#allocation25_spill]] %s5868_s5 }
   0x4   :  { %5887 = sst [smem:[#allocation26_spill]] %s5869_s6 }
   0x5   :  { %5888 = sst [smem:[#allocation27_spill]] %s5870_s7 }
   0x6   :  { %5889 = sst [smem:[#allocation28_spill]] %s5877_s14 }
   0x7   :  { %19 = sst [smem:[#allocation3]] %s5876_s13 }
   0x8   :  { %20 = vsyncpa [#allocation5], 0 }
   0x9   :  { %22 = vsyncpa [#allocation5 + $0x1], 0 }
   0xa   :  { %23 = vsyncpa [#allocation8], 0 }
   0xb   :  { %24 = vsyncpa [#allocation11], 0 }
   0xc   :  { %25 = vsyncpa [#allocation14], 0 }
   0xd   :  { %26 = vsyncpa [#allocation6], 0 }
   0xe   :  { %28 = vsyncpa [#allocation6 + $0x1], 0  ;;  %s5430_s15 = smov 0   ;;  %s5432_s16 = smov 0  }
   0xf   :  { %s5434_s17 = smov 0   ;;  %s5436_s18 = smov 0  }
  0x10 LB: > { %5890 = sst [smem:[#allocation21_spill]] %s5328_s17  ;;  %s5334_s13 = smov [#allocation7]   ;;  %s5332_s18 = sphi %s5436_s18, %s5922_s18   ;;  %s5328_s17 = sphi %s5434_s17, %s5919_s17   ;;  %s5324_s16 = sphi %s5432_s16, %s5921_s16   ;;  %s5320_s15 = sphi %s5430_s15, %s5920_s15  }
  0x11   : > { %s376_s19 = sshll.u32 %s5334_s13, 4  ;;  %s5451_s20 = sadd.s32 4294967295, %s5332_s18   ;;  %s377_s19 = int_to_ptr.vmem [resolvable:$true] %s376_s19 }
  0x12   : > { %p4174_p0 = scmp.ge.s32.totalorder %s5332_s18, 1  ;;  %p5879_p1 = scmp.eq.s32.totalorder %s5451_s20, 0 }
  0x13   : > { %p364_p2 = scmp.lt.s32.totalorder %s5332_s18, 3  ;;  %s5335_s23 = smov [#allocation10]  }
  0x14   : > { %s408_s24 = sshll.u32 %s5335_s23, 4  ;;  %s5336_s25 = smov [#allocation9]   ;;  %s5469_s24 = int_to_ptr.vmem [resolvable:$true] %s408_s24 }
  0x15   : > { %p5456_p3 = pnand %p4174_p0, %p364_p2  ;;  %s5471_s26 = sshll.u32 %s5336_s25, 4  ;;  %s393_s26 = int_to_ptr.vmem [resolvable:$true] %s5471_s26 }
  0x16   : > { %s5109_s28 = scalar_lea.vmem %s377_s19, 3072  ;;  %p5117_p11 = scmp.lt.s32.totalorder %s377_s19, %s377_s19 }
  0x17   : > { %s5891_s21 = scalar_select %p5456_p3, 1, 0 }
  0x18   : > { %p4825_p5 = pneg %p5456_p3  ;;  %p5110_p8 = scmp.ne.s32.totalorder %s377_s19, %s5109_s28 }
  0x19   : > { %p5118_p12 = scmp.lt.s32.totalorder %s5109_s28, %s5109_s28 }
  0x1a   : > { %p5465_p6 = pnand %p4825_p5, %p5879_p1 }
  0x1b   : > { %p5119_p13 = por %p5118_p12, %p5117_p11 }
  0x1c   : > { %p5475_p7 = pneg %p5465_p6 }
  0x1e   : > { %p5112_p9 = pnand %p5110_p8, %p5475_p7 }
  0x20   : > { %p5113_p10 = pneg %p5112_p9 }
  0x22   : > { %p5120_p0 = pnand %p5119_p13, %p5113_p10 }
  0x24   : > { %5123 = shalt.err (!%p5120_p0)
}
  0x25   : > { %s5337_s29 = smov 192   ;;  %s5338_s30 = smov 12  }
  0x26   : > { %s5894_s1 = sld [smem:[#allocation23_spill]]  ;;  %s5135_s25 = scalar_lea.vmem %s5469_s24, 16384 }
  0x27   : > { %p5136_p2 = scmp.ne.s32.totalorder %s5469_s24, %s5135_s25  ;;  %p5143_p9 = scmp.lt.s32.totalorder %s5469_s24, %s5469_s24 }
  0x28   : > { %p5144_p10 = scmp.lt.s32.totalorder %s5135_s25, %s5135_s25 }
  0x29   : > { %p5138_p5 = pnand %p5136_p2, %p5475_p7 }
  0x2a   : > { %p5145_p11 = por %p5144_p10, %p5143_p9 }
  0x2b   : > { %p5139_p8 = pneg %p5138_p5 }
  0x2c   : > { %4828 = dma.hbm_to_vmem [thread:$0]  (!%p5465_p6), %s5894_s1, 3072, %s377_s19, [#allocation8], %s5337_s29, %s5337_s29, %s5338_s30  }
  0x2d   : > { %p5146_p12 = pnand %p5145_p11, %p5139_p8 }
  0x2f   : > { %5149 = shalt.err (!%p5146_p12)
}
  0x30   : > { %s5339_s28 = smov 1024   ;;  %s5340_s14 = smov 64  }
  0x31   : > { %s5895_s5 = sld [smem:[#allocation25_spill]]  ;;  %s5161_s30 = scalar_lea.vmem %s393_s26, 1024 }
  0x32   : > { %p5162_p13 = scmp.ne.s32.totalorder %s393_s26, %s5161_s30  ;;  %p5169_p5 = scmp.lt.s32.totalorder %s393_s26, %s393_s26 }
  0x33   : > { %p5170_p8 = scmp.lt.s32.totalorder %s5161_s30, %s5161_s30 }
  0x34   : > { %p5164_p0 = pnand %p5162_p13, %p5475_p7 }
  0x35   : > { %p5171_p9 = por %p5170_p8, %p5169_p5 }
  0x36   : > { %p5165_p2 = pneg %p5164_p0 }
  0x37   : > { %4834 = dma.hbm_to_vmem [thread:$0]  (!%p5465_p6), %s5895_s5, 16384, %s5469_s24, [#allocation11], %s5339_s28, %s5339_s28, %s5340_s14  }
  0x38   : > { %p5172_p10 = pnand %p5171_p9, %p5165_p2 }
  0x3a   : > { %5175 = shalt.err (!%p5172_p10)
}
  0x3b   : > { %s5341_s13 = smov 4   ;;  %s5896_s3 = sld [smem:[#allocation24_spill]] }
  0x3c   : > { %s5342_s24 = smov [#allocation12]   ;;  %s5343_s19 = smov [#allocation13]  }
  0x3d   : > { %s422_s28 = sshll.u32 %s5342_s24, 4  ;;  %s432_s29 = sshll.u32 %s5343_s19, 4  ;;  %s423_s28 = int_to_ptr.vmem [resolvable:$true] %s422_s28  ;;  %s433_s29 = int_to_ptr.vmem [resolvable:$true] %s432_s29 }
  0x3e   : > { %s5187_s30 = scalar_lea.vmem %s423_s28, 256  ;;  %p5195_p0 = scmp.lt.s32.totalorder %s423_s28, %s423_s28 }
  0x3f   : > { %p5188_p11 = scmp.ne.s32.totalorder %s423_s28, %s5187_s30  ;;  %p5196_p2 = scmp.lt.s32.totalorder %s5187_s30, %s5187_s30 }
  0x41   : > { %4831 = dma.hbm_to_vmem [thread:$0]  (!%p5465_p6), %s5896_s3, 1024, %s393_s26, [#allocation8], %s5340_s14, %s5340_s14, %s5341_s13  }
  0x42   : > { %p5190_p12 = pnand %p5188_p11, %p5475_p7  ;;  %p5197_p5 = por %p5196_p2, %p5195_p0 }
  0x44   : > { %p5191_p13 = pneg %p5190_p12 }
  0x46   : > { %p5198_p8 = pnand %p5197_p5, %p5191_p13 }
  0x48   : > { %5201 = shalt.err (!%p5198_p8)
}
  0x49   : > { %s5897_s6 = sld [smem:[#allocation26_spill]]  ;;  %s5213_s25 = scalar_lea.vmem %s433_s29, 16384 }
  0x4a   : > { %p5214_p9 = scmp.ne.s32.totalorder %s433_s29, %s5213_s25  ;;  %p5221_p1 = scmp.lt.s32.totalorder %s433_s29, %s433_s29 }
  0x4b   : > { %p5222_p11 = scmp.lt.s32.totalorder %s5213_s25, %s5213_s25 }
  0x4c   : > { %p5216_p10 = pnand %p5214_p9, %p5475_p7 }
  0x4d   : > { %p5223_p12 = por %p5222_p11, %p5221_p1 }
  0x4e   : > { %p5217_p4 = pneg %p5216_p10 }
  0x4f   : > { %4837 = dma.hbm_to_vmem [thread:$0]  (!%p5465_p6), %s5897_s6, 256, %s423_s28, [#allocation11]  }
  0x50   : > { %p5224_p3 = pnand %p5223_p12, %p5217_p4 }
  0x52   : > { %5227 = shalt.err (!%p5224_p3)
}
  0x53   : > { %s5898_s7 = sld [smem:[#allocation27_spill]]  ;;  %s4173_s22 = sadd.s32 4294967294, %s5332_s18  }
  0x54   : > { %s5529_s27 = sadd.s32 1, %s5332_s18   ;;  %s41_s30 = sadd.s32 1, %s5328_s17 }
  0x55   : > { %s38_s28 = ssub.s32 %s5332_s18, %s5529_s27  ;;  %p48_p3 = scmp.ne.s32.totalorder %s5328_s17, %s5324_s16 }
  0x56   : > { %p39_p1 = scmp.eq.s32.totalorder %s38_s28, 0  ;;  %p49_p4 = scmp.eq.s32.totalorder %s5332_s18, 0 }
  0x57   : > { %p54_p7 = scmp.ne.s32.totalorder %s5324_s16, %s5320_s15  ;;  %p5901_p0 = scmp.eq.s32.totalorder %s5451_s20, 0 }
  0x58   : > { %s5540_s23 = scalar_select %p39_p1, %s5328_s17, %s41_s30  }
  0x59   : > { %4840 = dma.hbm_to_vmem [thread:$0]  (!%p5465_p6), %s5898_s7, 16384, %s433_s29, [#allocation14], %s5340_s14, %s5340_s14, %s5341_s13  }
  0x5a   : > { %5899 = sst [smem:[#allocation22_spill]] %s5540_s23  ;;  %p5542_p13 = por %p49_p4, %p48_p3 }
  0x5b   : > { %p5548_p6 = por %p5901_p0, %p54_p7  ;;  %p351_p2 = scmp.eq.s32.totalorder %s5451_s20, 1 }
  0x5c   : > { %p357_p5 = scmp.eq.s32.totalorder %s4173_s22, 1  ;;  %p4854_p8 = scmp.lt.s32.totalorder %s5332_s18, 2 }
  0x5d   : > { %s5902_s14 = scalar_select %p5548_p6, 1, 0 }
  0x5e   : > { %s464_s13 = sand.u32 1, %s5328_s17   ;;  %p5555_p9 = por %p351_p2, %p48_p3 }
  0x5f   : > { %p5559_p10 = por %p357_p5, %p54_p7  ;;  %s4181_s24 = sshll.u32 %s464_s13, 3 }
  0x60   : > { %s5903_s29 = scalar_select %p5555_p9, 1, 0 }
  0x61   : > { %s5904_s25 = scalar_select %p5559_p10, 1, 0 }
  0x62   : > { %s4182_s19 = sshll.u32 %s5332_s18, 7  ;;  %s468_s22 = scalar_lea.vmem [#allocation4], %s4181_s24 }
  0x63   : > { %s5567_s1 = scalar_lea.hbm %s5863_s0, %s4182_s19  ;;  %s475_s3 = sshll.u32 %s468_s22, 4  ;;  %s476_s3 = int_to_ptr.vmem [resolvable:$true] %s475_s3 }
  0x64   : > { %p5571_p11 = pnand %p4854_p8, %p5542_p13  ;;  %s465_s6 = scalar_lea.sflag [#allocation5], %s464_s13 }
  0x65   : > { %s5228_s7 = scalar_lea.hbm %s5567_s1, 128  ;;  %s5233_s30 = scalar_lea.hbm %s5863_s0, 256 }
  0x66   : > { %p5229_p12 = scmp.ne.s32.totalorder %s5567_s1, %s5228_s7  ;;  %p5230_p1 = pneg %p5571_p11 }
  0x67   : > { %p5234_p7 = scmp.lt.s32.totalorder %s5567_s1, %s5863_s0  ;;  %p5235_p13 = scmp.lt.s32.totalorder %s5233_s30, %s5228_s7 }
  0x68   : > { %p5231_p3 = pnand %p5230_p1, %p5229_p12 }
  0x69   : > { %p5236_p0 = por %p5235_p13, %p5234_p7 }
  0x6a   : > { %p5232_p4 = pneg %p5231_p3 }
  0x6c   : > { %p5237_p2 = pnand %p5236_p0, %p5232_p4 }
  0x6e   : > { %5240 = shalt.err (!%p5237_p2)
}
  0x6f   : > { %s5241_s26 = scalar_lea.vmem %s476_s3, 128  ;;  %s5344_s13 = smov [#allocation4]  }
  0x70   : > { %p5242_p5 = scmp.ne.s32.totalorder %s476_s3, %s5241_s26  ;;  %s5246_s23 = sshll.u32 %s5344_s13, 4  ;;  %s5247_s23 = int_to_ptr.vmem [resolvable:$false] %s5246_s23 }
  0x71   : > { %s5248_s17 = scalar_lea.vmem %s5247_s23, 256  ;;  %p5249_p12 = scmp.lt.s32.totalorder %s476_s3, %s5247_s23 }
  0x72   : > { %p5244_p8 = pnand %p5242_p5, %p5230_p1  ;;  %p5250_p3 = scmp.lt.s32.totalorder %s5248_s17, %s5241_s26 }
  0x74   : > { %p5245_p10 = pneg %p5244_p8  ;;  %p5251_p9 = por %p5250_p3, %p5249_p12 }
  0x76   : > { %p5252_p6 = pnand %p5251_p9, %p5245_p10 }
  0x78   : > { %5255 = shalt.err (!%p5252_p6)
}
  0x79   : > { %4844 = dma.hbm_to_vmem [thread:$0]  (!%p5571_p11), %s5567_s1, 128, %s476_s3, %s465_s6  }
  0x7a   : > { %p5906_p4 = scmp.ne.s32.totalorder %s5891_s21, 0 }
  0x7b   : > { %s5592_s7 = sand.u32 (!%p5906_p4), 1, %s5324_s16   ;;  %p5907_p6 = scmp.ne.s32.totalorder (!%p5906_p4), %s5902_s14, 0 }
  0x7c   : > { %484 = sbr.rel (%p5906_p4) target bundleno = 2916 (0xb64), region = 76  ;;  %s4184_s19 = sshll.u32 (!%p5906_p4), %s5592_s7, 3 }
  0x7d   : > { %s487_s23 = scalar_lea.sflag (!%p5906_p4), [#allocation5], %s5592_s7  ;;  %s5598_s17 = scalar_lea.vmem (!%p5906_p4), [#allocation4], %s4184_s19 }
  0x81   : > { %5299 = dma.done.wait (%p5907_p6), %s487_s23, 128  }
  0x82   : > { %5301 = vsyncadd (%p5907_p6), %s487_s23, 4294967168  ;;  %p5908_p9 = scmp.eq.s32.totalorder %s5451_s20, 0 }
  0x84   : > { %5303 = dma.done.wait (%p5908_p9), [#allocation8], 4096   ;;  %p5909_p10 = pmov %p5908_p9 }
  0x85   : > { %p5910_p11 = pmov %p5908_p9 }
  0x86   : > { %5305 = vsyncadd (%p5909_p10), [#allocation8], 4294963200 }
  0x87   : > { %5307 = dma.done.wait (%p5910_p11), [#allocation11], 16640   ;;  %p5911_p1 = pmov %p5908_p9 }
  0x89   : > { %5309 = vsyncadd (%p5911_p1), [#allocation11], 4294950656  ;;  %p5912_p7 = pmov %p5911_p1 }
  0x8a   : > { %p5913_p13 = pmov %p5911_p1 }
  0x8b   : > { %5311 = dma.done.wait (%p5912_p7), [#allocation14], 16384  }
  0x8c   : > { %5313 = vsyncadd (%p5913_p13), [#allocation14], 4294950912  ;;  %v5345_v0 = vmov 0   ;;  %v5346_v1 = vmov 0.0   ;;  %v4909_v2 = vld [vmem:[#allocation7 + $0xac] ss:$12 sps:$4 sm:$0xff]   ;;  %v592_v28 = vlaneseq }
  0x8d   : > { %767 = vmatprep.mubr.bf16.mxu0 %v5345_v0  ;;  %4713 = vmatprep.subr.bf16.mxu1 %v5346_v1  ;;  %v4911_v3 = vld [vmem:[#allocation7 + $0xa8] ss:$12 sps:$4 sm:$0xff]   ;;  %v4914_v5 = vld [vmem:[#allocation7 + $0x90] ss:$12 sps:$4 sm:$0xff]   ;;  %v4917_v7 = vld [vmem:[#allocation7 + $0x78] ss:$12 sps:$4 sm:$0xff]  }
  0x8e   : > { %735 = vmatprep.subr.bf16.mxu0 %v4909_v2  ;;  %v4912_v4 = vld [vmem:[#allocation7 + $0x94] ss:$12 sps:$4 sm:$0xff]   ;;  %v4915_v6 = vld [vmem:[#allocation7 + $0x7c] ss:$12 sps:$4 sm:$0xff]   ;;  %v4918_v8 = vld [vmem:[#allocation7 + $0x64] ss:$12 sps:$4 sm:$0xff]  }
  0x8f   : > { %736 = vmatpush1.bf16.msra.mxu0 %v4911_v3  ;;  %v4920_v9 = vld [vmem:[#allocation7 + $0x60] ss:$12 sps:$4 sm:$0xff]   ;;  %v4933_v10 = vld [vmem:[#allocation7 + $0xb0] ss:$12 sps:$4 sm:$0xff]   ;;  %v4934_v12 = vld [vmem:[#allocation7 + $0x98] ss:$12 sps:$4 sm:$0xff]  }
  0x90   : > { %737 = vmatprep.subr.bf16.mxu0 %v4912_v4  ;;  %v4921_v11 = vld [vmem:[#allocation7 + $0x4c] ss:$12 sps:$4 sm:$0xff]   ;;  %4714 = vmatpush3.bf16.msra.mxu1 %v4933_v10  ;;  %v4923_v13 = vld [vmem:[#allocation7 + $0x48] ss:$12 sps:$4 sm:$0xff]   ;;  %v4926_v15 = vld [vmem:[#allocation7 + $0x30] ss:$12 sps:$4 sm:$0xff]  }
  0x91   : > { %4715 = vmatprep.subr.bf16.mxu1 %v5346_v1  ;;  %v4924_v14 = vld [vmem:[#allocation7 + $0x34] ss:$12 sps:$4 sm:$0xff]   ;;  %v4927_v17 = vld [vmem:[#allocation7 + $0x1c] ss:$12 sps:$4 sm:$0xff]   ;;  %v4929_v19 = vld [vmem:[#allocation7 + $0x18] ss:$12 sps:$4 sm:$0xff]  }
  0x92   : > { %v4935_v16 = vld [vmem:[#allocation7 + $0x80] ss:$12 sps:$4 sm:$0xff]   ;;  %v4936_v18 = vld [vmem:[#allocation7 + $0x68] ss:$12 sps:$4 sm:$0xff]   ;;  %v4930_v20 = vld [vmem:[#allocation7 + $0x4] ss:$12 sps:$4 sm:$0xff]  }
  0x93   : > { %738 = vmatpush1.bf16.msra.mxu0 %v4914_v5  ;;  %v4937_v21 = vld [vmem:[#allocation7 + $0x50] ss:$12 sps:$4 sm:$0xff]   ;;  %v4932_v22 = vld [vmem:[#allocation7] ss:$12 sps:$4 sm:$0xff]   ;;  %v4938_v24 = vld [vmem:[#allocation7 + $0x38] ss:$12 sps:$4 sm:$0xff]  }
  0x94   : > { %739 = vmatprep.subr.bf16.mxu0 %v4915_v6  ;;  %4716 = vmatpush3.bf16.msra.mxu1 %v4934_v12  ;;  %v556_v23 = vld [vmem:[%s5598_s17] sm:$0xff]  ;;  %v4939_v26 = vld [vmem:[#allocation7 + $0x20] ss:$12 sps:$4 sm:$0xff]   ;;  %vm5347_vm0 = vmmov 0   ;;  %v5634_v29 = vshrl.u32 %v592_v28, 7  ;;  %vm819_vm1 = vcmask 261120  }
  0x95   : > { %4717 = vmatprep.subr.bf16.mxu1 %v5346_v1  ;;  %v557_v25 = vpack.c.bf16 %v556_v23, %v556_v23  ;;  %v4940_v27 = vld [vmem:[#allocation7 + $0x8] ss:$12 sps:$4 sm:$0xff]   ;;  %4729 = vmatprep.mubr.msk.bf16.mxu1 %vm5347_vm0, %v5346_v1  ;;  %v590_v31 = vld [vmem:[%s5865_s2] sm:$0x7]  ;;  %s5348_s5 = smov 96   ;;  %s5349_s6 = smov 64  }
  0x96   : > { %v5637_v30 = vsub.s32 0, %v5634_v29  ;;  %v5643_v32 = vsub.s32 1, %v5634_v29  ;;  %s5350_s21 = smov 32   ;;  %v5658_v44 = vsub.s32 2, %v5634_v29  ;;  %vm881_vm2 = vcmask 1043456   ;;  %s4032_s1 = sld [smem:[#allocation3]] }
  0x97   : > { %740 = vmatpush1.bf16.msra.mxu0 %v4917_v7  ;;  %vm866_vm3 = vcmask 64512   ;;  %vm927_vm4 = vcmask 257024   ;;  %vm1049_vm5 = vcmask 519424   ;;  %vm1168_vm6 = vcmask 781824   ;;  %s4497_s28 = sshll.u32 %s5451_s20, 7  ;;  %s554_s30 = scalar_lea.vmem [#allocation15], %s4184_s19 }
  0x98   : > { %741 = vmatprep.subr.bf16.mxu0 %v4918_v8  ;;  %4718 = vmatpush3.bf16.msra.mxu1 %v4935_v16  ;;  %v595_v33 = vrot.slane %v590_v31, %v5637_v30  ;;  %v599_v34 = vrot.slane %v590_v31, %v5643_v32  ;;  %v603_v45 = vrot.slane %v590_v31, %v5658_v44  ;;  %vm1287_vm7 = vcmask 1044224   ;;  %s4055_s24 = sshll.u32 %s554_s30, 4  ;;  %s5914_s13 = sld [smem:[#allocation28_spill]]  ;;  %s4056_s24 = int_to_ptr.vmem [resolvable:$true] %s4055_s24 }
  0x99   : > { %4719 = vmatprep.subr.bf16.mxu1 %v5346_v1  ;;  %p5915_p2 = scmp.ne.s32.totalorder %s5903_s29, 0 }
  0x9b   : > { %742 = vmatpush1.bf16.msra.mxu0 %v4920_v9 }
  0x9c   : > { %743 = vmatprep.subr.bf16.mxu0 %v4921_v11  ;;  %4720 = vmatpush3.bf16.msra.mxu1 %v4936_v18  ;;  %s4035_s3 = ssub.f32 1.0, %s4032_s1 }
  0x9d   : > { %4721 = vmatprep.subr.bf16.mxu1 %v5346_v1 }
  0x9e   : > { %s4053_s23 = scalar_lea.hbm %s5914_s13, %s4497_s28 }
  0x9f   : > { %744 = vmatpush1.bf16.msra.mxu0 %v4923_v13 }
  0xa0   : > { %745 = vmatprep.subr.bf16.mxu0 %v4924_v14  ;;  %4722 = vmatpush3.bf16.msra.mxu1 %v4937_v21 }
  0xa1   : > { %4723 = vmatprep.subr.bf16.mxu1 %v5346_v1 }
  0xa3   : > { %746 = vmatpush1.bf16.msra.mxu0 %v4926_v15 }
  0xa4   : > { %747 = vmatprep.subr.bf16.mxu0 %v4927_v17  ;;  %4724 = vmatpush3.bf16.msra.mxu1 %v4938_v24 }
  0xa5   : > { %4725 = vmatprep.subr.bf16.mxu1 %v5346_v1 }
  0xa7   : > { %748 = vmatpush1.bf16.msra.mxu0 %v4929_v19 }
  0xa8   : > { %749 = vmatprep.subr.bf16.mxu0 %v4930_v20  ;;  %4726 = vmatpush3.bf16.msra.mxu1 %v4939_v26 }
  0xa9   : > { %4727 = vmatprep.subr.bf16.mxu1 %v5346_v1 }
  0xab   : > { %750 = vmatpush1.bf16.msra.mxu0 %v4932_v22 }
  0xac   : > { %4757 = vmatprep.subr.bf16.mxu0 %v5346_v1  ;;  %4728 = vmatpush3.bf16.msra.mxu1 %v4940_v27 }
  0xad   : > { %4733 = vmatprep.subr.bf16.mxu1 %v5346_v1 }
  0xae   : > { %768 = vmatmul.mubr.bf16.vlgmr.msra.gmra.mxu0 %v557_v25 }
  0xaf   : > { %4759 = vmatprep.mubr.msk.bf16.mxu0 %vm5347_vm0, %v5346_v1  ;;  %4730 = vmatmul.mubr.bf16.vlgmr.msra.gmra.mxu1 %v557_v25 }
  0xb0   : > { %4735 = vmatprep.mubr.msk.bf16.mxu1 %vm5347_vm0, %v5346_v1 }
 0x16e   : > { %v769_v35 = vpop.f32.mrf.mxu0 }
 0x16f   : > { %v770_v36 = vadd.f32 %v769_v35, %v595_v33  ;;  %v810_v46 = vpop.f32.mrf.mxu1 }
 0x170   : > { %v771_v37 = vpop.f32.mrf.mxu0  ;;  %v811_v47 = vadd.f32 %v810_v46, %v603_v45 }
 0x171   : > { %v816_v38 = vpack.c.bf16 %v770_v36, %v770_v36  ;;  %v772_v39 = vadd.f32 %v771_v37, %v599_v34  ;;  %v4731_v48 = vpop.f32.mrf.mxu1 }
 0x172   : > { %v773_v40 = vpop.f32.mrf.mxu0  ;;  %v5661_v49 = vpack.c.bf16 %v811_v47, %v811_v47 }
 0x173   : > { %v817_v41 = vpack.c.bf16 %v772_v39, %v772_v39  ;;  %930 = vrot.lane.b32.xlu1 %v816_v38, %s5348_s5  ;;  %v813_v50 = vpop.f32.mrf.mxu1 }
 0x174   : > { %v774_v42 = vpop.f32.mrf.mxu0  ;;  %v883_v51 = vsel %vm881_vm2, %v5661_v49, 0 }
 0x175   : > { %v824_v43 = vsel %vm819_vm1, %v817_v41, 0  ;;  %v4732_v52 = vpop.f32.mrf.mxu1 }
 0x176   : > { %4734 = vmatpush3.bf16.xpose.msra.mxu1 %v824_v43 }
 0x177   : > { %1053 = vrot.lane.b32.xlu1 %v817_v41, %s5349_s6  ;;  %4739 = vmatprep.subr.bf16.mxu1 %v5346_v1 }
 0x17b   : > { %1051 = vrot.lane.b32.xlu1 %v816_v38, %s5349_s6 }
 0x17d   : > { %4736 = vmatmul.mubr.msk.bf16.vlgmr.msra.gmra.mxu1 %vm819_vm1, %v816_v38 }
 0x17e   : > { %4741 = vmatprep.mubr.msk.bf16.mxu1 %vm5347_vm0, %v5346_v1  ;;  %4740 = vmatpush3.bf16.msra.mxu1 %v883_v51 }
 0x17f   : > { %1172 = vrot.lane.b32.xlu1 %v817_v41, %s5350_s21  ;;  %4745 = vmatprep.subr.bf16.mxu1 %v5346_v1 }
 0x183   : > { %1170 = vrot.lane.b32.xlu1 %v816_v38, %s5350_s21 }
 0x1e5   : > { %v931_v53 = vpop.permute.xlu1 %930 }
 0x1e9   : > { %v1054_v54 = vpop.permute.xlu1 %1053 }
 0x1ea   : > { %v1059_v55 = vsel %vm819_vm1, %v1054_v54, 0 }
 0x1eb   : > { %4758 = vmatpush3.bf16.xpose.msra.mxu0 %v1059_v55 }
 0x1ec   : > { %4769 = vmatprep.subr.bf16.mxu0 %v5346_v1 }
 0x1ed   : > { %v1052_v56 = vpop.permute.xlu1 %1051 }
 0x1f1   : > { %v1173_v57 = vpop.permute.xlu1 %1172 }
 0x1f2   : > { %v1178_v58 = vsel %vm819_vm1, %v1173_v57, 0  ;;  %4760 = vmatmul.mubr.msk.bf16.vlgmr.msra.gmra.mxu0 %vm819_vm1, %v1052_v56 }
 0x1f3   : > { %4770 = vmatpush3.bf16.xpose.msra.mxu0 %v1178_v58  ;;  %4771 = vmatprep.mubr.msk.bf16.mxu0 %vm5347_vm0, %v5346_v1  ;;  %v4941_v58 = vld [vmem:[#allocation9 + $0x38] sm:$0xff]  }
 0x1f4   : > { %4781 = vmatprep.subr.bf16.mxu0 %v5346_v1 }
 0x1f5   : > { %v1171_v59 = vpop.permute.xlu1 %1170 }
 0x1fa   : > { %4772 = vmatmul.mubr.msk.bf16.vlgmr.msra.gmra.mxu0 %vm819_vm1, %v1171_v59  ;;  %v4942_v59 = vld [vmem:[#allocation9 + $0x30] sm:$0xff]  }
 0x1fb   : > { %4797 = vmatprep.mubr.msk.bf16.mxu0 %vm5347_vm0, %v5346_v1  ;;  %4782 = vmatpush3.bf16.msra.mxu0 %v4941_v58  ;;  %v1457_v58 = vld [vmem:[#allocation10 + $0x308] sm:$0xff] }
 0x1fc   : > { %4783 = vmatprep.subr.bf16.mxu0 %v5346_v1 }
 0x1ff   : > { %4784 = vmatpush3.bf16.msra.mxu0 %v4942_v59 }
 0x200   : > { %4785 = vmatprep.subr.bf16.mxu0 %v5346_v1 }
 0x23d   : > { %v860_v60 = vpop.f32.mrf.mxu1 }
 0x23e   : > { %v867_v61 = vsel %vm866_vm3, %v860_v60, -inf }
 0x23f   : > { %868 = vmax.xlane.f32.xlu0 %v867_v61  ;;  %v4737_v62 = vpop.f32.mrf.mxu1 }
 0x241   : > { %v863_v63 = vpop.f32.mrf.mxu1 }
 0x243   : > { %v4738_v2 = vpop.f32.mrf.mxu1 }
 0x255   : > { %933 = vrot.lane.b32.xlu0 %v817_v41, %s5348_s5 }
 0x2b2   : > { %v1095_v3 = vpop.f32.mrf.mxu0 }
 0x2b3   : > { %v1101_v4 = vsel %vm866_vm3, %v1095_v3, -inf }
 0x2b4   : > { %v4761_v5 = vpop.f32.mrf.mxu0  ;;  %1102 = vmax.xlane.f32.xlu0 %v1101_v4 }
 0x2b5   : > { %v4943_v5 = vld [vmem:[#allocation9 + $0x28] sm:$0xff]  }
 0x2b6   : > { %v1098_v6 = vpop.f32.mrf.mxu0  ;;  %4786 = vmatpush3.bf16.msra.mxu0 %v4943_v5 }
 0x2b7   : > { %v4944_v6 = vld [vmem:[#allocation9 + $0x20] sm:$0xff]   ;;  %4787 = vmatprep.subr.bf16.mxu0 %v5346_v1 }
 0x2b8   : > { %v4762_v7 = vpop.f32.mrf.mxu0 }
 0x2ba   : > { %v1214_v8 = vpop.f32.mrf.mxu0  ;;  %4788 = vmatpush3.bf16.msra.mxu0 %v4944_v6  ;;  %v1455_v6 = vld [vmem:[#allocation10 + $0x2c8] sm:$0xff] }
 0x2bb   : > { %v1220_v9 = vsel %vm866_vm3, %v1214_v8, -inf  ;;  %4789 = vmatprep.subr.bf16.mxu0 %v5346_v1 }
 0x2bc   : > { %1221 = vmax.xlane.f32.xlu1 %v1220_v9  ;;  %v4773_v10 = vpop.f32.mrf.mxu0  ;;  %v4945_v9 = vld [vmem:[#allocation9 + $0x18] sm:$0xff]  }
 0x2be   : > { %v1217_v11 = vpop.f32.mrf.mxu0  ;;  %4790 = vmatpush3.bf16.msra.mxu0 %v4945_v9 }
 0x2bf   : > { %4791 = vmatprep.subr.bf16.mxu0 %v5346_v1 }
 0x2c0   : > { %v4774_v12 = vpop.f32.mrf.mxu0 }
 0x2c1   : > { %v4946_v12 = vld [vmem:[#allocation9 + $0x10] sm:$0xff]  }
 0x2c2   : > { %4792 = vmatpush3.bf16.msra.mxu0 %v4946_v12  ;;  %v1449_v12 = vld [vmem:[#allocation10 + $0x208] sm:$0xff] }
 0x2c3   : > { %4793 = vmatprep.subr.bf16.mxu0 %v5346_v1 }
 0x2c8   : > { %v869_v13 = vpop.xlane.xlu0 %868 }
 0x2c9   : > { %v870_v14 = vsub.f32 %v860_v60, %v869_v13 }
 0x2ca   : > { %993 = vrot.lane.b32.xlu0 %v5661_v49, %s5348_s5 }
 0x2cb   : > { %v871_v15 = vmul.f32 1.442695, %v870_v14 }
 0x2cc   : > { %v934_v17 = vpop.permute.xlu0 %933 }
 0x2cd   : > { %5077 = vpow2.f32 %v871_v15  ;;  %v939_v19 = vsel %vm819_vm1, %v934_v17, 0 }
 0x2da   : > { %v5078_v16 = vpop.eup %5077 }
 0x2db   : > { %v877_v18 = vpack.c.bf16 %v5078_v16, %v5078_v16  ;;  %v873_v54 = vsel %vm866_vm3, %v5078_v16, 0.0 }
 0x2dd   : > { %4742 = vmatmul.mubr.msk.bf16.vlgmr.msra.gmra.mxu1 %vm866_vm3, %v877_v18  ;;  %v4947_v18 = vld [vmem:[#allocation9 + $0x8] sm:$0xff]  }
 0x2de   : > { %4746 = vmatpush3.bf16.xpose.msra.mxu1 %v939_v19  ;;  %4747 = vmatprep.mubr.msk.bf16.mxu1 %vm5347_vm0, %v5346_v1 }
 0x2df   : > { %4751 = vmatprep.subr.bf16.mxu1 %v5346_v1  ;;  %4794 = vmatpush3.bf16.msra.mxu0 %v4947_v18  ;;  %v1444_v18 = vld [vmem:[#allocation10 + $0x180] sm:$0xff] }
 0x2e0   : > { %4795 = vmatprep.subr.bf16.mxu0 %v5346_v1 }
 0x2e5   : > { %4748 = vmatmul.mubr.msk.bf16.vlgmr.msra.gmra.mxu1 %vm819_vm1, %v931_v53 }
 0x2e6   : > { %4753 = vmatprep.mubr.msk.bf16.mxu1 %vm5347_vm0, %v5346_v1 }
 0x33d   : > { %v1103_v20 = vpop.xlane.xlu0 %1102 }
 0x33e   : > { %v1104_v35 = vsub.f32 %v1095_v3, %v1103_v20 }
 0x340   : > { %v1105_v36 = vmul.f32 1.442695, %v1104_v35 }
 0x341   : > { %v994_v21 = vpop.permute.xlu0 %993 }
 0x342   : > { %v999_v22 = vsel %vm881_vm2, %v994_v21, 0  ;;  %5079 = vpow2.f32 %v1105_v36  ;;  %v4948_v21 = vld [vmem:[#allocation9] sm:$0xff]  }
 0x343   : > { %4752 = vmatpush3.bf16.msra.mxu1 %v999_v22  ;;  %4796 = vmatpush3.bf16.msra.mxu0 %v4948_v21 }
 0x344   : > { %4763 = vmatprep.subr.bf16.mxu1 %v5346_v1 }
 0x345   : > { %v1222_v39 = vpop.xlane.xlu1 %1221 }
 0x346   : > { %v1223_v40 = vsub.f32 %v1214_v8, %v1222_v39  ;;  %v1462_v39 = vld [vmem:[#allocation10 + $0x3c0] sm:$0xff] }
 0x348   : > { %v1224_v43 = vmul.f32 1.442695, %v1223_v40  ;;  %v1461_v40 = vld [vmem:[#allocation10 + $0x388] sm:$0xff] }
 0x34f   : > { %v5080_v37 = vpop.eup %5079 }
 0x350   : > { %v1107_v38 = vsel %vm866_vm3, %v5080_v37, 0.0  ;;  %v1111_v55 = vpack.c.bf16 %v5080_v37, %v5080_v37 }
 0x39d   : > { %v919_v23 = vpop.f32.mrf.mxu1 }
 0x39f   : > { %v4743_v24 = vpop.f32.mrf.mxu1 }
 0x3a1   : > { %v922_v25 = vpop.f32.mrf.mxu1 }
 0x3a3   : > { %v4744_v26 = vpop.f32.mrf.mxu1 }
 0x3a5   : > { %v975_v27 = vpop.f32.mrf.mxu1 }
 0x3a6   : > { %v981_v28 = vsel %vm866_vm3, %v975_v27, -inf }
 0x3a7   : > { %982 = vmax.xlane.f32.xlu1 %v981_v28  ;;  %v4749_v31 = vpop.f32.mrf.mxu1 }
 0x3a9   : > { %v978_v33 = vpop.f32.mrf.mxu1 }
 0x3ab   : > { %v4750_v34 = vpop.f32.mrf.mxu1 }
 0x3b8   : > { %1112 = vrot.lane.b32.xlu1 %v5661_v49, %s5349_s6 }
 0x3bc   : > { %1231 = vrot.lane.b32.xlu1 %v5661_v49, %s5350_s21 }
 0x3e0   : > { %1108 = vadd.xlane.f32.xlu1 %v1107_v38  ;;  %v1460_v38 = vld [vmem:[#allocation10 + $0x380] sm:$0xff] }
 0x430   : > { %v983_v41 = vpop.xlane.xlu1 %982 }
 0x431   : > { %v984_v42 = vsub.f32 %v975_v27, %v983_v41  ;;  %v4265_v41 = vcombine.low %v1460_v38, %v1462_v39 }
 0x433   : > { %v985_v45 = vmul.f32 1.442695, %v984_v42  ;;  %v4266_v42 = vcombine.high %v1460_v38, %v1462_v39  ;;  %v1437_v38 = vld [vmem:[#allocation10 + $0x88] sm:$0xff] }
 0x434   : > { %v1113_v47 = vpop.permute.xlu1 %1112 }
 0x435   : > { %5081 = vpow2.f32 %v985_v45  ;;  %v1118_v51 = vsel %vm881_vm2, %v1113_v47, 0  ;;  %v4226_v47 = vld [vmem:[%s5867_s4] ss:$0 sm:$0xff] }
 0x436   : > { %5083 = vpow2.f32 %v1224_v43  ;;  %v1463_v43 = vld [vmem:[#allocation10 + $0x3c8] sm:$0xff] }
 0x437   : > { %v4267_v45 = vcombine.low %v1461_v40, %v1463_v43 }
 0x438   : > { %v1232_v53 = vpop.permute.xlu1 %1231 }
 0x439   : > { %v1237_v56 = vsel %vm881_vm2, %v1232_v53, 0 }
 0x442   : > { %v5082_v46 = vpop.eup %5081 }
 0x443   : > { %v987_v48 = vsel %vm866_vm3, %v5082_v46, 0.0  ;;  %v991_v49 = vpack.c.bf16 %v5082_v46, %v5082_v46  ;;  %v5084_v50 = vpop.eup %5083  ;;  %v4268_v46 = vcombine.high %v1461_v40, %v1463_v43  ;;  %v1439_v40 = vld [vmem:[#allocation10 + $0xc8] sm:$0xff] }
 0x444   : > { %988 = vadd.xlane.f32.xlu0 %v987_v48  ;;  %v1226_v52 = vsel %vm866_vm3, %v5084_v50, 0.0  ;;  %v1230_v57 = vpack.c.bf16 %v5084_v50, %v5084_v50  ;;  %v4244_v43 = vcombine.high %v1437_v38, %v1439_v40 }
 0x445   : > { %4754 = vmatmul.mubr.msk.bf16.vlgmr.msra.gmra.mxu1 %vm866_vm3, %v991_v49  ;;  %1687 = vmatprep.subr.bf16.mxu0 %v4268_v46  ;;  %v1434_v46 = vld [vmem:[#allocation10 + $0x40] sm:$0xff] }
 0x446   : > { %4764 = vmatpush3.bf16.msra.mxu1 %v1118_v51  ;;  %4765 = vmatprep.mubr.msk.bf16.mxu1 %vm5347_vm0, %v5346_v1  ;;  %v5097_v51 = vld [vmem:[%s5598_s17] sm:$0xff] }
 0x447   : > { %4775 = vmatprep.subr.bf16.mxu1 %v5346_v1 }
 0x448   : > { %1227 = vadd.xlane.f32.xlu0 %v1226_v52 }
 0x44c   : > { %874 = vadd.xlane.f32.xlu0 %v873_v54 }
 0x44d   : > { %4766 = vmatmul.mubr.msk.bf16.vlgmr.msra.gmra.mxu1 %vm866_vm3, %v1111_v55 }
 0x44e   : > { %4776 = vmatpush3.bf16.msra.mxu1 %v1237_v56  ;;  %4777 = vmatprep.mubr.msk.bf16.mxu1 %vm5347_vm0, %v5346_v1  ;;  %v1456_v56 = vld [vmem:[#allocation10 + $0x300] sm:$0xff] }
 0x44f   : > { %1646 = vmatprep.subr.bf16.mxu1 %v4266_v42  ;;  %v4243_v42 = vcombine.low %v1437_v38, %v1439_v40  ;;  %v1812_v38 = vld [vmem:[#allocation10 + $0x190] sm:$0xff]  ;;  %v1813_v40 = vld [vmem:[#allocation10 + $0x198] sm:$0xff] }
 0x455   : > { %4778 = vmatmul.mubr.msk.bf16.vlgmr.msra.gmra.mxu1 %vm866_vm3, %v1230_v57  ;;  %v1458_v57 = vld [vmem:[#allocation10 + $0x340] sm:$0xff] }
 0x456   : > { %1678 = vmatprep.mubr.bf16.mxu1 %v5345_v0  ;;  %1647 = vmatpush1.bf16.msra.mxu1 %v4265_v41  ;;  %v4262_v59 = vcombine.high %v1456_v56, %v1458_v57 }
 0x458   : > { %1648 = vmatprep.subr.bf16.mxu1 %v4262_v59  ;;  %v1831_v59 = vld [vmem:[#allocation10 + $0x3d8] sm:$0xff] }
 0x469   : > { %v1109_v4 = vpop.xlane.xlu1 %1108 }
 0x4cd   : > { %v989_v60 = vpop.xlane.xlu0 %988 }
 0x4d1   : > { %v1228_v61 = vpop.xlane.xlu0 %1227 }
 0x4d5   : > { %v875_v62 = vpop.xlane.xlu0 %874 }
 0x4d6   : > { %5085 = vrcp.f32 %v875_v62 }
 0x4d7   : > { %5087 = vrcp.f32 %v989_v60  ;;  %v1459_v60 = vld [vmem:[#allocation10 + $0x348] sm:$0xff] }
 0x4d8   : > { %5089 = vrcp.f32 %v1109_v4  ;;  %v4263_v62 = vcombine.low %v1457_v58, %v1459_v60  ;;  %v1453_v4 = vld [vmem:[#allocation10 + $0x288] sm:$0xff] }
 0x4d9   : > { %5091 = vrcp.f32 %v1228_v61  ;;  %v4261_v61 = vcombine.low %v1456_v56, %v1458_v57  ;;  %v4260_v9 = vcombine.high %v1453_v4, %v1455_v6  ;;  %v1829_v56 = vld [vmem:[#allocation10 + $0x398] sm:$0xff] }
 0x4db   : > { %1649 = vmatpush1.bf16.msra.mxu1 %v4261_v61  ;;  %v4300_v61 = vcombine.high %v1829_v56, %v1831_v59 }
 0x4e3   : > { %v5086_v63 = vpop.eup %5085 }
 0x4e4   : > { %v925_v2 = vmul.f32 %v5086_v63, %v919_v23  ;;  %v5088_v7 = vpop.eup %5087  ;;  %v4264_v63 = vcombine.high %v1457_v58, %v1459_v60  ;;  %v4299_v60 = vcombine.low %v1829_v56, %v1831_v59  ;;  %v1804_v56 = vld [vmem:[#allocation10 + $0x90] sm:$0xff]  ;;  %v1807_v59 = vld [vmem:[#allocation10 + $0xd8] sm:$0xff] }
 0x4e5   : > { %v5090_v16 = vpop.eup %5089 }
 0x4e6   : > { %v926_v3 = vpack.c.bf16 %v925_v2, %v925_v2  ;;  %v5092_v25 = vpop.eup %5091  ;;  %v1452_v2 = vld [vmem:[#allocation10 + $0x280] sm:$0xff] }
 0x4e8   : > { %928 = vst.msk [vmem:[#allocation2] sm:$0xf] %vm927_vm4, %v926_v3  ;;  %v1454_v3 = vld [vmem:[#allocation10 + $0x2c0] sm:$0xff] }
 0x4e9   : > { %v4258_v5 = vcombine.high %v1452_v2, %v1454_v3 }
 0x4eb   : > { %1650 = vmatprep.subr.bf16.mxu1 %v4258_v5 }
 0x505   : > { %v1035_v8 = vpop.f32.mrf.mxu1 }
 0x506   : > { %v1041_v10 = vmul.f32 %v5088_v7, %v1035_v8  ;;  %v4257_v7 = vcombine.low %v1452_v2, %v1454_v3  ;;  %v4259_v8 = vcombine.low %v1453_v4, %v1455_v6 }
 0x507   : > { %v4755_v11 = vpop.f32.mrf.mxu1 }
 0x508   : > { %v4500_v13 = vpack.c.bf16 %v1041_v10, %v1041_v10  ;;  %1651 = vmatpush1.bf16.msra.mxu1 %v4257_v7  ;;  %v1448_v10 = vld [vmem:[#allocation10 + $0x200] sm:$0xff] }
 0x509   : > { %v1038_v14 = vpop.f32.mrf.mxu1  ;;  %v1450_v11 = vld [vmem:[#allocation10 + $0x240] sm:$0xff] }
 0x50a   : > { %1046 = vrot.lane.b32.xlu1 %v4500_v13, %s5350_s21  ;;  %v4254_v13 = vcombine.high %v1448_v10, %v1450_v11  ;;  %v1451_v14 = vld [vmem:[#allocation10 + $0x248] sm:$0xff] }
 0x50b   : > { %v4756_v15 = vpop.f32.mrf.mxu1 }
 0x50c   : > { %v4253_v15 = vcombine.low %v1448_v10, %v1450_v11  ;;  %1652 = vmatprep.subr.bf16.mxu1 %v4254_v13  ;;  %v4236_v11 = vld [vmem:[%s5873_s10] ss:$0 sm:$0xff]  ;;  %v1824_v13 = vld [vmem:[#allocation10 + $0x310] sm:$0xff] }
 0x50d   : > { %v1154_v17 = vpop.f32.mrf.mxu1 }
 0x50e   : > { %v1160_v19 = vmul.f32 %v5090_v16, %v1154_v17  ;;  %v4255_v16 = vcombine.low %v1449_v12, %v1451_v14  ;;  %v4256_v17 = vcombine.high %v1449_v12, %v1451_v14  ;;  %1653 = vmatpush1.bf16.msra.mxu1 %v4253_v15  ;;  %v1826_v14 = vld [vmem:[#allocation10 + $0x350] sm:$0xff]  ;;  %v1825_v15 = vld [vmem:[#allocation10 + $0x318] sm:$0xff] }
 0x50f   : > { %v4767_v20 = vpop.f32.mrf.mxu1 }
 0x510   : > { %v4501_v22 = vpack.c.bf16 %v1160_v19, %v1160_v19  ;;  %v1446_v19 = vld [vmem:[#allocation10 + $0x1c0] sm:$0xff]  ;;  %v1445_v20 = vld [vmem:[#allocation10 + $0x188] sm:$0xff] }
 0x511   : > { %v1157_v23 = vpop.f32.mrf.mxu1  ;;  %v4250_v21 = vcombine.high %v1444_v18, %v1446_v19 }
 0x512   : > { %1165 = vrot.lane.b32.xlu0 %v4501_v22, %s5349_s6  ;;  %v1447_v22 = vld [vmem:[#allocation10 + $0x1c8] sm:$0xff]  ;;  %v4249_v23 = vcombine.low %v1444_v18, %v1446_v19  ;;  %v4294_v18 = vcombine.high %v1824_v13, %v1826_v14 }
 0x513   : > { %v4768_v24 = vpop.f32.mrf.mxu1  ;;  %1654 = vmatprep.subr.bf16.mxu1 %v4250_v21  ;;  %v1822_v21 = vld [vmem:[#allocation10 + $0x2d0] sm:$0xff] }
 0x514   : > { %v4251_v24 = vcombine.low %v1445_v20, %v1447_v22  ;;  %1655 = vmatpush1.bf16.msra.mxu1 %v4249_v23  ;;  %v1823_v23 = vld [vmem:[#allocation10 + $0x2d8] sm:$0xff] }
 0x515   : > { %v1273_v26 = vpop.f32.mrf.mxu1 }
 0x516   : > { %v1279_v27 = vmul.f32 %v5092_v25, %v1273_v26  ;;  %v4252_v25 = vcombine.high %v1445_v20, %v1447_v22  ;;  %v1440_v26 = vld [vmem:[#allocation10 + $0x100] sm:$0xff]  ;;  %v1820_v20 = vld [vmem:[#allocation10 + $0x290] sm:$0xff]  ;;  %v1821_v22 = vld [vmem:[#allocation10 + $0x298] sm:$0xff] }
 0x517   : > { %v4779_v28 = vpop.f32.mrf.mxu1 }
 0x518   : > { %v4502_v31 = vpack.c.bf16 %v1279_v27, %v1279_v27  ;;  %v1442_v27 = vld [vmem:[#allocation10 + $0x140] sm:$0xff]  ;;  %v1441_v28 = vld [vmem:[#allocation10 + $0x108] sm:$0xff] }
 0x519   : > { %v1276_v33 = vpop.f32.mrf.mxu1 }
 0x51a   : > { %1284 = vrot.lane.b32.xlu1 %v4502_v31, %s5348_s5  ;;  %v4246_v31 = vcombine.high %v1440_v26, %v1442_v27  ;;  %v1443_v33 = vld [vmem:[#allocation10 + $0x148] sm:$0xff]  ;;  %s4042_s5 = scalar_lea.sflag [#allocation6], %s5592_s7 }
 0x51b   : > { %v4780_v34 = vpop.f32.mrf.mxu1 }
 0x51c   : > { %v4245_v34 = vcombine.low %v1440_v26, %v1442_v27  ;;  %1656 = vmatprep.subr.bf16.mxu1 %v4246_v31  ;;  %v4290_v26 = vcombine.high %v1820_v20, %v1822_v21  ;;  %v4292_v27 = vcombine.high %v1821_v22, %v1823_v23  ;;  %v1818_v31 = vld [vmem:[#allocation10 + $0x250] sm:$0xff] }
 0x51e   : > { %1657 = vmatpush1.bf16.msra.mxu1 %v4245_v34  ;;  %v1819_v34 = vld [vmem:[#allocation10 + $0x258] sm:$0xff] }
 0x57c   : > { %v1047_v35 = vpop.permute.xlu1 %1046 }
 0x57d   : > { %1050 = vst.msk [vmem:[#allocation2] sm:$0xf] %vm1049_vm5, %v1047_v35  ;;  %v4247_v35 = vcombine.low %v1441_v28, %v1443_v33 }
 0x584   : > { %v1166_v36 = vpop.permute.xlu0 %1165 }
 0x585   : > { %1169 = vst.msk [vmem:[#allocation2] sm:$0xf] %vm1168_vm6, %v1166_v36  ;;  %v4248_v36 = vcombine.high %v1441_v28, %v1443_v33  ;;  %v1816_v28 = vld [vmem:[#allocation10 + $0x210] sm:$0xff]  ;;  %v1817_v33 = vld [vmem:[#allocation10 + $0x218] sm:$0xff] }
 0x58c   : > { %v1285_v1 = vpop.permute.xlu1 %1284 }
 0x58d   : > { %1288 = vst.msk [vmem:[#allocation2] sm:$0xf] %vm1287_vm7, %v1285_v1  ;;  %v1436_v1 = vld [vmem:[#allocation10 + $0x80] sm:$0xff] }
 0x594   : > { %v1289_v37 = vld [vmem:[#allocation2] sm:$0xf] }
 0x595   : > { %4798 = vmatmul.mubr.bf16.vlgmr.msra.gmra.mxu0 %v1289_v37  ;;  %v1438_v37 = vld [vmem:[#allocation10 + $0xc0] sm:$0xff] }
 0x596   : > { %1719 = vmatprep.mubr.bf16.mxu0 %v5345_v0  ;;  %1688 = vmatpush1.bf16.msra.mxu0 %v4267_v45  ;;  %v4242_v39 = vcombine.high %v1436_v1, %v1438_v37  ;;  %v4241_v41 = vcombine.low %v1436_v1, %v1438_v37  ;;  %v1432_v45 = vld [vmem:[#allocation10] sm:$0xff]  ;;  %v4286_v1 = vcombine.high %v1816_v28, %v1818_v31 }
 0x597   : > { %1689 = vmatprep.subr.bf16.mxu0 %v4264_v63  ;;  %v4288_v37 = vcombine.high %v1817_v33, %v1819_v34 }
 0x598   : > { %1658 = vmatprep.subr.bf16.mxu1 %v4242_v39  ;;  %v1814_v39 = vld [vmem:[#allocation10 + $0x1d0] sm:$0xff] }
 0x599   : > { %1659 = vmatpush1.bf16.msra.mxu1 %v4241_v41  ;;  %v1815_v41 = vld [vmem:[#allocation10 + $0x1d8] sm:$0xff] }
 0x59a   : > { %1690 = vmatpush1.bf16.msra.mxu0 %v4263_v62 }
 0x59b   : > { %1691 = vmatprep.subr.bf16.mxu0 %v4260_v9  ;;  %v4235_v9 = vld [vmem:[%s5872_s9] ss:$0 sm:$0xff] }
 0x59e   : > { %1692 = vmatpush1.bf16.msra.mxu0 %v4259_v8 }
 0x59f   : > { %1693 = vmatprep.subr.bf16.mxu0 %v4256_v17 }
 0x5a2   : > { %1694 = vmatpush1.bf16.msra.mxu0 %v4255_v16  ;;  %v1827_v16 = vld [vmem:[#allocation10 + $0x358] sm:$0xff] }
 0x5a3   : > { %1695 = vmatprep.subr.bf16.mxu0 %v4252_v25  ;;  %v4296_v19 = vcombine.high %v1825_v15, %v1827_v16  ;;  %v4295_v25 = vcombine.low %v1825_v15, %v1827_v16  ;;  %v4952_v15 = vld [vmem:[#allocation13 + $0x1b8] sm:$0xff]   ;;  %v4953_v16 = vld [vmem:[#allocation13 + $0x170] sm:$0xff]  }
 0x5a6   : > { %1696 = vmatpush1.bf16.msra.mxu0 %v4251_v24  ;;  %v4293_v24 = vcombine.low %v1824_v13, %v1826_v14  ;;  %v4950_v13 = vld [vmem:[#allocation13 + $0x1f8] sm:$0xff]  }
 0x5a7   : > { %1697 = vmatprep.subr.bf16.mxu0 %v4248_v36  ;;  %v4291_v36 = vcombine.low %v1821_v22, %v1823_v23  ;;  %v4951_v14 = vld [vmem:[#allocation13 + $0x138] sm:$0xff]   ;;  %v4958_v22 = vld [vmem:[#allocation13 + $0x1e8] sm:$0xff]  }
 0x5a8   : > { %v4959_v23 = vld [vmem:[#allocation13 + $0x128] sm:$0xff]  }
 0x5aa   : > { %1698 = vmatpush1.bf16.msra.mxu0 %v4247_v35  ;;  %v4289_v35 = vcombine.low %v1820_v20, %v1822_v21  ;;  %v4956_v20 = vld [vmem:[#allocation13 + $0x1b0] sm:$0xff]   ;;  %v4957_v21 = vld [vmem:[#allocation13 + $0x168] sm:$0xff]  }
 0x5ab   : > { %1699 = vmatprep.subr.bf16.mxu0 %v4244_v43  ;;  %v4287_v43 = vcombine.low %v1817_v33, %v1819_v34  ;;  %v4966_v33 = vld [vmem:[#allocation13 + $0x1d8] sm:$0xff]  }
 0x5ac   : > { %v4967_v34 = vld [vmem:[#allocation13 + $0x118] sm:$0xff]  }
 0x5ae   : > { %1700 = vmatpush1.bf16.msra.mxu0 %v4243_v42  ;;  %v4285_v42 = vcombine.low %v1816_v28, %v1818_v31  ;;  %v4964_v28 = vld [vmem:[#allocation13 + $0x1a0] sm:$0xff]   ;;  %v4965_v31 = vld [vmem:[#allocation13 + $0x158] sm:$0xff]  }
 0x655   : > { %v1395_v48 = vpop.f32.mrf.mxu0 }
 0x656   : > { %v1396_v49 = vadd.f32 %v4226_v47, %v1395_v48  ;;  %v1433_v47 = vld [vmem:[#allocation10 + $0x8] sm:$0xff]  ;;  %v4238_v48 = vcombine.high %v1432_v45, %v1434_v46 }
 0x657   : > { %v4799_v50 = vpop.f32.mrf.mxu0 }
 0x658   : > { %v5727_v52 = vadd.f32 %v5097_v51, %v1396_v49  ;;  %v1435_v49 = vld [vmem:[#allocation10 + $0x48] sm:$0xff]  ;;  %v4237_v50 = vcombine.low %v1432_v45, %v1434_v46  ;;  %1660 = vmatprep.subr.bf16.mxu1 %v4238_v48  ;;  %v4282_v45 = vcombine.high %v1812_v38, %v1814_v39  ;;  %v4284_v46 = vcombine.high %v1813_v40, %v1815_v41  ;;  %v1810_v48 = vld [vmem:[#allocation10 + $0x150] sm:$0xff] }
 0x659   : > { %v1398_v53 = vpop.f32.mrf.mxu0  ;;  %v4239_v51 = vcombine.low %v1433_v47, %v1435_v49 }
 0x65a   : > { %1404 = vadd.xlane.f32.xlu1 %v5727_v52  ;;  %v1407_v54 = vmul.f32 %v5727_v52, %v5727_v52  ;;  %v4240_v53 = vcombine.high %v1433_v47, %v1435_v49  ;;  %1661 = vmatpush1.bf16.msra.mxu1 %v4237_v50  ;;  %v1808_v47 = vld [vmem:[#allocation10 + $0x110] sm:$0xff]  ;;  %v1809_v49 = vld [vmem:[#allocation10 + $0x118] sm:$0xff] }
 0x65b   : > { %v4800_v55 = vpop.f32.mrf.mxu0  ;;  %v1811_v50 = vld [vmem:[#allocation10 + $0x158] sm:$0xff] }
 0x65c   : > { %1408 = vadd.xlane.f32.xlu0 %v1407_v54  ;;  %1701 = vmatprep.subr.bf16.mxu0 %v4240_v53  ;;  %v1828_v54 = vld [vmem:[#allocation10 + $0x390] sm:$0xff]  ;;  %v4283_v53 = vcombine.low %v1813_v40, %v1815_v41  ;;  %v4974_v40 = vld [vmem:[#allocation13 + $0x1c8] sm:$0xff]  }
 0x65d   : > { %v1830_v55 = vld [vmem:[#allocation10 + $0x3d0] sm:$0xff]  ;;  %1702 = vmatpush1.bf16.msra.mxu0 %v4239_v51  ;;  %v4281_v51 = vcombine.low %v1812_v38, %v1814_v39  ;;  %v4972_v38 = vld [vmem:[#allocation13 + $0x190] sm:$0xff]   ;;  %v4973_v39 = vld [vmem:[#allocation13 + $0x148] sm:$0xff]  }
 0x65e   : > { %v4297_v57 = vcombine.low %v1828_v54, %v1830_v55  ;;  %v4298_v58 = vcombine.high %v1828_v54, %v1830_v55  ;;  %2055 = vmatprep.subr.bf16.mxu0 %v4300_v61  ;;  %v4278_v54 = vcombine.high %v1808_v47, %v1810_v48  ;;  %v4280_v55 = vcombine.high %v1809_v49, %v1811_v50  ;;  %v4975_v41 = vld [vmem:[#allocation13 + $0x108] sm:$0xff]  }
 0x65f   : > { %v4279_v61 = vcombine.low %v1809_v49, %v1811_v50  ;;  %v4982_v49 = vld [vmem:[#allocation13 + $0xf8] sm:$0xff]  }
 0x660   : > { %2014 = vmatprep.subr.bf16.mxu1 %v4298_v58  ;;  %v1805_v58 = vld [vmem:[#allocation10 + $0x98] sm:$0xff] }
 0x6e3   : > { %v1405_v62 = vpop.xlane.xlu1 %1404 }
 0x6e4   : > { %v1406_v63 = vmul.f32 0.03125, %v1405_v62 }
 0x6e5   : > { %v1409_v2 = vpop.xlane.xlu0 %1408 }
 0x6e6   : > { %v1411_v3 = vmul.f32 %v1406_v63, %v1406_v63  ;;  %v1410_v4 = vmul.f32 0.03125, %v1409_v2  ;;  %v1413_v7 = vsub.f32 %v5727_v52, %v1406_v63  ;;  %v4276_v63 = vcombine.high %v1805_v58, %v1807_v59  ;;  %v1800_v2 = vld [vmem:[#allocation10 + $0x10] sm:$0xff] }
 0x6e8   : > { %v1412_v5 = vsub.f32 %v1410_v4, %v1411_v3  ;;  %v1802_v3 = vld [vmem:[#allocation10 + $0x50] sm:$0xff]  ;;  %v1801_v4 = vld [vmem:[#allocation10 + $0x18] sm:$0xff] }
 0x6ea   : > { %v1414_v6 = vadd.f32 1e-05, %v1412_v5  ;;  %v1803_v5 = vld [vmem:[#allocation10 + $0x58] sm:$0xff] }
 0x6ec   : > { %5093 = vrsqrt.f32 %v1414_v6 }
 0x6f9   : > { %v5094_v8 = vpop.eup %5093 }
 0x6fa   : > { %v1416_v10 = vmul.f32 %v5094_v8, %v1413_v7  ;;  %v4275_v7 = vcombine.low %v1805_v58, %v1807_v59  ;;  %v4270_v8 = vcombine.high %v1800_v2, %v1802_v3  ;;  %v5756_v59 = vsub.s32 3, %v5634_v29 }
 0x6fc   : > { %v1423_v12 = vmul.f32 %v4235_v9, %v1416_v10  ;;  %v4272_v9 = vcombine.high %v1801_v4, %v1803_v5  ;;  %v4269_v10 = vcombine.low %v1800_v2, %v1802_v3 }
 0x6fe   : > { %v5739_v17 = vadd.f32 %v4236_v11, %v1423_v12  ;;  %v4271_v11 = vcombine.low %v1801_v4, %v1803_v5  ;;  %v4949_v12 = vld [vmem:[#allocation13 + $0x178] sm:$0xff]  }
 0x700   : > { %v5743_v52 = vpack.c.bf16 %v5739_v17, %v5739_v17 }
 0x702   : > { %1679 = vmatmul.mubr.bf16.vlgmr.msra.gmra.mxu1 %v5743_v52  ;;  %1720 = vmatmul.mubr.bf16.vlgmr.msra.gmra.mxu0 %v5743_v52 }
 0x703   : > { %2015 = vmatpush1.bf16.msra.mxu1 %v4297_v57  ;;  %2056 = vmatpush1.bf16.msra.mxu0 %v4299_v60  ;;  %v1806_v57 = vld [vmem:[#allocation10 + $0xd0] sm:$0xff]  ;;  %v4277_v60 = vcombine.low %v1808_v47, %v1810_v48  ;;  %v4981_v48 = vld [vmem:[#allocation13 + $0x78] sm:$0xff]  }
 0x704   : > { %2016 = vmatprep.subr.bf16.mxu1 %v4294_v18  ;;  %2057 = vmatprep.subr.bf16.mxu0 %v4296_v19  ;;  %v4274_v62 = vcombine.high %v1804_v56, %v1806_v57  ;;  %v4273_v6 = vcombine.low %v1804_v56, %v1806_v57  ;;  %v4954_v18 = vld [vmem:[#allocation13 + $0x1f0] sm:$0xff]   ;;  %v4980_v47 = vld [vmem:[#allocation13 + $0x180] sm:$0xff]  }
 0x705   : > { %2046 = vmatprep.mubr.bf16.mxu1 %v5345_v0  ;;  %2087 = vmatprep.mubr.bf16.mxu0 %v5345_v0  ;;  %v4955_v19 = vld [vmem:[#allocation13 + $0x130] sm:$0xff]  }
 0x707   : > { %2017 = vmatpush1.bf16.msra.mxu1 %v4293_v24  ;;  %2058 = vmatpush1.bf16.msra.mxu0 %v4295_v25  ;;  %v4960_v24 = vld [vmem:[#allocation13 + $0x1a8] sm:$0xff]   ;;  %v4961_v25 = vld [vmem:[#allocation13 + $0x160] sm:$0xff]  }
 0x708   : > { %2018 = vmatprep.subr.bf16.mxu1 %v4290_v26  ;;  %2059 = vmatprep.subr.bf16.mxu0 %v4292_v27  ;;  %v4962_v26 = vld [vmem:[#allocation13 + $0x1e0] sm:$0xff]  }
 0x709   : > { %v4963_v27 = vld [vmem:[#allocation13 + $0x120] sm:$0xff]  }
 0x70b   : > { %2019 = vmatpush1.bf16.msra.mxu1 %v4289_v35  ;;  %2060 = vmatpush1.bf16.msra.mxu0 %v4291_v36  ;;  %v4968_v35 = vld [vmem:[#allocation13 + $0x198] sm:$0xff]   ;;  %v4969_v36 = vld [vmem:[#allocation13 + $0x150] sm:$0xff]  }
 0x70c   : > { %2020 = vmatprep.subr.bf16.mxu1 %v4286_v1  ;;  %2061 = vmatprep.subr.bf16.mxu0 %v4288_v37  ;;  %v4970_v1 = vld [vmem:[#allocation13 + $0x1d0] sm:$0xff]  }
 0x70d   : > { %v4971_v37 = vld [vmem:[#allocation13 + $0x110] sm:$0xff]  }
 0x70f   : > { %2021 = vmatpush1.bf16.msra.mxu1 %v4285_v42  ;;  %2062 = vmatpush1.bf16.msra.mxu0 %v4287_v43  ;;  %v4976_v42 = vld [vmem:[#allocation13 + $0x188] sm:$0xff]   ;;  %v4977_v43 = vld [vmem:[#allocation13 + $0x140] sm:$0xff]  }
 0x710   : > { %2022 = vmatprep.subr.bf16.mxu1 %v4282_v45  ;;  %2063 = vmatprep.subr.bf16.mxu0 %v4284_v46  ;;  %v4978_v45 = vld [vmem:[#allocation13 + $0x1c0] sm:$0xff]  }
 0x711   : > { %v4979_v46 = vld [vmem:[#allocation13 + $0x100] sm:$0xff]  }
 0x713   : > { %2023 = vmatpush1.bf16.msra.mxu1 %v4281_v51  ;;  %2064 = vmatpush1.bf16.msra.mxu0 %v4283_v53 }
 0x714   : > { %2024 = vmatprep.subr.bf16.mxu1 %v4278_v54  ;;  %2065 = vmatprep.subr.bf16.mxu0 %v4280_v55 }
 0x717   : > { %2025 = vmatpush1.bf16.msra.mxu1 %v4277_v60  ;;  %2066 = vmatpush1.bf16.msra.mxu0 %v4279_v61  ;;  %v1832_v60 = vld [vmem:[#allocation12 + $0x4] sm:$0xf]  ;;  %v5758_v61 = vld [vmem:[#allocation12] sm:$0xf] }
 0x718   : > { %2026 = vmatprep.subr.bf16.mxu1 %v4274_v62  ;;  %2067 = vmatprep.subr.bf16.mxu0 %v4276_v63  ;;  %v1837_v62 = vrot.slane %v1832_v60, %v5637_v30  ;;  %v1845_v63 = vrot.slane %v1832_v60, %v5658_v44  ;;  %v1473_v2 = vrot.slane %v5758_v61, %v5643_v32 }
 0x719   : > { %v1481_v3 = vrot.slane %v5758_v61, %v5756_v59  ;;  %v1841_v4 = vrot.slane %v1832_v60, %v5643_v32  ;;  %v1849_v5 = vrot.slane %v1832_v60, %v5756_v59  ;;  %v5004_v60 = vld [vmem:[#allocation13 + $0x90] sm:$0xff]  }
 0x71b   : > { %2027 = vmatpush1.bf16.msra.mxu1 %v4273_v6  ;;  %2068 = vmatpush1.bf16.msra.mxu0 %v4275_v7 }
 0x71c   : > { %2028 = vmatprep.subr.bf16.mxu1 %v4270_v8  ;;  %2069 = vmatprep.subr.bf16.mxu0 %v4272_v9 }
 0x71f   : > { %2029 = vmatpush1.bf16.msra.mxu1 %v4269_v10  ;;  %2070 = vmatpush1.bf16.msra.mxu0 %v4271_v11 }
 0x720   : > { %4537 = vmatprep.subr.bf16.mxu1 %v4949_v12  ;;  %4559 = vmatprep.subr.bf16.mxu0 %v4950_v13 }
 0x722   : > { %2047 = vmatmul.mubr.bf16.vlgmr.msra.gmra.mxu1 %v5743_v52  ;;  %2088 = vmatmul.mubr.bf16.vlgmr.msra.gmra.mxu0 %v5743_v52 }
 0x723   : > { %4538 = vmatpush3.bf16.msra.mxu1 %v4951_v14  ;;  %4560 = vmatpush3.bf16.msra.mxu0 %v4952_v15 }
 0x724   : > { %4539 = vmatprep.subr.bf16.mxu1 %v4953_v16  ;;  %4561 = vmatprep.subr.bf16.mxu0 %v4954_v18 }
 0x727   : > { %4540 = vmatpush3.bf16.msra.mxu1 %v4955_v19  ;;  %4562 = vmatpush3.bf16.msra.mxu0 %v4956_v20 }
 0x728   : > { %4541 = vmatprep.subr.bf16.mxu1 %v4957_v21  ;;  %4563 = vmatprep.subr.bf16.mxu0 %v4958_v22 }
 0x72b   : > { %4542 = vmatpush3.bf16.msra.mxu1 %v4959_v23  ;;  %4564 = vmatpush3.bf16.msra.mxu0 %v4960_v24 }
 0x72c   : > { %4543 = vmatprep.subr.bf16.mxu1 %v4961_v25  ;;  %4565 = vmatprep.subr.bf16.mxu0 %v4962_v26 }
 0x72f   : > { %4544 = vmatpush3.bf16.msra.mxu1 %v4963_v27  ;;  %4566 = vmatpush3.bf16.msra.mxu0 %v4964_v28  ;;  %v4983_v28 = vld [vmem:[#allocation13 + $0x38] sm:$0xff]  }
 0x730   : > { %4545 = vmatprep.subr.bf16.mxu1 %v4965_v31  ;;  %4567 = vmatprep.subr.bf16.mxu0 %v4966_v33  ;;  %v4984_v31 = vld [vmem:[#allocation13 + $0xb8] sm:$0xff]  }
 0x733   : > { %4546 = vmatpush3.bf16.msra.mxu1 %v4967_v34  ;;  %4568 = vmatpush3.bf16.msra.mxu0 %v4968_v35  ;;  %v4985_v35 = vld [vmem:[#allocation13 + $0x70] sm:$0xff]  }
 0x734   : > { %4547 = vmatprep.subr.bf16.mxu1 %v4969_v36  ;;  %4569 = vmatprep.subr.bf16.mxu0 %v4970_v1  ;;  %v4986_v36 = vld [vmem:[#allocation13 + $0xf0] sm:$0xff]  }
 0x737   : > { %4548 = vmatpush3.bf16.msra.mxu1 %v4971_v37  ;;  %4570 = vmatpush3.bf16.msra.mxu0 %v4972_v38  ;;  %v4987_v38 = vld [vmem:[#allocation13 + $0x30] sm:$0xff]  }
 0x738   : > { %4549 = vmatprep.subr.bf16.mxu1 %v4973_v39  ;;  %4571 = vmatprep.subr.bf16.mxu0 %v4974_v40  ;;  %v4988_v39 = vld [vmem:[#allocation13 + $0xb0] sm:$0xff]   ;;  %v4989_v40 = vld [vmem:[#allocation13 + $0x68] sm:$0xff]  }
 0x73b   : > { %4550 = vmatpush3.bf16.msra.mxu1 %v4975_v41  ;;  %4572 = vmatpush3.bf16.msra.mxu0 %v4976_v42  ;;  %v4990_v41 = vld [vmem:[#allocation13 + $0xe8] sm:$0xff]  }
 0x73c   : > { %4551 = vmatprep.subr.bf16.mxu1 %v4977_v43  ;;  %4573 = vmatprep.subr.bf16.mxu0 %v4978_v45  ;;  %v4991_v42 = vld [vmem:[#allocation13 + $0x28] sm:$0xff]   ;;  %v4993_v45 = vld [vmem:[#allocation13 + $0x60] sm:$0xff]  }
 0x73d   : > { %v4992_v43 = vld [vmem:[#allocation13 + $0xa8] sm:$0xff]  }
 0x73f   : > { %4552 = vmatpush3.bf16.msra.mxu1 %v4979_v46  ;;  %4574 = vmatpush3.bf16.msra.mxu0 %v4980_v47  ;;  %v4994_v46 = vld [vmem:[#allocation13 + $0xe0] sm:$0xff]  }
 0x740   : > { %4581 = vmatprep.subr.bf16.mxu1 %v4981_v48  ;;  %4603 = vmatprep.subr.bf16.mxu0 %v4982_v49  ;;  %v4995_v47 = vld [vmem:[#allocation13 + $0x20] sm:$0xff]   ;;  %v4997_v49 = vld [vmem:[#allocation13 + $0x58] sm:$0xff]  }
 0x741   : > { %v4996_v48 = vld [vmem:[#allocation13 + $0xa0] sm:$0xff]  }
 0x7c2   : > { %v5751_v50 = vpop.f32.mrf.mxu1  ;;  %v5753_v51 = vpop.f32.mrf.mxu0 }
 0x7c4   : > { %v1682_v53 = vpop.f32.mrf.mxu1  ;;  %v1723_v54 = vpop.f32.mrf.mxu0 }
 0x7c5   : > { %v1683_v9 = vadd.f32 %v1682_v53, %v1473_v2  ;;  %v1724_v10 = vadd.f32 %v1723_v54, %v1481_v3  ;;  %v4998_v53 = vld [vmem:[#allocation13 + $0xd8] sm:$0xff]   ;;  %v5005_v2 = vld [vmem:[#allocation13 + $0x48] sm:$0xff]  }
 0x7c6   : > { %v1684_v55 = vpop.f32.mrf.mxu1  ;;  %v1725_v56 = vpop.f32.mrf.mxu0  ;;  %v4999_v54 = vld [vmem:[#allocation13 + $0x18] sm:$0xff]   ;;  %v5006_v3 = vld [vmem:[#allocation13 + $0xc8] sm:$0xff]  }
 0x7c7   : > { %v1729_v22 = vmax.f32 %v1683_v9, 0.0  ;;  %v1731_v23 = vmax.f32 %v1724_v10, 0.0  ;;  %v5000_v55 = vld [vmem:[#allocation13 + $0x98] sm:$0xff]   ;;  %v5001_v56 = vld [vmem:[#allocation13 + $0x50] sm:$0xff]  }
 0x7c8   : > { %v1685_v57 = vpop.f32.mrf.mxu1  ;;  %v1726_v58 = vpop.f32.mrf.mxu0  ;;  %v2740_v9 = vld [vmem:[#allocation10 + $0x3a0] sm:$0xff] }
 0x7c9   : > { %v1733_v1 = vpack.c.bf16 %v1729_v22, %v1729_v22  ;;  %v1735_v37 = vpack.c.bf16 %v1731_v23, %v1731_v23  ;;  %v5002_v57 = vld [vmem:[#allocation13 + $0xd0] sm:$0xff]  }
 0x7ca   : > { %v5003_v58 = vld [vmem:[#allocation13 + $0x10] sm:$0xff]  }
 0x7cb   : > { %v2742_v10 = vld [vmem:[#allocation10 + $0x3e0] sm:$0xff] }
 0x7e2   : > { %v2048_v6 = vpop.f32.mrf.mxu1  ;;  %v2089_v29 = vpop.f32.mrf.mxu0 }
 0x7e3   : > { %v2049_v7 = vadd.f32 %v2048_v6, %v1837_v62  ;;  %v2090_v8 = vadd.f32 %v2089_v29, %v1845_v63  ;;  %v1469_v62 = vrot.slane %v5758_v61, %v5637_v30  ;;  %v1477_v63 = vrot.slane %v5758_v61, %v5658_v44  ;;  %v2743_v61 = vld [vmem:[#allocation10 + $0x3e8] sm:$0xff] }
 0x7e4   : > { %v2050_v11 = vpop.f32.mrf.mxu1  ;;  %v2091_v12 = vpop.f32.mrf.mxu0 }
 0x7e5   : > { %v2051_v13 = vadd.f32 %v2050_v11, %v1841_v4  ;;  %v2092_v14 = vadd.f32 %v2091_v12, %v1849_v5  ;;  %v2096_v15 = vmax.f32 %v2049_v7, 0.0  ;;  %v2098_v16 = vmax.f32 %v2090_v8, 0.0  ;;  %v5007_v4 = vld [vmem:[#allocation13 + $0x8] sm:$0xff]   ;;  %v5009_v7 = vld [vmem:[#allocation13 + $0x40] sm:$0xff]   ;;  %v2741_v11 = vld [vmem:[#allocation10 + $0x3a8] sm:$0xff] }
 0x7e6   : > { %v2052_v18 = vpop.f32.mrf.mxu1  ;;  %v2093_v19 = vpop.f32.mrf.mxu0  ;;  %v5008_v5 = vld [vmem:[#allocation13 + $0x88] sm:$0xff]   ;;  %v1681_v6 = vadd.f32 %v5751_v50, %v1469_v62  ;;  %v1722_v29 = vadd.f32 %v5753_v51, %v1477_v63  ;;  %v5010_v8 = vld [vmem:[#allocation13 + $0xc0] sm:$0xff]   ;;  %v4396_v50 = vcombine.high %v2741_v11, %v2743_v61  ;;  %v2738_v51 = vld [vmem:[#allocation10 + $0x360] sm:$0xff]  ;;  %v4395_v22 = vcombine.low %v2741_v11, %v2743_v61 }
 0x7e7   : > { %v2097_v20 = vmax.f32 %v2051_v13, 0.0  ;;  %v2099_v21 = vmax.f32 %v2092_v14, 0.0  ;;  %v2100_v33 = vpack.c.bf16 %v2096_v15, %v2096_v15  ;;  %v2102_v34 = vpack.c.bf16 %v2098_v16, %v2098_v16  ;;  %v5011_v12 = vld [vmem:[#allocation13] sm:$0xff]   ;;  %v2736_v18 = vld [vmem:[#allocation10 + $0x320] sm:$0xff]  ;;  %v2737_v19 = vld [vmem:[#allocation10 + $0x328] sm:$0xff] }
 0x7e8   : > { %v2053_v24 = vpop.f32.mrf.mxu1  ;;  %v2094_v25 = vpop.f32.mrf.mxu0  ;;  %v5012_v13 = vld [vmem:[#allocation13 + $0x80] sm:$0xff]   ;;  %v1728_v14 = vmax.f32 %v1681_v6, 0.0  ;;  %v1730_v15 = vmax.f32 %v1722_v29, 0.0  ;;  %v4394_v16 = vcombine.high %v2740_v9, %v2742_v10  ;;  %v4390_v23 = vcombine.high %v2736_v18, %v2738_v51  ;;  %v2723_v62 = vld [vmem:[#allocation10 + $0x168] sm:$0xff]  ;;  %v2718_v6 = vld [vmem:[#allocation10 + $0xe0] sm:$0xff] }
 0x7e9   : > { %v2101_v26 = vpack.c.bf16 %v2097_v20, %v2097_v20  ;;  %v2103_v27 = vpack.c.bf16 %v2099_v21, %v2099_v21  ;;  %v2739_v20 = vld [vmem:[#allocation10 + $0x368] sm:$0xff]  ;;  %v4393_v21 = vcombine.low %v2740_v9, %v2742_v10  ;;  %v2712_v61 = vld [vmem:[#allocation10 + $0x20] sm:$0xff] }
 0x7ea   : > { %v1732_v24 = vpack.c.bf16 %v1728_v14, %v1728_v14  ;;  %v1734_v25 = vpack.c.bf16 %v1730_v15, %v1730_v15  ;;  %v2717_v29 = vld [vmem:[#allocation10 + $0xa8] sm:$0xff] }
 0x7eb   : > { %2392 = vmatprep.mubr.bf16.mxu1 %v2101_v26  ;;  %2432 = vmatprep.mubr.bf16.mxu0 %v2103_v27  ;;  %v4392_v26 = vcombine.high %v2737_v19, %v2739_v20  ;;  %v2732_v27 = vld [vmem:[#allocation10 + $0x2a0] sm:$0xff]  ;;  %v2715_v14 = vld [vmem:[#allocation10 + $0x68] sm:$0xff] }
 0x7ec   : > { %2393 = vmatmul.mubr.bf16.vlgmr.msra.gmra.mxu1 %v2100_v33  ;;  %2433 = vmatmul.mubr.bf16.vlgmr.msra.gmra.mxu0 %v2102_v34  ;;  %v2735_v33 = vld [vmem:[#allocation10 + $0x2e8] sm:$0xff]  ;;  %v4389_v34 = vcombine.low %v2736_v18, %v2738_v51 }
 0x7ed   : > { %4582 = vmatpush3.bf16.msra.mxu1 %v4983_v28  ;;  %4604 = vmatpush3.bf16.msra.mxu0 %v4984_v31  ;;  %v2734_v28 = vld [vmem:[#allocation10 + $0x2e0] sm:$0xff]  ;;  %v2733_v31 = vld [vmem:[#allocation10 + $0x2a8] sm:$0xff] }
 0x7ee   : > { %2664 = vmatprep.mubr.bf16.mxu1 %v1733_v1  ;;  %2704 = vmatprep.mubr.bf16.mxu0 %v1735_v37  ;;  %v4388_v1 = vcombine.high %v2733_v31, %v2735_v33  ;;  %v2728_v37 = vld [vmem:[#allocation10 + $0x220] sm:$0xff] }
 0x7ef   : > { %4583 = vmatprep.subr.bf16.mxu1 %v4985_v35  ;;  %4605 = vmatprep.subr.bf16.mxu0 %v4986_v36  ;;  %v4391_v35 = vcombine.low %v2737_v19, %v2739_v20  ;;  %v4386_v36 = vcombine.high %v2732_v27, %v2734_v28  ;;  %v5013_v20 = vld [vmem:[#allocation13 + $0x278] sm:$0xff]  }
 0x7f1   : > { %4584 = vmatpush3.bf16.msra.mxu1 %v4987_v38  ;;  %4606 = vmatpush3.bf16.msra.mxu0 %v4988_v39  ;;  %v2730_v38 = vld [vmem:[#allocation10 + $0x260] sm:$0xff]  ;;  %v2729_v39 = vld [vmem:[#allocation10 + $0x228] sm:$0xff] }
 0x7f2   : > { %4585 = vmatprep.subr.bf16.mxu1 %v4989_v40  ;;  %4607 = vmatprep.subr.bf16.mxu0 %v4990_v41  ;;  %v2731_v40 = vld [vmem:[#allocation10 + $0x268] sm:$0xff]  ;;  %v4385_v41 = vcombine.low %v2732_v27, %v2734_v28  ;;  %v5020_v27 = vld [vmem:[#allocation13 + $0x2b0] sm:$0xff]   ;;  %v5021_v28 = vld [vmem:[#allocation13 + $0x268] sm:$0xff]  }
 0x7f5   : > { %4586 = vmatpush3.bf16.msra.mxu1 %v4991_v42  ;;  %4608 = vmatpush3.bf16.msra.mxu0 %v4992_v43  ;;  %v4387_v42 = vcombine.low %v2733_v31, %v2735_v33  ;;  %v4382_v43 = vcombine.high %v2728_v37, %v2730_v38  ;;  %v5022_v31 = vld [vmem:[#allocation13 + $0x2e8] sm:$0xff]  }
 0x7f6   : > { %4587 = vmatprep.subr.bf16.mxu1 %v4993_v45  ;;  %4609 = vmatprep.subr.bf16.mxu0 %v4994_v46  ;;  %v4384_v45 = vcombine.high %v2729_v39, %v2731_v40  ;;  %v2724_v46 = vld [vmem:[#allocation10 + $0x1a0] sm:$0xff]  ;;  %v5023_v33 = vld [vmem:[#allocation13 + $0x228] sm:$0xff]  }
 0x7f9   : > { %4588 = vmatpush3.bf16.msra.mxu1 %v4995_v47  ;;  %4610 = vmatpush3.bf16.msra.mxu0 %v4996_v48  ;;  %v2726_v47 = vld [vmem:[#allocation10 + $0x1e0] sm:$0xff]  ;;  %v2725_v48 = vld [vmem:[#allocation10 + $0x1a8] sm:$0xff] }
 0x7fa   : > { %4589 = vmatprep.subr.bf16.mxu1 %v4997_v49  ;;  %4611 = vmatprep.subr.bf16.mxu0 %v4998_v53  ;;  %v2727_v49 = vld [vmem:[#allocation10 + $0x1e8] sm:$0xff]  ;;  %v4381_v53 = vcombine.low %v2728_v37, %v2730_v38  ;;  %v4377_v63 = vcombine.low %v2724_v46, %v2726_v47  ;;  %v5028_v37 = vld [vmem:[#allocation13 + $0x2a0] sm:$0xff]  }
 0x7fb   : > { %v5029_v38 = vld [vmem:[#allocation13 + $0x258] sm:$0xff]  }
 0x7fd   : > { %4590 = vmatpush3.bf16.msra.mxu1 %v4999_v54  ;;  %4612 = vmatpush3.bf16.msra.mxu0 %v5000_v55  ;;  %v4383_v54 = vcombine.low %v2729_v39, %v2731_v40  ;;  %v4378_v55 = vcombine.high %v2724_v46, %v2726_v47  ;;  %v5030_v39 = vld [vmem:[#allocation13 + $0x2d8] sm:$0xff]   ;;  %v5036_v46 = vld [vmem:[#allocation13 + $0x290] sm:$0xff]   ;;  %v5037_v47 = vld [vmem:[#allocation13 + $0x248] sm:$0xff]  }
 0x7fe   : > { %4591 = vmatprep.subr.bf16.mxu1 %v5001_v56  ;;  %4613 = vmatprep.subr.bf16.mxu0 %v5002_v57  ;;  %v4380_v56 = vcombine.high %v2725_v48, %v2727_v49  ;;  %v2720_v57 = vld [vmem:[#allocation10 + $0x120] sm:$0xff]  ;;  %v5031_v40 = vld [vmem:[#allocation13 + $0x218] sm:$0xff]  }
 0x801   : > { %4592 = vmatpush3.bf16.msra.mxu1 %v5003_v58  ;;  %4614 = vmatpush3.bf16.msra.mxu0 %v5004_v60  ;;  %v2722_v58 = vld [vmem:[#allocation10 + $0x160] sm:$0xff]  ;;  %v2721_v60 = vld [vmem:[#allocation10 + $0x128] sm:$0xff] }
 0x802   : > { %4593 = vmatprep.subr.bf16.mxu1 %v5005_v2  ;;  %4615 = vmatprep.subr.bf16.mxu0 %v5006_v3  ;;  %v4379_v2 = vcombine.low %v2725_v48, %v2727_v49  ;;  %v4374_v3 = vcombine.high %v2720_v57, %v2722_v58  ;;  %v4375_v9 = vcombine.low %v2721_v60, %v2723_v62  ;;  %v5038_v48 = vld [vmem:[#allocation13 + $0x2c8] sm:$0xff]  }
 0x803   : > { %v5039_v49 = vld [vmem:[#allocation13 + $0x208] sm:$0xff]  }
 0x805   : > { %4594 = vmatpush3.bf16.msra.mxu1 %v5007_v4  ;;  %4616 = vmatpush3.bf16.msra.mxu0 %v5008_v5  ;;  %v4376_v4 = vcombine.high %v2721_v60, %v2723_v62  ;;  %v2716_v5 = vld [vmem:[#allocation10 + $0xa0] sm:$0xff]  ;;  %v5780_v60 = vld [vmem:[#allocation10 + $0x3f0] sm:$0xff]  ;;  %v5782_v62 = vld [vmem:[#allocation10 + $0x3b8] sm:$0xff] }
 0x806   : > { %4595 = vmatprep.subr.bf16.mxu1 %v5009_v7  ;;  %4617 = vmatprep.subr.bf16.mxu0 %v5010_v8  ;;  %v2719_v7 = vld [vmem:[#allocation10 + $0xe8] sm:$0xff]  ;;  %v4373_v8 = vcombine.low %v2720_v57, %v2722_v58  ;;  %v4370_v10 = vcombine.high %v2716_v5, %v2718_v6  ;;  %v4369_v15 = vcombine.low %v2716_v5, %v2718_v6  ;;  %v5044_v57 = vld [vmem:[#allocation13 + $0x280] sm:$0xff]  }
 0x807   : > { %v4372_v11 = vcombine.high %v2717_v29, %v2719_v7  ;;  %v5778_v58 = vld [vmem:[#allocation10 + $0x3b0] sm:$0xff] }
 0x809   : > { %4596 = vmatpush3.bf16.msra.mxu1 %v5011_v12  ;;  %4618 = vmatpush3.bf16.msra.mxu0 %v5012_v13  ;;  %v2714_v12 = vld [vmem:[#allocation10 + $0x60] sm:$0xff]  ;;  %v2713_v13 = vld [vmem:[#allocation10 + $0x28] sm:$0xff] }
 0x80a   : > { %2926 = vmatprep.subr.bf16.mxu1 %v4394_v16  ;;  %2967 = vmatprep.subr.bf16.mxu0 %v4396_v50  ;;  %v4371_v16 = vcombine.low %v2717_v29, %v2719_v7  ;;  %v4366_v50 = vcombine.high %v2712_v61, %v2714_v12  ;;  %v4368_v18 = vcombine.high %v2713_v13, %v2715_v14 }
 0x80b   : > { %v4365_v51 = vcombine.low %v2712_v61, %v2714_v12  ;;  %v4367_v19 = vcombine.low %v2713_v13, %v2715_v14 }
 0x80c   : > { %2665 = vmatmul.mubr.bf16.vlgmr.msra.gmra.mxu1 %v1732_v24  ;;  %2705 = vmatmul.mubr.bf16.vlgmr.msra.gmra.mxu0 %v1734_v25  ;;  %v5017_v24 = vld [vmem:[#allocation13 + $0x270] sm:$0xff]  }
 0x80d   : > { %2927 = vmatpush1.bf16.msra.mxu1 %v4393_v21  ;;  %2968 = vmatpush1.bf16.msra.mxu0 %v4395_v22  ;;  %v5014_v21 = vld [vmem:[#allocation13 + $0x2f8] sm:$0xff]   ;;  %v5018_v25 = vld [vmem:[#allocation13 + $0x2f0] sm:$0xff]  }
 0x80e   : > { %2928 = vmatprep.subr.bf16.mxu1 %v4390_v23  ;;  %2969 = vmatprep.subr.bf16.mxu0 %v4392_v26  ;;  %v5015_v22 = vld [vmem:[#allocation13 + $0x238] sm:$0xff]   ;;  %v5019_v26 = vld [vmem:[#allocation13 + $0x230] sm:$0xff]  }
 0x80f   : > { %2958 = vmatprep.mubr.bf16.mxu1 %v5345_v0  ;;  %2999 = vmatprep.mubr.bf16.mxu0 %v5345_v0  ;;  %v5016_v23 = vld [vmem:[#allocation13 + $0x2b8] sm:$0xff]  }
 0x811   : > { %2929 = vmatpush1.bf16.msra.mxu1 %v4389_v34  ;;  %2970 = vmatpush1.bf16.msra.mxu0 %v4391_v35  ;;  %v5024_v34 = vld [vmem:[#allocation13 + $0x2a8] sm:$0xff]   ;;  %v5025_v35 = vld [vmem:[#allocation13 + $0x260] sm:$0xff]  }
 0x812   : > { %2930 = vmatprep.subr.bf16.mxu1 %v4386_v36  ;;  %2971 = vmatprep.subr.bf16.mxu0 %v4388_v1  ;;  %v5026_v36 = vld [vmem:[#allocation13 + $0x2e0] sm:$0xff]  }
 0x813   : > { %v5027_v1 = vld [vmem:[#allocation13 + $0x220] sm:$0xff]  }
 0x815   : > { %2931 = vmatpush1.bf16.msra.mxu1 %v4385_v41  ;;  %2972 = vmatpush1.bf16.msra.mxu0 %v4387_v42  ;;  %v5032_v41 = vld [vmem:[#allocation13 + $0x298] sm:$0xff]   ;;  %v5033_v42 = vld [vmem:[#allocation13 + $0x250] sm:$0xff]  }
 0x816   : > { %2932 = vmatprep.subr.bf16.mxu1 %v4382_v43  ;;  %2973 = vmatprep.subr.bf16.mxu0 %v4384_v45  ;;  %v5034_v43 = vld [vmem:[#allocation13 + $0x2d0] sm:$0xff]  }
 0x817   : > { %v5035_v45 = vld [vmem:[#allocation13 + $0x210] sm:$0xff]  }
 0x819   : > { %2933 = vmatpush1.bf16.msra.mxu1 %v4381_v53  ;;  %2974 = vmatpush1.bf16.msra.mxu0 %v4383_v54  ;;  %v5040_v53 = vld [vmem:[#allocation13 + $0x288] sm:$0xff]   ;;  %v5041_v54 = vld [vmem:[#allocation13 + $0x240] sm:$0xff]  }
 0x81a   : > { %2934 = vmatprep.subr.bf16.mxu1 %v4378_v55  ;;  %2975 = vmatprep.subr.bf16.mxu0 %v4380_v56  ;;  %v5042_v55 = vld [vmem:[#allocation13 + $0x2c0] sm:$0xff]  }
 0x81b   : > { %v5043_v56 = vld [vmem:[#allocation13 + $0x200] sm:$0xff]  }
 0x81d   : > { %2935 = vmatpush1.bf16.msra.mxu1 %v4377_v63  ;;  %2976 = vmatpush1.bf16.msra.mxu0 %v4379_v2  ;;  %v4458_v63 = vcombine.high %v5778_v58, %v5780_v60  ;;  %v5786_v2 = vld [vmem:[#allocation10 + $0x3f8] sm:$0xff] }
 0x81e   : > { %2936 = vmatprep.subr.bf16.mxu1 %v4374_v3  ;;  %2977 = vmatprep.subr.bf16.mxu0 %v4376_v4  ;;  %v4457_v3 = vcombine.low %v5778_v58, %v5780_v60  ;;  %v4459_v4 = vcombine.low %v5782_v62, %v5786_v2  ;;  %v4460_v5 = vcombine.high %v5782_v62, %v5786_v2 }
 0x821   : > { %2937 = vmatpush1.bf16.msra.mxu1 %v4373_v8  ;;  %2978 = vmatpush1.bf16.msra.mxu0 %v4375_v9 }
 0x822   : > { %2938 = vmatprep.subr.bf16.mxu1 %v4370_v10  ;;  %2979 = vmatprep.subr.bf16.mxu0 %v4372_v11 }
 0x825   : > { %2939 = vmatpush1.bf16.msra.mxu1 %v4369_v15  ;;  %2980 = vmatpush1.bf16.msra.mxu0 %v4371_v16 }
 0x826   : > { %2940 = vmatprep.subr.bf16.mxu1 %v4366_v50  ;;  %2981 = vmatprep.subr.bf16.mxu0 %v4368_v18 }
 0x829   : > { %2941 = vmatpush1.bf16.msra.mxu1 %v4365_v51  ;;  %2982 = vmatpush1.bf16.msra.mxu0 %v4367_v19 }
 0x82a   : > { %4625 = vmatprep.subr.bf16.mxu1 %v5013_v20  ;;  %4647 = vmatprep.subr.bf16.mxu0 %v5014_v21 }
 0x82c   : > { %2959 = vmatmul.mubr.bf16.vlgmr.msra.gmra.mxu1 %v5743_v52  ;;  %3000 = vmatmul.mubr.bf16.vlgmr.msra.gmra.mxu0 %v5743_v52 }
 0x82d   : > { %4626 = vmatpush3.bf16.msra.mxu1 %v5015_v22  ;;  %4648 = vmatpush3.bf16.msra.mxu0 %v5016_v23 }
 0x82e   : > { %4627 = vmatprep.subr.bf16.mxu1 %v5017_v24  ;;  %4649 = vmatprep.subr.bf16.mxu0 %v5018_v25 }
 0x831   : > { %4628 = vmatpush3.bf16.msra.mxu1 %v5019_v26  ;;  %4650 = vmatpush3.bf16.msra.mxu0 %v5020_v27  ;;  %v2744_v26 = vld [vmem:[#allocation12 + $0x8] sm:$0xf] }
 0x832   : > { %4629 = vmatprep.subr.bf16.mxu1 %v5021_v28  ;;  %4651 = vmatprep.subr.bf16.mxu0 %v5022_v31  ;;  %v2749_v27 = vrot.slane %v2744_v26, %v5637_v30  ;;  %v2757_v28 = vrot.slane %v2744_v26, %v5658_v44  ;;  %v2753_v31 = vrot.slane %v2744_v26, %v5643_v32 }
 0x835   : > { %4630 = vmatpush3.bf16.msra.mxu1 %v5023_v33  ;;  %4652 = vmatpush3.bf16.msra.mxu0 %v5024_v34  ;;  %v2761_v33 = vrot.slane %v2744_v26, %v5756_v59  ;;  %v3362_v26 = vld [vmem:[#allocation10 + $0x138] sm:$0xff] }
 0x836   : > { %4631 = vmatprep.subr.bf16.mxu1 %v5025_v35  ;;  %4653 = vmatprep.subr.bf16.mxu0 %v5026_v36 }
 0x839   : > { %4632 = vmatpush3.bf16.msra.mxu1 %v5027_v1  ;;  %4654 = vmatpush3.bf16.msra.mxu0 %v5028_v37 }
 0x83a   : > { %4633 = vmatprep.subr.bf16.mxu1 %v5029_v38  ;;  %4655 = vmatprep.subr.bf16.mxu0 %v5030_v39 }
 0x83d   : > { %4634 = vmatpush3.bf16.msra.mxu1 %v5031_v40  ;;  %4656 = vmatpush3.bf16.msra.mxu0 %v5032_v41 }
 0x83e   : > { %4635 = vmatprep.subr.bf16.mxu1 %v5033_v42  ;;  %4657 = vmatprep.subr.bf16.mxu0 %v5034_v43 }
 0x841   : > { %4636 = vmatpush3.bf16.msra.mxu1 %v5035_v45  ;;  %4658 = vmatpush3.bf16.msra.mxu0 %v5036_v46  ;;  %v3377_v46 = vld [vmem:[#allocation10 + $0x330] sm:$0xff] }
 0x842   : > { %4637 = vmatprep.subr.bf16.mxu1 %v5037_v47  ;;  %4659 = vmatprep.subr.bf16.mxu0 %v5038_v48 }
 0x845   : > { %4638 = vmatpush3.bf16.msra.mxu1 %v5039_v49  ;;  %4660 = vmatpush3.bf16.msra.mxu0 %v5040_v53  ;;  %v3379_v49 = vld [vmem:[#allocation10 + $0x370] sm:$0xff]  ;;  %v3378_v53 = vld [vmem:[#allocation10 + $0x338] sm:$0xff] }
 0x846   : > { %4639 = vmatprep.subr.bf16.mxu1 %v5041_v54  ;;  %4661 = vmatprep.subr.bf16.mxu0 %v5042_v55  ;;  %v3380_v54 = vld [vmem:[#allocation10 + $0x378] sm:$0xff] }
 0x849   : > { %4640 = vmatpush3.bf16.msra.mxu1 %v5043_v56  ;;  %4662 = vmatpush3.bf16.msra.mxu0 %v5044_v57 }
 0x84a   : > { %3567 = vmatprep.subr.bf16.mxu1 %v4458_v63  ;;  %3608 = vmatprep.subr.bf16.mxu0 %v4460_v5 }
 0x8ac   : > { %v4553_v6 = vpop.f32.mrf.mxu1  ;;  %v4575_v29 = vpop.f32.mrf.mxu0 }
 0x8ae   : > { %v4554_v7 = vpop.f32.mrf.mxu1  ;;  %v4576_v8 = vpop.f32.mrf.mxu0 }
 0x8af   : > { %v4555_v9 = vadd.f32 %v4554_v7, %v4553_v6  ;;  %v4577_v10 = vadd.f32 %v4576_v8, %v4575_v29  ;;  %v4454_v29 = vcombine.high %v3377_v46, %v3379_v49  ;;  %v4456_v7 = vcombine.high %v3378_v53, %v3380_v54  ;;  %v3373_v8 = vld [vmem:[#allocation10 + $0x2b0] sm:$0xff] }
 0x8b0   : > { %v4556_v11 = vpop.f32.mrf.mxu1  ;;  %v4578_v61 = vpop.f32.mrf.mxu0 }
 0x8b1   : > { %v2435_v12 = vadd.f32 %v4577_v10, %v4555_v9  ;;  %v3375_v9 = vld [vmem:[#allocation10 + $0x2f0] sm:$0xff]  ;;  %v3374_v10 = vld [vmem:[#allocation10 + $0x2b8] sm:$0xff]  ;;  %v4453_v61 = vcombine.low %v3377_v46, %v3379_v49 }
 0x8b2   : > { %v4557_v13 = vpop.f32.mrf.mxu1  ;;  %v4579_v14 = vpop.f32.mrf.mxu0  ;;  %v3376_v11 = vld [vmem:[#allocation10 + $0x2f8] sm:$0xff]  ;;  %v4449_v58 = vcombine.low %v3373_v8, %v3375_v9 }
 0x8b3   : > { %v4450_v13 = vcombine.high %v3373_v8, %v3375_v9  ;;  %v4452_v14 = vcombine.high %v3374_v10, %v3376_v11  ;;  %v4451_v60 = vcombine.low %v3374_v10, %v3376_v11  ;;  %v3356_v46 = vld [vmem:[#allocation10 + $0x78] sm:$0xff]  ;;  %v5052_v8 = vld [vmem:[#allocation13 + $0x3b0] sm:$0xff]  }
 0x8b4   : > { %v5053_v9 = vld [vmem:[#allocation13 + $0x368] sm:$0xff]  }
 0x8b5   : > { %v5054_v10 = vld [vmem:[#allocation13 + $0x3e8] sm:$0xff]  }
 0x8b6   : > { %v5055_v11 = vld [vmem:[#allocation13 + $0x328] sm:$0xff]  }
 0x8cc   : > { %v4597_v15 = vpop.f32.mrf.mxu1  ;;  %v4619_v16 = vpop.f32.mrf.mxu0 }
 0x8ce   : > { %v4598_v50 = vpop.f32.mrf.mxu1  ;;  %v4620_v18 = vpop.f32.mrf.mxu0 }
 0x8cf   : > { %v4599_v51 = vadd.f32 %v4598_v50, %v4597_v15  ;;  %v4621_v19 = vadd.f32 %v4620_v18, %v4619_v16  ;;  %v3369_v15 = vld [vmem:[#allocation10 + $0x230] sm:$0xff]  ;;  %v3370_v50 = vld [vmem:[#allocation10 + $0x238] sm:$0xff] }
 0x8d0   : > { %v4600_v20 = vpop.f32.mrf.mxu1  ;;  %v4622_v21 = vpop.f32.mrf.mxu0  ;;  %v3371_v16 = vld [vmem:[#allocation10 + $0x270] sm:$0xff]  ;;  %v3372_v18 = vld [vmem:[#allocation10 + $0x278] sm:$0xff] }
 0x8d1   : > { %v2667_v22 = vadd.f32 %v4599_v51, %v2435_v12  ;;  %v4455_v12 = vcombine.low %v3378_v53, %v3380_v54  ;;  %v4446_v62 = vcombine.high %v3369_v15, %v3371_v16  ;;  %v4448_v2 = vcombine.high %v3370_v50, %v3372_v18  ;;  %v3366_v51 = vld [vmem:[#allocation10 + $0x1b8] sm:$0xff] }
 0x8d2   : > { %v4601_v23 = vpop.f32.mrf.mxu1  ;;  %v4623_v24 = vpop.f32.mrf.mxu0  ;;  %v4445_v20 = vcombine.low %v3369_v15, %v3371_v16  ;;  %v4447_v21 = vcombine.low %v3370_v50, %v3372_v18  ;;  %v5061_v15 = vld [vmem:[#allocation13 + $0x358] sm:$0xff]  }
 0x8d3   : > { %v5794_v25 = vadd.f32 %v4621_v19, %v2667_v22  ;;  %v3368_v19 = vld [vmem:[#allocation10 + $0x1f8] sm:$0xff]  ;;  %v3361_v23 = vld [vmem:[#allocation10 + $0x130] sm:$0xff]  ;;  %v5062_v16 = vld [vmem:[#allocation13 + $0x3d8] sm:$0xff]  }
 0x8d4   : > { %v3363_v24 = vld [vmem:[#allocation10 + $0x170] sm:$0xff]  ;;  %v5063_v50 = vld [vmem:[#allocation13 + $0x318] sm:$0xff]  }
 0x8d5   : > { %v5064_v18 = vld [vmem:[#allocation13 + $0x398] sm:$0xff]  }
 0x8ec   : > { %v2960_v34 = vpop.f32.mrf.mxu1  ;;  %v3001_v35 = vpop.f32.mrf.mxu0 }
 0x8ed   : > { %v2961_v36 = vadd.f32 %v2960_v34, %v2749_v27  ;;  %v3002_v1 = vadd.f32 %v3001_v35, %v2757_v28  ;;  %v3364_v27 = vld [vmem:[#allocation10 + $0x178] sm:$0xff]  ;;  %v3357_v35 = vld [vmem:[#allocation10 + $0xb0] sm:$0xff] }
 0x8ee   : > { %v2962_v37 = vpop.f32.mrf.mxu1  ;;  %v3003_v38 = vpop.f32.mrf.mxu0  ;;  %v4440_v34 = vcombine.high %v3362_v26, %v3364_v27 }
 0x8ef   : > { %v2963_v39 = vadd.f32 %v2962_v37, %v2753_v31  ;;  %v3004_v40 = vadd.f32 %v3003_v38, %v2761_v33  ;;  %v3008_v41 = vmax.f32 %v2961_v36, 0.0  ;;  %v3010_v42 = vmax.f32 %v3002_v1, 0.0  ;;  %v3359_v36 = vld [vmem:[#allocation10 + $0xf0] sm:$0xff]  ;;  %v3358_v1 = vld [vmem:[#allocation10 + $0xb8] sm:$0xff] }
 0x8f0   : > { %v2964_v43 = vpop.f32.mrf.mxu1  ;;  %v3005_v45 = vpop.f32.mrf.mxu0  ;;  %v4443_v31 = vcombine.low %v3366_v51, %v3368_v19  ;;  %v4438_v33 = vcombine.high %v3361_v23, %v3363_v24  ;;  %v3360_v37 = vld [vmem:[#allocation10 + $0xf8] sm:$0xff]  ;;  %v4437_v38 = vcombine.low %v3361_v23, %v3363_v24 }
 0x8f1   : > { %v3009_v47 = vmax.f32 %v2963_v39, 0.0  ;;  %v3011_v48 = vmax.f32 %v3004_v40, 0.0  ;;  %v3012_v5 = vpack.c.bf16 %v3008_v41, %v3008_v41  ;;  %v3014_v6 = vpack.c.bf16 %v3010_v42, %v3010_v42  ;;  %v3353_v42 = vld [vmem:[#allocation10 + $0x30] sm:$0xff]  ;;  %v3354_v45 = vld [vmem:[#allocation10 + $0x38] sm:$0xff] }
 0x8f2   : > { %v2965_v55 = vpop.f32.mrf.mxu1  ;;  %v3006_v56 = vpop.f32.mrf.mxu0  ;;  %v4439_v39 = vcombine.low %v3362_v26, %v3364_v27  ;;  %v4434_v40 = vcombine.high %v3357_v35, %v3359_v36  ;;  %v4436_v41 = vcombine.high %v3358_v1, %v3360_v37  ;;  %v3355_v43 = vld [vmem:[#allocation10 + $0x70] sm:$0xff]  ;;  %v4432_v53 = vcombine.high %v3354_v45, %v3356_v46 }
 0x8f3   : > { %v3013_v57 = vpack.c.bf16 %v3009_v47, %v3009_v47  ;;  %v3015_v63 = vpack.c.bf16 %v3011_v48, %v3011_v48  ;;  %v4433_v47 = vcombine.low %v3357_v35, %v3359_v36  ;;  %v4435_v48 = vcombine.low %v3358_v1, %v3360_v37  ;;  %v5045_v56 = vld [vmem:[#allocation13 + $0x378] sm:$0xff]  }
 0x8f4   : > { %v4430_v49 = vcombine.high %v3353_v42, %v3355_v43  ;;  %v4429_v54 = vcombine.low %v3353_v42, %v3355_v43  ;;  %v4431_v55 = vcombine.low %v3354_v45, %v3356_v46 }
 0x8f5   : > { %3304 = vmatprep.mubr.bf16.mxu1 %v3013_v57  ;;  %3344 = vmatprep.mubr.bf16.mxu0 %v3015_v63  ;;  %v5046_v57 = vld [vmem:[#allocation13 + $0x3f8] sm:$0xff]  }
 0x8f6   : > { %3305 = vmatmul.mubr.bf16.vlgmr.msra.gmra.mxu1 %v3012_v5  ;;  %3345 = vmatmul.mubr.bf16.vlgmr.msra.gmra.mxu0 %v3014_v6  ;;  %v5047_v63 = vld [vmem:[#allocation13 + $0x338] sm:$0xff]   ;;  %v5049_v6 = vld [vmem:[#allocation13 + $0x370] sm:$0xff]  }
 0x8f7   : > { %3568 = vmatpush1.bf16.msra.mxu1 %v4457_v3  ;;  %3609 = vmatpush1.bf16.msra.mxu0 %v4459_v4  ;;  %v3365_v3 = vld [vmem:[#allocation10 + $0x1b0] sm:$0xff]  ;;  %v5048_v5 = vld [vmem:[#allocation13 + $0x3b8] sm:$0xff]  }
 0x8f8   : > { %3569 = vmatprep.subr.bf16.mxu1 %v4454_v29  ;;  %3610 = vmatprep.subr.bf16.mxu0 %v4456_v7  ;;  %v3367_v4 = vld [vmem:[#allocation10 + $0x1f0] sm:$0xff]  ;;  %v5050_v29 = vld [vmem:[#allocation13 + $0x3f0] sm:$0xff]  }
 0x8f9   : > { %3599 = vmatprep.mubr.bf16.mxu1 %v5345_v0  ;;  %3640 = vmatprep.mubr.bf16.mxu0 %v5345_v0  ;;  %v4442_v22 = vcombine.high %v3365_v3, %v3367_v4  ;;  %v4444_v0 = vcombine.high %v3366_v51, %v3368_v19  ;;  %v4441_v28 = vcombine.low %v3365_v3, %v3367_v4  ;;  %v5051_v7 = vld [vmem:[#allocation13 + $0x330] sm:$0xff]   ;;  %v5069_v3 = vld [vmem:[#allocation13 + $0x348] sm:$0xff]  }
 0x8fa   : > { %v5070_v4 = vld [vmem:[#allocation13 + $0x3c8] sm:$0xff]  }
 0x8fb   : > { %3570 = vmatpush1.bf16.msra.mxu1 %v4453_v61  ;;  %3611 = vmatpush1.bf16.msra.mxu0 %v4455_v12  ;;  %v5057_v61 = vld [vmem:[#allocation13 + $0x360] sm:$0xff]   ;;  %v5071_v51 = vld [vmem:[#allocation13 + $0x308] sm:$0xff]  }
 0x8fc   : > { %3571 = vmatprep.subr.bf16.mxu1 %v4450_v13  ;;  %3612 = vmatprep.subr.bf16.mxu0 %v4452_v14  ;;  %v5058_v12 = vld [vmem:[#allocation13 + $0x3e0] sm:$0xff]   ;;  %v5072_v19 = vld [vmem:[#allocation13 + $0x388] sm:$0xff]  }
 0x8fd   : > { %v5059_v13 = vld [vmem:[#allocation13 + $0x320] sm:$0xff]  }
 0x8fe   : > { %v5060_v14 = vld [vmem:[#allocation13 + $0x3a0] sm:$0xff]  }
 0x8ff   : > { %3572 = vmatpush1.bf16.msra.mxu1 %v4449_v58  ;;  %3613 = vmatpush1.bf16.msra.mxu0 %v4451_v60  ;;  %v5065_v58 = vld [vmem:[#allocation13 + $0x350] sm:$0xff]  }
 0x900   : > { %3573 = vmatprep.subr.bf16.mxu1 %v4446_v62  ;;  %3614 = vmatprep.subr.bf16.mxu0 %v4448_v2  ;;  %v5066_v60 = vld [vmem:[#allocation13 + $0x3d0] sm:$0xff]  }
 0x901   : > { %v5067_v62 = vld [vmem:[#allocation13 + $0x310] sm:$0xff]  }
 0x902   : > { %v5068_v2 = vld [vmem:[#allocation13 + $0x390] sm:$0xff]  }
 0x903   : > { %3574 = vmatpush1.bf16.msra.mxu1 %v4445_v20  ;;  %3615 = vmatpush1.bf16.msra.mxu0 %v4447_v21  ;;  %v5073_v20 = vld [vmem:[#allocation13 + $0x340] sm:$0xff]  }
 0x904   : > { %3575 = vmatprep.subr.bf16.mxu1 %v4442_v22  ;;  %3616 = vmatprep.subr.bf16.mxu0 %v4444_v0  ;;  %v5074_v21 = vld [vmem:[#allocation13 + $0x3c0] sm:$0xff]  }
 0x905   : > { %v5075_v22 = vld [vmem:[#allocation13 + $0x300] sm:$0xff]  }
 0x906   : > { %v5076_v0 = vld [vmem:[#allocation13 + $0x380] sm:$0xff]  }
 0x907   : > { %3576 = vmatpush1.bf16.msra.mxu1 %v4441_v28  ;;  %3617 = vmatpush1.bf16.msra.mxu0 %v4443_v31 }
 0x908   : > { %3577 = vmatprep.subr.bf16.mxu1 %v4438_v33  ;;  %3618 = vmatprep.subr.bf16.mxu0 %v4440_v34 }
 0x90b   : > { %3578 = vmatpush1.bf16.msra.mxu1 %v4437_v38  ;;  %3619 = vmatpush1.bf16.msra.mxu0 %v4439_v39  ;;  %v3385_v38 = vld [vmem:[#allocation12 + $0xc] sm:$0xf] }
 0x90c   : > { %3579 = vmatprep.subr.bf16.mxu1 %v4434_v40  ;;  %3620 = vmatprep.subr.bf16.mxu0 %v4436_v41  ;;  %v3390_v39 = vrot.slane %v3385_v38, %v5637_v30  ;;  %v3398_v40 = vrot.slane %v3385_v38, %v5658_v44  ;;  %v3394_v41 = vrot.slane %v3385_v38, %v5643_v32 }
 0x90d   : > { %v3402_v42 = vrot.slane %v3385_v38, %v5756_v59 }
 0x90f   : > { %3580 = vmatpush1.bf16.msra.mxu1 %v4433_v47  ;;  %3621 = vmatpush1.bf16.msra.mxu0 %v4435_v48 }
 0x910   : > { %3581 = vmatprep.subr.bf16.mxu1 %v4430_v49  ;;  %3622 = vmatprep.subr.bf16.mxu0 %v4432_v53 }
 0x913   : > { %3582 = vmatpush1.bf16.msra.mxu1 %v4429_v54  ;;  %3623 = vmatpush1.bf16.msra.mxu0 %v4431_v55 }
 0x914   : > { %4669 = vmatprep.subr.bf16.mxu1 %v5045_v56  ;;  %4691 = vmatprep.subr.bf16.mxu0 %v5046_v57 }
 0x916   : > { %3600 = vmatmul.mubr.bf16.vlgmr.msra.gmra.mxu1 %v5743_v52  ;;  %3641 = vmatmul.mubr.bf16.vlgmr.msra.gmra.mxu0 %v5743_v52  ;;  %v5056_v52 = vld [vmem:[#allocation13 + $0x3a8] sm:$0xff]  }
 0x917   : > { %4670 = vmatpush3.bf16.msra.mxu1 %v5047_v63  ;;  %4692 = vmatpush3.bf16.msra.mxu0 %v5048_v5 }
 0x918   : > { %4671 = vmatprep.subr.bf16.mxu1 %v5049_v6  ;;  %4693 = vmatprep.subr.bf16.mxu0 %v5050_v29 }
 0x91b   : > { %4672 = vmatpush3.bf16.msra.mxu1 %v5051_v7  ;;  %4694 = vmatpush3.bf16.msra.mxu0 %v5052_v8 }
 0x91c   : > { %4673 = vmatprep.subr.bf16.mxu1 %v5053_v9  ;;  %4695 = vmatprep.subr.bf16.mxu0 %v5054_v10 }
 0x91f   : > { %4674 = vmatpush3.bf16.msra.mxu1 %v5055_v11  ;;  %4696 = vmatpush3.bf16.msra.mxu0 %v5056_v52 }
 0x920   : > { %4675 = vmatprep.subr.bf16.mxu1 %v5057_v61  ;;  %4697 = vmatprep.subr.bf16.mxu0 %v5058_v12 }
 0x923   : > { %4676 = vmatpush3.bf16.msra.mxu1 %v5059_v13  ;;  %4698 = vmatpush3.bf16.msra.mxu0 %v5060_v14 }
 0x924   : > { %4677 = vmatprep.subr.bf16.mxu1 %v5061_v15  ;;  %4699 = vmatprep.subr.bf16.mxu0 %v5062_v16  ;;  %v4493_v16 = vld [vmem:[%s5871_s8] ss:$0 sm:$0xff] }
 0x927   : > { %4678 = vmatpush3.bf16.msra.mxu1 %v5063_v50  ;;  %4700 = vmatpush3.bf16.msra.mxu0 %v5064_v18 }
 0x928   : > { %4679 = vmatprep.subr.bf16.mxu1 %v5065_v58  ;;  %4701 = vmatprep.subr.bf16.mxu0 %v5066_v60 }
 0x92b   : > { %4680 = vmatpush3.bf16.msra.mxu1 %v5067_v62  ;;  %4702 = vmatpush3.bf16.msra.mxu0 %v5068_v2 }
 0x92c   : > { %4681 = vmatprep.subr.bf16.mxu1 %v5069_v3  ;;  %4703 = vmatprep.subr.bf16.mxu0 %v5070_v4 }
 0x92f   : > { %4682 = vmatpush3.bf16.msra.mxu1 %v5071_v51  ;;  %4704 = vmatpush3.bf16.msra.mxu0 %v5072_v19 }
 0x930   : > { %4683 = vmatprep.subr.bf16.mxu1 %v5073_v20  ;;  %4705 = vmatprep.subr.bf16.mxu0 %v5074_v21 }
 0x933   : > { %4684 = vmatpush3.bf16.msra.mxu1 %v5075_v22  ;;  %4706 = vmatpush3.bf16.msra.mxu0 %v5076_v0 }
 0x9b6   : > { %v4641_v23 = vpop.f32.mrf.mxu1  ;;  %v4663_v24 = vpop.f32.mrf.mxu0 }
 0x9b8   : > { %v4642_v26 = vpop.f32.mrf.mxu1  ;;  %v4664_v27 = vpop.f32.mrf.mxu0 }
 0x9b9   : > { %v4643_v28 = vadd.f32 %v4642_v26, %v4641_v23  ;;  %v4665_v31 = vadd.f32 %v4664_v27, %v4663_v24  ;;  %v4495_v23 = vld [vmem:[%s5875_s12] ss:$0 sm:$0xff]  ;;  %v4036_v24 = vld [vmem:[%s5598_s17] sm:$0xff]  ;;  %v4037_v26 = vstv %s4035_s3  ;;  %s5256_s17 = scalar_lea.vmem %s4056_s24, 128 }
 0x9ba   : > { %v4644_v33 = vpop.f32.mrf.mxu1  ;;  %v4666_v34 = vpop.f32.mrf.mxu0  ;;  %p5257_p0 = scmp.ne.s32.totalorder %s4056_s24, %s5256_s17 }
 0x9bb   : > { %v3347_v35 = vadd.f32 %v4665_v31, %v4643_v28  ;;  %v4033_v28 = vstv %s4032_s1  ;;  %v4038_v33 = vmul.f32 %v4037_v26, %v4036_v24  ;;  %s5351_s1 = smov [#allocation15]  }
 0x9bc   : > { %v4645_v36 = vpop.f32.mrf.mxu1  ;;  %v4667_v1 = vpop.f32.mrf.mxu0  ;;  %p5258_p5 = pnand %p5257_p0, %p5915_p2  ;;  %s5260_s3 = sshll.u32 %s5351_s1, 4  ;;  %s5261_s3 = int_to_ptr.vmem [resolvable:$false] %s5260_s3 }
 0x9bd   : > { %v3352_v37 = vadd.f32 %v3347_v35, %v5794_v25  ;;  %s5262_s20 = scalar_lea.vmem %s5261_s3, 256  ;;  %p5263_p12 = scmp.lt.s32.totalorder %s4056_s24, %s5261_s3 }
 0x9be   : > { %p5259_p8 = pneg %p5258_p5  ;;  %p5264_p3 = scmp.lt.s32.totalorder %s5262_s20, %s5256_s17 }
 0x9c0   : > { %p5265_p4 = por %p5264_p3, %p5263_p12 }
 0x9c2   : > { %p5266_p6 = pnand %p5265_p4, %p5259_p8 }
 0x9d6   : > { %v3601_v43 = vpop.f32.mrf.mxu1  ;;  %v3642_v45 = vpop.f32.mrf.mxu0 }
 0x9d7   : > { %v3602_v46 = vadd.f32 %v3601_v43, %v3390_v39  ;;  %v3643_v47 = vadd.f32 %v3642_v45, %v3398_v40 }
 0x9d8   : > { %v3603_v48 = vpop.f32.mrf.mxu1  ;;  %v3644_v49 = vpop.f32.mrf.mxu0 }
 0x9d9   : > { %v3604_v53 = vadd.f32 %v3603_v48, %v3394_v41  ;;  %v3645_v54 = vadd.f32 %v3644_v49, %v3402_v42  ;;  %v3649_v55 = vmax.f32 %v3602_v46, 0.0  ;;  %v3651_v56 = vmax.f32 %v3643_v47, 0.0 }
 0x9da   : > { %v3605_v25 = vpop.f32.mrf.mxu1  ;;  %v3646_v57 = vpop.f32.mrf.mxu0 }
 0x9db   : > { %v3650_v63 = vmax.f32 %v3604_v53, 0.0  ;;  %v3652_v30 = vmax.f32 %v3645_v54, 0.0  ;;  %v3653_v29 = vpack.c.bf16 %v3649_v55, %v3649_v55  ;;  %v3655_v59 = vpack.c.bf16 %v3651_v56, %v3651_v56 }
 0x9dc   : > { %v3606_v5 = vpop.f32.mrf.mxu1  ;;  %v3647_v44 = vpop.f32.mrf.mxu0 }
 0x9dd   : > { %v3654_v6 = vpack.c.bf16 %v3650_v63, %v3650_v63  ;;  %v3656_v32 = vpack.c.bf16 %v3652_v30, %v3652_v30 }
 0x9df   : > { %3945 = vmatprep.mubr.bf16.mxu1 %v3654_v6  ;;  %3985 = vmatprep.mubr.bf16.mxu0 %v3656_v32 }
 0x9e0   : > { %3946 = vmatmul.mubr.bf16.vlgmr.msra.gmra.mxu1 %v3653_v29  ;;  %3986 = vmatmul.mubr.bf16.vlgmr.msra.gmra.mxu0 %v3655_v59 }
 0xaa0   : > { %v4685_v7 = vpop.f32.mrf.mxu1  ;;  %v4707_v8 = vpop.f32.mrf.mxu0 }
 0xaa2   : > { %v4686_v9 = vpop.f32.mrf.mxu1  ;;  %v4708_v10 = vpop.f32.mrf.mxu0 }
 0xaa3   : > { %v4687_v11 = vadd.f32 %v4686_v9, %v4685_v7  ;;  %v4709_v52 = vadd.f32 %v4708_v10, %v4707_v8 }
 0xaa4   : > { %v4688_v61 = vpop.f32.mrf.mxu1  ;;  %v4710_v12 = vpop.f32.mrf.mxu0 }
 0xaa5   : > { %v3988_v13 = vadd.f32 %v4709_v52, %v4687_v11 }
 0xaa6   : > { %v4689_v14 = vpop.f32.mrf.mxu1  ;;  %v4711_v15 = vpop.f32.mrf.mxu0 }
 0xaa7   : > { %v3993_v50 = vadd.f32 %v3988_v13, %v3352_v37 }
 0xaa9   : > { %v4001_v18 = vadd.f32 %v4493_v16, %v3993_v50 }
 0xaab   : > { %v4002_v58 = vadd.f32 %v4001_v18, %v5739_v17  ;;  %v4494_v17 = vld [vmem:[%s5874_s11] ss:$0 sm:$0xff] }
 0xaad   : > { %4005 = vadd.xlane.f32.xlu0 %v4002_v58  ;;  %v4008_v60 = vmul.f32 %v4002_v58, %v4002_v58 }
 0xaaf   : > { %4009 = vadd.xlane.f32.xlu1 %v4008_v60 }
 0xb36   : > { %v4006_v62 = vpop.xlane.xlu0 %4005 }
 0xb37   : > { %v4007_v2 = vmul.f32 0.03125, %v4006_v62 }
 0xb38   : > { %v4010_v3 = vpop.xlane.xlu1 %4009 }
 0xb39   : > { %v4012_v4 = vmul.f32 %v4007_v2, %v4007_v2  ;;  %v4011_v51 = vmul.f32 0.03125, %v4010_v3  ;;  %v4014_v21 = vsub.f32 %v4002_v58, %v4007_v2 }
 0xb3b   : > { %v4013_v19 = vsub.f32 %v4011_v51, %v4012_v4 }
 0xb3d   : > { %v4015_v20 = vadd.f32 1e-05, %v4013_v19 }
 0xb3f   : > { %5095 = vrsqrt.f32 %v4015_v20 }
 0xb4c   : > { %v5096_v22 = vpop.eup %5095 }
 0xb4d   : > { %v4017_v0 = vmul.f32 %v5096_v22, %v4014_v21 }
 0xb4f   : > { %v4024_v27 = vmul.f32 %v4494_v17, %v4017_v0 }
 0xb51   : > { %v4031_v31 = vadd.f32 %v4495_v23, %v4024_v27 }
 0xb53   : > { %v4034_v34 = vmul.f32 %v4033_v28, %v4031_v31 }
 0xb55   : > { %v4039_v35 = vadd.f32 %v4038_v33, %v4034_v34 }
 0xb57   : > { %4040 = vst [vmem:[%s554_s30] sm:$0xff] %v4039_v35 }
 0xb58   : > { %5269 = shalt.err (!%p5266_p6)
}
 0xb59   : > { %s5270_s19 = scalar_lea.hbm %s4053_s23, 128  ;;  %s5274_s21 = scalar_lea.hbm %s5914_s13, 256 }
 0xb5a   : > { %p5271_p9 = scmp.ne.s32.totalorder %s4053_s23, %s5270_s19  ;;  %p5275_p1 = scmp.lt.s32.totalorder %s4053_s23, %s5914_s13 }
 0xb5b   : > { %p5276_p7 = scmp.lt.s32.totalorder %s5274_s21, %s5270_s19 }
 0xb5c   : > { %p5272_p10 = pnand %p5271_p9, %p5915_p2 }
 0xb5d   : > { %p5277_p13 = por %p5276_p7, %p5275_p1 }
 0xb5e   : > { %p5273_p11 = pneg %p5272_p10 }
 0xb60   : > { %p5278_p0 = pnand %p5277_p13, %p5273_p11 }
 0xb62   : > { %5281 = shalt.err (!%p5278_p0)
}
 0xb63   : > { %4823 = dma.vmem_to_hbm [thread:$0]  (%p5915_p2), %s4056_s24, 128, %s4053_s23, %s4042_s5  }
 0xb64 PF: > { %s4067_s30 = sand.u32 1, %s5320_s15   ;;  %p5916_p5 = scmp.ne.s32.totalorder %s5904_s25, 0 }
 0xb65   : > { %p5917_p8 = scmp.ge.s32.totalorder %s5332_s18, 2  ;;  %s4068_s22 = scalar_lea.sflag [#allocation6], %s4067_s30 }
 0xb67   : > { %p4846_p12 = pnand %p5917_p8, %p5916_p5 }
 0xb69   : > { %p4847_p3 = pneg %p4846_p12 }
 0xb6b   : > { %5315 = dma.done.wait (%p4847_p3), %s4068_s22, 128  }
 0xb6c   : > { %5317 = vsyncadd (%p4847_p3), %s4068_s22, 4294967168  ;;  %s5918_s26 = sld [smem:[#allocation21_spill]]  ;;  %p31_p4 = scmp.ge.s32.totalorder %s5529_s27, 4  }
 0xb6d   : > { %s5919_s17 = sld [smem:[#allocation22_spill]]  ;;  %s5920_s15 = smov %s5324_s16 }
 0xb6e   : > { %s5922_s18 = smov %s5529_s27  ;;  %33 = sbr.rel (!%p31_p4) target bundleno = 16 (0x10), region = 141 }
 0xb72   : > { %s5921_s16 = smov %s5918_s26 }
 0xb73   :  { %4073 = vsyncpa [#allocation5], 1 }
 0xb74   :  { %4075 = vsyncpa [#allocation5 + $0x1], 1 }
 0xb75   :  { %4076 = vsyncpa [#allocation8], 1 }
 0xb76   :  { %4077 = vsyncpa [#allocation11], 1 }
 0xb77   :  { %4078 = vsyncpa [#allocation14], 1 }
 0xb78   :  { %4079 = vsyncpa [#allocation6], 1 }
 0xb79   :  { %4081 = vsyncpa [#allocation6 + $0x1], 1 }

</bundles_post_ra>
